<compile_context>
chip_gen: v7x
topology: tpu7x:2x2x1
jax: 0.10.0
libtpu: 0.0.40
codegen_flags: <defaults>
</compile_context>

<pallas_src>
import functools

import jax
import jax.numpy as jnp
from jax import lax
from jax.experimental import pallas as pl
from jax.experimental.pallas import tpu as pltpu


_VMEM = pl.BlockSpec(memory_space=pltpu.MemorySpace.VMEM)


# ----------------------------------------------------------------------------
# Fused bidirectional LSTM layer kernel (both directions, time-chunked grid)
# ----------------------------------------------------------------------------
def _bilstm_kernel(xf_ref, xb_ref, wih_ref, whh_ref, b_ref,
                   yf_ref, yb_ref, xpf, xpb, h_scr, c_scr):
    """grid=(num_time_chunks,), both directions fused per grid step.

    xf_ref: [Tc*Bp, Din] bf16  forward-time chunk c of the input
    xb_ref: [Tc*Bp, Din] bf16  chunk (nc-1-c) of the input (backward direction)
    wih_ref:[2, Din, 4H] bf16  per-direction input weights, gate cols [i|f|o|g]
    whh_ref:[2H, 8H]     f32   block-diag recurrent weights (fwd block | bwd block)
    b_ref:  [2, 1, 4H]   f32   per-direction b_ih + b_hh, gate cols [i|f|o|g]
    yf_ref: [Tc*Bp, H]   f32   forward hidden states of chunk c
    yb_ref: [Tc*Bp, H]   f32   backward hidden states of chunk (nc-1-c)
    xpf/xpb:[Tc*Bp, 4H]  f32   scratch: hoisted input projections
    h_scr/c_scr:[Bp, 2H] f32   scratch: [h_fwd | h_bwd] state, carried over chunks
    """
    H = whh_ref.shape[0] // 2
    H4 = 4 * H
    Bp = h_scr.shape[0]
    Tc = yf_ref.shape[0] // Bp

    c_idx = pl.program_id(0)

    @pl.when(c_idx == 0)
    def _():
        h_scr[...] = jnp.zeros_like(h_scr)
        c_scr[...] = jnp.zeros_like(c_scr)

    # Hoisted, time-independent input projection (+ bias): two big bf16 MXU
    # matmuls per chunk instead of Tc tiny per-step matmuls.  f32 accumulate.
    xpf[...] = (jnp.dot(xf_ref[...], wih_ref[0],
                        preferred_element_type=jnp.float32) + b_ref[0])
    xpb[...] = (jnp.dot(xb_ref[...], wih_ref[1],
                        preferred_element_type=jnp.float32) + b_ref[1])

    whh = whh_ref[...]  # hoist weight read out of the serial loop

    def step(s, carry):
        # Aligned row offsets (Bp is a multiple of 8): fwd time s, bwd time Tc-1-s.
        offf = pl.multiple_of(s * Bp, Bp)
        offb = pl.multiple_of((Tc - 1 - s) * Bp, Bp)

        # One fused recurrent matmul for BOTH directions (block-diagonal W_hh):
        # N = 8H fills the 256-wide MXU, and the two dependence chains
        # interleave to hide each other's latency on single-TC chips.
        rec = jnp.dot(h_scr[...], whh, preferred_element_type=jnp.float32)  # [Bp, 8H]
        gf = xpf[pl.ds(offf, Bp), :] + rec[:, :H4]
        gb = xpb[pl.ds(offb, Bp), :] + rec[:, H4:]

        # Gate layout [i | f | o | g]: sigmoid over a contiguous 3H slab,
        # tanh over the last H only (halves EUP work vs full-width sig+tanh).
        sf = jax.nn.sigmoid(gf[:, :3 * H])
        sb = jax.nn.sigmoid(gb[:, :3 * H])
        ggf = jnp.tanh(gf[:, 3 * H:])
        ggb = jnp.tanh(gb[:, 3 * H:])

        c_f = sf[:, H:2 * H] * c_scr[:, :H] + sf[:, :H] * ggf
        c_b = sb[:, H:2 * H] * c_scr[:, H:] + sb[:, :H] * ggb
        h_f = sf[:, 2 * H:] * jnp.tanh(c_f)
        h_b = sb[:, 2 * H:] * jnp.tanh(c_b)

        c_scr[:, :H] = c_f
        c_scr[:, H:] = c_b
        h_scr[:, :H] = h_f
        h_scr[:, H:] = h_b
        yf_ref[pl.ds(offf, Bp), :] = h_f
        yb_ref[pl.ds(offb, Bp), :] = h_b
        return carry

    # Bounded trip count (chunk length) -> full unroll for LLO visibility.
    lax.fori_loop(0, Tc, step, 0, unroll=True)


def _pick_time_chunk(T, Bp, target=32):
    """Largest divisor of T <= target whose row-block is bf16-tile friendly."""
    if T <= target:
        return T
    for tc in range(target, 1, -1):
        if T % tc == 0 and (tc * Bp) % 16 == 0:
            return tc
    return T  # fall back to a single full-sequence chunk


def bilstm_layer(x2d_bf16, wih, whh_big, b, *, T, Bp, t_chunk_target=32):
    """One fused bidirectional LSTM layer.

    x2d_bf16: [T*Bp, Din] bf16 time-major input (row block t = time step t).
    Returns (y_fwd, y_bwd), each [T*Bp, H] f32 in forward time order.
    """
    TB, Din = x2d_bf16.shape
    assert TB == T * Bp
    H = whh_big.shape[0] // 2
    Tc = _pick_time_chunk(T, Bp, t_chunk_target)
    nc = T // Tc

    yf, yb = pl.pallas_call(
        _bilstm_kernel,
        out_shape=(jax.ShapeDtypeStruct((T * Bp, H), jnp.float32),
                   jax.ShapeDtypeStruct((T * Bp, H), jnp.float32)),
        grid=(nc,),
        in_specs=[
            # Forward direction consumes chunks 0..nc-1, backward nc-1..0.
            pl.BlockSpec((Tc * Bp, Din), lambda c: (c, 0)),
            pl.BlockSpec((Tc * Bp, Din), lambda c: (nc - 1 - c, 0)),
            pl.BlockSpec((2, Din, 4 * H), lambda c: (0, 0, 0)),
            pl.BlockSpec((2 * H, 8 * H), lambda c: (0, 0)),
            pl.BlockSpec((2, 1, 4 * H), lambda c: (0, 0, 0)),
        ],
        out_specs=(
            pl.BlockSpec((Tc * Bp, H), lambda c: (c, 0)),
            pl.BlockSpec((Tc * Bp, H), lambda c: (nc - 1 - c, 0)),
        ),
        scratch_shapes=[
            pltpu.VMEM((Tc * Bp, 4 * H), jnp.float32),  # fwd projection (chunk)
            pltpu.VMEM((Tc * Bp, 4 * H), jnp.float32),  # bwd projection (chunk)
            pltpu.VMEM((Bp, 2 * H), jnp.float32),       # [h_fwd | h_bwd]
            pltpu.VMEM((Bp, 2 * H), jnp.float32),       # [c_fwd | c_bwd]
        ],
        compiler_params=pltpu.CompilerParams(
            # Time chunks are sequential (h/c carried in scratch).
            dimension_semantics=("arbitrary",)),
    )(x2d_bf16, x2d_bf16, wih, whh_big, b)
    return yf, yb


# ----------------------------------------------------------------------------
# Classifier kernel: Linear(2H->4H) + LeakyReLU + Linear(4H->H) + LeakyReLU
#                    + Linear(H->C).  Dropouts are identity (eval mode).
# ----------------------------------------------------------------------------
def _classifier_kernel(x_ref, w1_ref, b1_ref, w2_ref, b2_ref, w3_ref, b3_ref,
                       o_ref):
    def leaky(v):
        return jnp.where(v > 0, v, 0.01 * v)

    h = leaky(jnp.dot(x_ref[...], w1_ref[...],
                      preferred_element_type=jnp.float32) + b1_ref[...])
    h = leaky(jnp.dot(h, w2_ref[...],
                      preferred_element_type=jnp.float32) + b2_ref[...])
    o_ref[...] = (jnp.dot(h, w3_ref[...],
                          preferred_element_type=jnp.float32) + b3_ref[...])


def classifier(x_b2h, w1, b1, w2, b2, w3p, b3p):
    """x_b2h: [Bp, 2H] -> padded logits [Bp, Cp] (lane-dense output)."""
    Bp = x_b2h.shape[0]
    Cp = w3p.shape[1]
    return pl.pallas_call(
        _classifier_kernel,
        out_shape=jax.ShapeDtypeStruct((Bp, Cp), jnp.float32),
        in_specs=[_VMEM] * 7,
        out_specs=_VMEM,
    )(x_b2h, w1, b1, w2, b2, w3p, b3p)


# ----------------------------------------------------------------------------
# Full forward pass
# ----------------------------------------------------------------------------
@functools.partial(jax.jit, static_argnames=("num_layers",))
def lstm_forward(X, params, num_layers=2):
    """X: [B, T] int32 token ids -> logits [B, num_class]."""
    B, T = X.shape
    emb = params["embed"][X]                    # [B, T, E]  embedding gather (glue)
    x = jnp.transpose(emb, (1, 0, 2))           # [T, B, E]  time-major
    Bp = max(8, -(-B // 8) * 8)                 # pad batch to a sublane multiple
    if Bp != B:
        x = jnp.pad(x, ((0, 0), (0, Bp - B), (0, 0)))
    x2d = x.reshape(T * Bp, -1)                 # [T*Bp, E]

    for layer in range(num_layers):
        p = params["lstm"][layer]
        yf, yb = bilstm_layer(x2d.astype(jnp.bfloat16),
                              p["wih"], p["whh"], p["b"], T=T, Bp=Bp)
        x2d = jnp.concatenate([yf, yb], axis=-1)          # [T*Bp, 2H] (fwd || bwd)

    last = x2d[(T - 1) * Bp:]                   # [Bp, 2H]  == out[:, -1, :]
    logits = classifier(last, params["w1"], params["b1"],
                        params["w2"], params["b2"],
                        params["w3p"], params["b3p"])
    C = params["b3"].shape[0]
    return logits[:B, :C]


# ----------------------------------------------------------------------------
# Deterministic parameter initialization (matches module __init__ shapes)
# ----------------------------------------------------------------------------
def _reorder_ifgo_to_ifog(w):
    """Permute gate columns from PyTorch's [i|f|g|o] to the kernel's [i|f|o|g]."""
    H = w.shape[-1] // 4
    return jnp.concatenate([w[..., :2 * H], w[..., 3 * H:], w[..., 2 * H:3 * H]],
                           axis=-1)


def init_params(key, total_word, embed_size, hidden_size, num_class, num_layers,
                padding_index=0):
    def keygen(k):
        while True:
            k, sub = jax.random.split(k)
            yield sub

    ki = keygen(key)

    def xavier(k, fan_in, fan_out):
        limit = (6.0 / (fan_in + fan_out)) ** 0.5
        return jax.random.uniform(k, (fan_in, fan_out), jnp.float32, -limit, limit)

    # Embedding: default N(0,1), padding row zeroed (nn.Embedding(padding_idx=0)).
    embed = jax.random.normal(next(ki), (total_word, embed_size), jnp.float32)
    embed = embed.at[padding_index].set(0.0)

    H = hidden_size
    bound = 1.0 / (H ** 0.5)

    def u(kk, shape):
        return jax.random.uniform(kk, shape, jnp.float32, -bound, bound)

    lstm_layers = []
    for layer in range(num_layers):
        din = embed_size if layer == 0 else 2 * H
        wih_d, whh_d, b_d = [], [], []
        for _ in range(2):                       # direction 0 = fwd, 1 = bwd
            wih_d.append(_reorder_ifgo_to_ifog(u(next(ki), (din, 4 * H))))
            whh_d.append(_reorder_ifgo_to_ifog(u(next(ki), (H, 4 * H))))
            b_d.append(_reorder_ifgo_to_ifog(u(next(ki), (1, 4 * H))
                                             + u(next(ki), (1, 4 * H))))
        # Input weights in bf16 (MXU-native, half HBM/VMEM traffic).
        wih = jnp.stack(wih_d).astype(jnp.bfloat16)             # [2, din, 4H]
        # Block-diagonal recurrent weights: one fused [2H, 8H] matmul per step.
        whh_big = jnp.zeros((2 * H, 8 * H), jnp.float32)
        whh_big = whh_big.at[:H, :4 * H].set(whh_d[0])
        whh_big = whh_big.at[H:, 4 * H:].set(whh_d[1])
        b = jnp.stack(b_d)                                       # [2, 1, 4H]
        lstm_layers.append({"wih": wih, "whh": whh_big, "b": b})

    # Classifier: xavier_uniform weights, zero biases (initialize_weights()).
    w1 = xavier(next(ki), 2 * H, 4 * H)
    w2 = xavier(next(ki), 4 * H, H)
    w3 = xavier(next(ki), H, num_class)
    Cp = max(128, -(-num_class // 128) * 128)    # lane-dense (padded) output
    w3p = jnp.zeros((H, Cp), jnp.float32).at[:, :num_class].set(w3)
    b3 = jnp.zeros((num_class,), jnp.float32)
    b3p = jnp.zeros((1, Cp), jnp.float32).at[:, :num_class].set(b3)

    return {
        "embed": embed,
        "lstm": lstm_layers,
        "w1": w1, "b1": jnp.zeros((1, 4 * H), jnp.float32),
        "w2": w2, "b2": jnp.zeros((1, H), jnp.float32),
        "w3p": w3p, "b3p": b3p, "b3": b3,
    }


# ----------------------------------------------------------------------------
if __name__ == "__main__":
    TOTAL_WORD = 64
    NUM_CLASS = 4
    EMBED_SIZE = 32
    HIDDEN_SIZE = 32
    NUM_LAYERS = 2
    BATCH = 2
    SEQ = 8

    key = jax.random.PRNGKey(0)
    k_params, k_tokens = jax.random.split(key)

    params = init_params(k_params, TOTAL_WORD, EMBED_SIZE, HIDDEN_SIZE,
                         NUM_CLASS, NUM_LAYERS)

    # token ids in [1, TOTAL_WORD) (0 is the padding index)
    X = jax.random.randint(k_tokens, (BATCH, SEQ), 1, TOTAL_WORD, jnp.int32)

    logits = lstm_forward(X, params, num_layers=NUM_LAYERS)
    logits = jax.block_until_ready(logits)

    assert logits.shape == (BATCH, NUM_CLASS)
    assert logits.dtype == jnp.float32
    assert bool(jnp.all(jnp.isfinite(logits)))
    print("KERNEL_OK")
</pallas_src>

<mosaic_0001>
module attributes {stable_mosaic.version = 11 : i64} {
  func.func @_classifier_kernel(%arg0: memref<8x64xf32, #tpu.memory_space<vmem>>, %arg1: memref<64x128xf32, #tpu.memory_space<vmem>>, %arg2: memref<1x128xf32, #tpu.memory_space<vmem>>, %arg3: memref<128x32xf32, #tpu.memory_space<vmem>>, %arg4: memref<1x32xf32, #tpu.memory_space<vmem>>, %arg5: memref<32x128xf32, #tpu.memory_space<vmem>>, %arg6: memref<1x128xf32, #tpu.memory_space<vmem>>, %arg7: memref<8x128xf32, #tpu.memory_space<vmem>>) attributes {dimension_semantics = [], scalar_prefetch = 0 : i64, scratch_operands = 0 : i64, tpu.core_type = #tpu.core_type<tc>} {
    %c0 = arith.constant 0 : index
    %c0_0 = arith.constant 0 : index
    %0 = vector.load %arg0[%c0, %c0_0] : memref<8x64xf32, #tpu.memory_space<vmem>>, vector<8x64xf32>
    %c0_1 = arith.constant 0 : index
    %c0_2 = arith.constant 0 : index
    %1 = vector.load %arg1[%c0_1, %c0_2] : memref<64x128xf32, #tpu.memory_space<vmem>>, vector<64x128xf32>
    %cst = arith.constant dense<0.000000e+00> : vector<8x128xf32>
    %2 = tpu.matmul %0, %1, %cst {dimension_numbers = #tpu.dot_dimension_numbers<[1], [0], [0], [1], [0, 0, 1, 1], [], []>} : vector<8x64xf32>, vector<64x128xf32>, vector<8x128xf32> -> vector<8x128xf32>
    %c0_3 = arith.constant 0 : index
    %c0_4 = arith.constant 0 : index
    %3 = vector.load %arg2[%c0_3, %c0_4] : memref<1x128xf32, #tpu.memory_space<vmem>>, vector<1x128xf32>
    %4 = vector.broadcast %3 : vector<1x128xf32> to vector<8x128xf32>
    %5 = arith.addf %2, %4 : vector<8x128xf32>
    %cst_5 = arith.constant 0.000000e+00 : f32
    %6 = vector.broadcast %cst_5 : f32 to vector<8x128xf32>
    %7 = arith.cmpf ogt, %5, %6 : vector<8x128xf32>
    %cst_6 = arith.constant 0.00999999977 : f32
    %8 = vector.broadcast %cst_6 : f32 to vector<8x128xf32>
    %9 = arith.mulf %8, %5 : vector<8x128xf32>
    %10 = arith.select %7, %5, %9 : vector<8x128xi1>, vector<8x128xf32>
    %c0_7 = arith.constant 0 : index
    %c0_8 = arith.constant 0 : index
    %11 = vector.load %arg3[%c0_7, %c0_8] : memref<128x32xf32, #tpu.memory_space<vmem>>, vector<128x32xf32>
    %cst_9 = arith.constant dense<0.000000e+00> : vector<8x32xf32>
    %12 = tpu.matmul %10, %11, %cst_9 {dimension_numbers = #tpu.dot_dimension_numbers<[1], [0], [0], [1], [0, 0, 1, 1], [], []>} : vector<8x128xf32>, vector<128x32xf32>, vector<8x32xf32> -> vector<8x32xf32>
    %c0_10 = arith.constant 0 : index
    %c0_11 = arith.constant 0 : index
    %13 = vector.load %arg4[%c0_10, %c0_11] : memref<1x32xf32, #tpu.memory_space<vmem>>, vector<1x32xf32>
    %14 = vector.broadcast %13 : vector<1x32xf32> to vector<8x32xf32>
    %15 = arith.addf %12, %14 : vector<8x32xf32>
    %cst_12 = arith.constant 0.000000e+00 : f32
    %16 = vector.broadcast %cst_12 : f32 to vector<8x32xf32>
    %17 = arith.cmpf ogt, %15, %16 : vector<8x32xf32>
    %cst_13 = arith.constant 0.00999999977 : f32
    %18 = vector.broadcast %cst_13 : f32 to vector<8x32xf32>
    %19 = arith.mulf %18, %15 : vector<8x32xf32>
    %20 = arith.select %17, %15, %19 : vector<8x32xi1>, vector<8x32xf32>
    %c0_14 = arith.constant 0 : index
    %c0_15 = arith.constant 0 : index
    %21 = vector.load %arg5[%c0_14, %c0_15] : memref<32x128xf32, #tpu.memory_space<vmem>>, vector<32x128xf32>
    %cst_16 = arith.constant dense<0.000000e+00> : vector<8x128xf32>
    %22 = tpu.matmul %20, %21, %cst_16 {dimension_numbers = #tpu.dot_dimension_numbers<[1], [0], [0], [1], [0, 0, 1, 1], [], []>} : vector<8x32xf32>, vector<32x128xf32>, vector<8x128xf32> -> vector<8x128xf32>
    %c0_17 = arith.constant 0 : index
    %c0_18 = arith.constant 0 : index
    %23 = vector.load %arg6[%c0_17, %c0_18] : memref<1x128xf32, #tpu.memory_space<vmem>>, vector<1x128xf32>
    %24 = vector.broadcast %23 : vector<1x128xf32> to vector<8x128xf32>
    %25 = arith.addf %22, %24 : vector<8x128xf32>
    %c0_19 = arith.constant 0 : index
    %c0_20 = arith.constant 0 : index
    %26 = vector.load %arg7[%c0_19, %c0_20] : memref<8x128xf32, #tpu.memory_space<vmem>>, vector<8x128xf32>
    tpu.vector_store %arg7[%c0_19, %c0_20], %25 {strides = array<i32>} : memref<8x128xf32, #tpu.memory_space<vmem>>, vector<8x128xf32>,
    return
  }
}

module attributes {stable_mosaic.version = 11 : i64} {
  func.func @_bilstm_kernel(%arg0: i32, %arg1: memref<64x32xbf16, #tpu.memory_space<vmem>>, %arg2: memref<64x32xbf16, #tpu.memory_space<vmem>>, %arg3: memref<2x32x128xbf16, #tpu.memory_space<vmem>>, %arg4: memref<64x256xf32, #tpu.memory_space<vmem>>, %arg5: memref<2x1x128xf32, #tpu.memory_space<vmem>>, %arg6: memref<64x32xf32, #tpu.memory_space<vmem>>, %arg7: memref<64x32xf32, #tpu.memory_space<vmem>>, %arg8: memref<64x128xf32, #tpu.memory_space<vmem>>, %arg9: memref<64x128xf32, #tpu.memory_space<vmem>>, %arg10: memref<8x64xf32, #tpu.memory_space<vmem>>, %arg11: memref<8x64xf32, #tpu.memory_space<vmem>>) attributes {dimension_semantics = [#tpu.dimension_semantics<arbitrary>], iteration_bounds = array<i64: 1>, scalar_prefetch = 0 : i64, scratch_operands = 4 : i64, tpu.core_type = #tpu.core_type<tc>, window_params = [{transform_indices = @transform_0, window_bounds = array<i64: 64, 32>}, {transform_indices = @transform_1, window_bounds = array<i64: 64, 32>}, {pipeline_mode = #tpu.pipeline_mode<synchronous>, transform_indices = @transform_2, window_bounds = array<i64: 2, 32, 128>}, {pipeline_mode = #tpu.pipeline_mode<synchronous>, transform_indices = @transform_3, window_bounds = array<i64: 64, 256>}, {pipeline_mode = #tpu.pipeline_mode<synchronous>, transform_indices = @transform_4, window_bounds = array<i64: 2, 1, 128>}, {transform_indices = @transform_5, window_bounds = array<i64: 64, 32>}, {transform_indices = @transform_6, window_bounds = array<i64: 64, 32>}]} {
    %c0_i32 = arith.constant 0 : i32
    %0 = arith.cmpi eq, %arg0, %c0_i32 : i32
    %1 = arith.extui %0 : i1 to i32
    %c0_i32_0 = arith.constant 0 : i32
    %2 = arith.cmpi ne, %1, %c0_i32_0 : i32
    scf.if %2 {
      %cst_214 = arith.constant 0.000000e+00 : f32
      %478 = vector.broadcast %cst_214 : f32 to vector<8x64xf32>
      %c0_215 = arith.constant 0 : index
      %c0_216 = arith.constant 0 : index
      %479 = vector.load %arg10[%c0_215, %c0_216] : memref<8x64xf32, #tpu.memory_space<vmem>>, vector<8x64xf32>
      tpu.vector_store %arg10[%c0_215, %c0_216], %478 {strides = array<i32>} : memref<8x64xf32, #tpu.memory_space<vmem>>, vector<8x64xf32>,
      %cst_217 = arith.constant 0.000000e+00 : f32
      %480 = vector.broadcast %cst_217 : f32 to vector<8x64xf32>
      %c0_218 = arith.constant 0 : index
      %c0_219 = arith.constant 0 : index
      %481 = vector.load %arg11[%c0_218, %c0_219] : memref<8x64xf32, #tpu.memory_space<vmem>>, vector<8x64xf32>
      tpu.vector_store %arg11[%c0_218, %c0_219], %480 {strides = array<i32>} : memref<8x64xf32, #tpu.memory_space<vmem>>, vector<8x64xf32>,
    } else {
    }
    %c0 = arith.constant 0 : index
    %c0_1 = arith.constant 0 : index
    %3 = vector.load %arg1[%c0, %c0_1] : memref<64x32xbf16, #tpu.memory_space<vmem>>, vector<64x32xbf16>
    %c0_2 = arith.constant 0 : index
    %c0_3 = arith.constant 0 : index
    %c0_4 = arith.constant 0 : index
    %4 = vector.load %arg3[%c0_2, %c0_3, %c0_4] : memref<2x32x128xbf16, #tpu.memory_space<vmem>>, vector<1x32x128xbf16>
    %5 = vector.shape_cast %4 : vector<1x32x128xbf16> to vector<32x128xbf16>
    %cst = arith.constant dense<0.000000e+00> : vector<64x128xf32>
    %6 = tpu.matmul %3, %5, %cst {dimension_numbers = #tpu.dot_dimension_numbers<[1], [0], [0], [1], [0, 0, 1, 1], [], []>} : vector<64x32xbf16>, vector<32x128xbf16>, vector<64x128xf32> -> vector<64x128xf32>
    %c0_5 = arith.constant 0 : index
    %c0_6 = arith.constant 0 : index
    %c0_7 = arith.constant 0 : index
    %7 = vector.load %arg5[%c0_5, %c0_6, %c0_7] : memref<2x1x128xf32, #tpu.memory_space<vmem>>, vector<1x1x128xf32>
    %8 = vector.shape_cast %7 : vector<1x1x128xf32> to vector<1x128xf32>
    %9 = vector.broadcast %8 : vector<1x128xf32> to vector<64x128xf32>
    %10 = arith.addf %6, %9 : vector<64x128xf32>
    %c0_8 = arith.constant 0 : index
    %c0_9 = arith.constant 0 : index
    %11 = vector.load %arg8[%c0_8, %c0_9] : memref<64x128xf32, #tpu.memory_space<vmem>>, vector<64x128xf32>
    tpu.vector_store %arg8[%c0_8, %c0_9], %10 {strides = array<i32>} : memref<64x128xf32, #tpu.memory_space<vmem>>, vector<64x128xf32>,
    %c0_10 = arith.constant 0 : index
    %c0_11 = arith.constant 0 : index
    %12 = vector.load %arg2[%c0_10, %c0_11] : memref<64x32xbf16, #tpu.memory_space<vmem>>, vector<64x32xbf16>
    %c1 = arith.constant 1 : index
    %c0_12 = arith.constant 0 : index
    %c0_13 = arith.constant 0 : index
    %13 = vector.load %arg3[%c1, %c0_12, %c0_13] : memref<2x32x128xbf16, #tpu.memory_space<vmem>>, vector<1x32x128xbf16>
    %14 = vector.shape_cast %13 : vector<1x32x128xbf16> to vector<32x128xbf16>
    %cst_14 = arith.constant dense<0.000000e+00> : vector<64x128xf32>
    %15 = tpu.matmul %12, %14, %cst_14 {dimension_numbers = #tpu.dot_dimension_numbers<[1], [0], [0], [1], [0, 0, 1, 1], [], []>} : vector<64x32xbf16>, vector<32x128xbf16>, vector<64x128xf32> -> vector<64x128xf32>
    %c1_15 = arith.constant 1 : index
    %c0_16 = arith.constant 0 : index
    %c0_17 = arith.constant 0 : index
    %16 = vector.load %arg5[%c1_15, %c0_16, %c0_17] : memref<2x1x128xf32, #tpu.memory_space<vmem>>, vector<1x1x128xf32>
    %17 = vector.shape_cast %16 : vector<1x1x128xf32> to vector<1x128xf32>
    %18 = vector.broadcast %17 : vector<1x128xf32> to vector<64x128xf32>
    %19 = arith.addf %15, %18 : vector<64x128xf32>
    %c0_18 = arith.constant 0 : index
    %c0_19 = arith.constant 0 : index
    %20 = vector.load %arg9[%c0_18, %c0_19] : memref<64x128xf32, #tpu.memory_space<vmem>>, vector<64x128xf32>
    tpu.vector_store %arg9[%c0_18, %c0_19], %19 {strides = array<i32>} : memref<64x128xf32, #tpu.memory_space<vmem>>, vector<64x128xf32>,
    %c0_20 = arith.constant 0 : index
    %c0_21 = arith.constant 0 : index
    %21 = vector.load %arg4[%c0_20, %c0_21] : memref<64x256xf32, #tpu.memory_space<vmem>>, vector<64x256xf32>
    %c0_i32_22 = arith.constant 0 : i32
    %c8_i32 = arith.constant 8 : i32
    %22 = arith.muli %c0_i32_22, %c8_i32 : i32
    %23 = tpu.assume_multiple %22, 8 : i32
    %c7_i32 = arith.constant 7 : i32
    %24 = arith.subi %c7_i32, %c0_i32_22 : i32
    %c8_i32_23 = arith.constant 8 : i32
    %25 = arith.muli %24, %c8_i32_23 : i32
    %26 = tpu.assume_multiple %25, 8 : i32
    %c0_24 = arith.constant 0 : index
    %c0_25 = arith.constant 0 : index
    %27 = vector.load %arg10[%c0_24, %c0_25] : memref<8x64xf32, #tpu.memory_space<vmem>>, vector<8x64xf32>
    %cst_26 = arith.constant dense<0.000000e+00> : vector<8x256xf32>
    %28 = tpu.matmul %27, %21, %cst_26 {dimension_numbers = #tpu.dot_dimension_numbers<[1], [0], [0], [1], [0, 0, 1, 1], [], []>} : vector<8x64xf32>, vector<64x256xf32>, vector<8x256xf32> -> vector<8x256xf32>
    %29 = arith.index_cast %23 : i32 to index
    %c0_27 = arith.constant 0 : index
    %30 = vector.load %arg8[%29, %c0_27] : memref<64x128xf32, #tpu.memory_space<vmem>>, vector<8x128xf32>
    %31 = vector.extract_strided_slice %28 {offsets = [0, 0], sizes = [8, 128], strides = [1, 1]} : vector<8x256xf32> to vector<8x128xf32>
    %32 = arith.addf %30, %31 : vector<8x128xf32>
    %33 = arith.index_cast %26 : i32 to index
    %c0_28 = arith.constant 0 : index
    %34 = vector.load %arg9[%33, %c0_28] : memref<64x128xf32, #tpu.memory_space<vmem>>, vector<8x128xf32>
    %35 = vector.extract_strided_slice %28 {offsets = [0, 128], sizes = [8, 128], strides = [1, 1]} : vector<8x256xf32> to vector<8x128xf32>
    %36 = arith.addf %34, %35 : vector<8x128xf32>
    %37 = vector.extract_strided_slice %32 {offsets = [0, 0], sizes = [8, 96], strides = [1, 1]} : vector<8x128xf32> to vector<8x96xf32>
    %38 = arith.negf %37 : vector<8x96xf32>
    %39 = math.exp %38 : vector<8x96xf32>
    %cst_29 = arith.constant 1.000000e+00 : f32
    %40 = vector.broadcast %cst_29 : f32 to vector<8x96xf32>
    %41 = arith.addf %40, %39 : vector<8x96xf32>
    %42 = arith.divf %40, %41 : vector<8x96xf32>
    %43 = vector.extract_strided_slice %36 {offsets = [0, 0], sizes = [8, 96], strides = [1, 1]} : vector<8x128xf32> to vector<8x96xf32>
    %44 = arith.negf %43 : vector<8x96xf32>
    %45 = math.exp %44 : vector<8x96xf32>
    %cst_30 = arith.constant 1.000000e+00 : f32
    %46 = vector.broadcast %cst_30 : f32 to vector<8x96xf32>
    %47 = arith.addf %46, %45 : vector<8x96xf32>
    %48 = arith.divf %46, %47 : vector<8x96xf32>
    %49 = vector.extract_strided_slice %32 {offsets = [0, 96], sizes = [8, 32], strides = [1, 1]} : vector<8x128xf32> to vector<8x32xf32>
    %50 = math.tanh %49 : vector<8x32xf32>
    %51 = vector.extract_strided_slice %36 {offsets = [0, 96], sizes = [8, 32], strides = [1, 1]} : vector<8x128xf32> to vector<8x32xf32>
    %52 = math.tanh %51 : vector<8x32xf32>
    %53 = vector.extract_strided_slice %42 {offsets = [0, 32], sizes = [8, 32], strides = [1, 1]} : vector<8x96xf32> to vector<8x32xf32>
    %c0_31 = arith.constant 0 : index
    %c0_32 = arith.constant 0 : index
    %54 = vector.load %arg11[%c0_31, %c0_32] : memref<8x64xf32, #tpu.memory_space<vmem>>, vector<8x32xf32>
    %55 = arith.mulf %53, %54 : vector<8x32xf32>
    %56 = vector.extract_strided_slice %42 {offsets = [0, 0], sizes = [8, 32], strides = [1, 1]} : vector<8x96xf32> to vector<8x32xf32>
    %57 = arith.mulf %56, %50 : vector<8x32xf32>
    %58 = arith.addf %55, %57 : vector<8x32xf32>
    %59 = vector.extract_strided_slice %48 {offsets = [0, 32], sizes = [8, 32], strides = [1, 1]} : vector<8x96xf32> to vector<8x32xf32>
    %c0_33 = arith.constant 0 : index
    %c32 = arith.constant 32 : index
    %60 = vector.load %arg11[%c0_33, %c32] : memref<8x64xf32, #tpu.memory_space<vmem>>, vector<8x32xf32>
    %61 = arith.mulf %59, %60 : vector<8x32xf32>
    %62 = vector.extract_strided_slice %48 {offsets = [0, 0], sizes = [8, 32], strides = [1, 1]} : vector<8x96xf32> to vector<8x32xf32>
    %63 = arith.mulf %62, %52 : vector<8x32xf32>
    %64 = arith.addf %61, %63 : vector<8x32xf32>
    %65 = vector.extract_strided_slice %42 {offsets = [0, 64], sizes = [8, 32], strides = [1, 1]} : vector<8x96xf32> to vector<8x32xf32>
    %66 = math.tanh %58 : vector<8x32xf32>
    %67 = arith.mulf %65, %66 : vector<8x32xf32>
    %68 = vector.extract_strided_slice %48 {offsets = [0, 64], sizes = [8, 32], strides = [1, 1]} : vector<8x96xf32> to vector<8x32xf32>
    %69 = math.tanh %64 : vector<8x32xf32>
    %70 = arith.mulf %68, %69 : vector<8x32xf32>
    %c0_34 = arith.constant 0 : index
    %c0_35 = arith.constant 0 : index
    %71 = vector.load %arg11[%c0_34, %c0_35] : memref<8x64xf32, #tpu.memory_space<vmem>>, vector<8x32xf32>
    tpu.vector_store %arg11[%c0_34, %c0_35], %58 {strides = array<i32>} : memref<8x64xf32, #tpu.memory_space<vmem>>, vector<8x32xf32>,
    %c0_36 = arith.constant 0 : index
    %c32_37 = arith.constant 32 : index
    %72 = vector.load %arg11[%c0_36, %c32_37] : memref<8x64xf32, #tpu.memory_space<vmem>>, vector<8x32xf32>
    tpu.vector_store %arg11[%c0_36, %c32_37], %64 {strides = array<i32>} : memref<8x64xf32, #tpu.memory_space<vmem>>, vector<8x32xf32>,
    %c0_38 = arith.constant 0 : index
    %c0_39 = arith.constant 0 : index
    %73 = vector.load %arg10[%c0_38, %c0_39] : memref<8x64xf32, #tpu.memory_space<vmem>>, vector<8x32xf32>
    tpu.vector_store %arg10[%c0_38, %c0_39], %67 {strides = array<i32>} : memref<8x64xf32, #tpu.memory_space<vmem>>, vector<8x32xf32>,
    %c0_40 = arith.constant 0 : index
    %c32_41 = arith.constant 32 : index
    %74 = vector.load %arg10[%c0_40, %c32_41] : memref<8x64xf32, #tpu.memory_space<vmem>>, vector<8x32xf32>
    tpu.vector_store %arg10[%c0_40, %c32_41], %70 {strides = array<i32>} : memref<8x64xf32, #tpu.memory_space<vmem>>, vector<8x32xf32>,
    %75 = arith.index_cast %23 : i32 to index
    %c0_42 = arith.constant 0 : index
    %76 = vector.load %arg6[%75, %c0_42] : memref<64x32xf32, #tpu.memory_space<vmem>>, vector<8x32xf32>
    tpu.vector_store %arg6[%75, %c0_42], %67 {strides = array<i32>} : memref<64x32xf32, #tpu.memory_space<vmem>>, vector<8x32xf32>,
    %77 = arith.index_cast %26 : i32 to index
    %c0_43 = arith.constant 0 : index
    %78 = vector.load %arg7[%77, %c0_43] : memref<64x32xf32, #tpu.memory_space<vmem>>, vector<8x32xf32>
    tpu.vector_store %arg7[%77, %c0_43], %70 {strides = array<i32>} : memref<64x32xf32, #tpu.memory_space<vmem>>, vector<8x32xf32>,
    %c1_i32 = arith.constant 1 : i32
    %c8_i32_44 = arith.constant 8 : i32
    %79 = arith.muli %c1_i32, %c8_i32_44 : i32
    %80 = tpu.assume_multiple %79, 8 : i32
    %c7_i32_45 = arith.constant 7 : i32
    %81 = arith.subi %c7_i32_45, %c1_i32 : i32
    %c8_i32_46 = arith.constant 8 : i32
    %82 = arith.muli %81, %c8_i32_46 : i32
    %83 = tpu.assume_multiple %82, 8 : i32
    %c0_47 = arith.constant 0 : index
    %c0_48 = arith.constant 0 : index
    %84 = vector.load %arg10[%c0_47, %c0_48] : memref<8x64xf32, #tpu.memory_space<vmem>>, vector<8x64xf32>
    %cst_49 = arith.constant dense<0.000000e+00> : vector<8x256xf32>
    %85 = tpu.matmul %84, %21, %cst_49 {dimension_numbers = #tpu.dot_dimension_numbers<[1], [0], [0], [1], [0, 0, 1, 1], [], []>} : vector<8x64xf32>, vector<64x256xf32>, vector<8x256xf32> -> vector<8x256xf32>
    %86 = arith.index_cast %80 : i32 to index
    %c0_50 = arith.constant 0 : index
    %87 = vector.load %arg8[%86, %c0_50] : memref<64x128xf32, #tpu.memory_space<vmem>>, vector<8x128xf32>
    %88 = vector.extract_strided_slice %85 {offsets = [0, 0], sizes = [8, 128], strides = [1, 1]} : vector<8x256xf32> to vector<8x128xf32>
    %89 = arith.addf %87, %88 : vector<8x128xf32>
    %90 = arith.index_cast %83 : i32 to index
    %c0_51 = arith.constant 0 : index
    %91 = vector.load %arg9[%90, %c0_51] : memref<64x128xf32, #tpu.memory_space<vmem>>, vector<8x128xf32>
    %92 = vector.extract_strided_slice %85 {offsets = [0, 128], sizes = [8, 128], strides = [1, 1]} : vector<8x256xf32> to vector<8x128xf32>
    %93 = arith.addf %91, %92 : vector<8x128xf32>
    %94 = vector.extract_strided_slice %89 {offsets = [0, 0], sizes = [8, 96], strides = [1, 1]} : vector<8x128xf32> to vector<8x96xf32>
    %95 = arith.negf %94 : vector<8x96xf32>
    %96 = math.exp %95 : vector<8x96xf32>
    %cst_52 = arith.constant 1.000000e+00 : f32
    %97 = vector.broadcast %cst_52 : f32 to vector<8x96xf32>
    %98 = arith.addf %97, %96 : vector<8x96xf32>
    %99 = arith.divf %97, %98 : vector<8x96xf32>
    %100 = vector.extract_strided_slice %93 {offsets = [0, 0], sizes = [8, 96], strides = [1, 1]} : vector<8x128xf32> to vector<8x96xf32>
    %101 = arith.negf %100 : vector<8x96xf32>
    %102 = math.exp %101 : vector<8x96xf32>
    %cst_53 = arith.constant 1.000000e+00 : f32
    %103 = vector.broadcast %cst_53 : f32 to vector<8x96xf32>
    %104 = arith.addf %103, %102 : vector<8x96xf32>
    %105 = arith.divf %103, %104 : vector<8x96xf32>
    %106 = vector.extract_strided_slice %89 {offsets = [0, 96], sizes = [8, 32], strides = [1, 1]} : vector<8x128xf32> to vector<8x32xf32>
    %107 = math.tanh %106 : vector<8x32xf32>
    %108 = vector.extract_strided_slice %93 {offsets = [0, 96], sizes = [8, 32], strides = [1, 1]} : vector<8x128xf32> to vector<8x32xf32>
    %109 = math.tanh %108 : vector<8x32xf32>
    %110 = vector.extract_strided_slice %99 {offsets = [0, 32], sizes = [8, 32], strides = [1, 1]} : vector<8x96xf32> to vector<8x32xf32>
    %c0_54 = arith.constant 0 : index
    %c0_55 = arith.constant 0 : index
    %111 = vector.load %arg11[%c0_54, %c0_55] : memref<8x64xf32, #tpu.memory_space<vmem>>, vector<8x32xf32>
    %112 = arith.mulf %110, %111 : vector<8x32xf32>
    %113 = vector.extract_strided_slice %99 {offsets = [0, 0], sizes = [8, 32], strides = [1, 1]} : vector<8x96xf32> to vector<8x32xf32>
    %114 = arith.mulf %113, %107 : vector<8x32xf32>
    %115 = arith.addf %112, %114 : vector<8x32xf32>
    %116 = vector.extract_strided_slice %105 {offsets = [0, 32], sizes = [8, 32], strides = [1, 1]} : vector<8x96xf32> to vector<8x32xf32>
    %c0_56 = arith.constant 0 : index
    %c32_57 = arith.constant 32 : index
    %117 = vector.load %arg11[%c0_56, %c32_57] : memref<8x64xf32, #tpu.memory_space<vmem>>, vector<8x32xf32>
    %118 = arith.mulf %116, %117 : vector<8x32xf32>
    %119 = vector.extract_strided_slice %105 {offsets = [0, 0], sizes = [8, 32], strides = [1, 1]} : vector<8x96xf32> to vector<8x32xf32>
    %120 = arith.mulf %119, %109 : vector<8x32xf32>
    %121 = arith.addf %118, %120 : vector<8x32xf32>
    %122 = vector.extract_strided_slice %99 {offsets = [0, 64], sizes = [8, 32], strides = [1, 1]} : vector<8x96xf32> to vector<8x32xf32>
    %123 = math.tanh %115 : vector<8x32xf32>
    %124 = arith.mulf %122, %123 : vector<8x32xf32>
    %125 = vector.extract_strided_slice %105 {offsets = [0, 64], sizes = [8, 32], strides = [1, 1]} : vector<8x96xf32> to vector<8x32xf32>
    %126 = math.tanh %121 : vector<8x32xf32>
    %127 = arith.mulf %125, %126 : vector<8x32xf32>
    %c0_58 = arith.constant 0 : index
    %c0_59 = arith.constant 0 : index
    %128 = vector.load %arg11[%c0_58, %c0_59] : memref<8x64xf32, #tpu.memory_space<vmem>>, vector<8x32xf32>
    tpu.vector_store %arg11[%c0_58, %c0_59], %115 {strides = array<i32>} : memref<8x64xf32, #tpu.memory_space<vmem>>, vector<8x32xf32>,
    %c0_60 = arith.constant 0 : index
    %c32_61 = arith.constant 32 : index
    %129 = vector.load %arg11[%c0_60, %c32_61] : memref<8x64xf32, #tpu.memory_space<vmem>>, vector<8x32xf32>
    tpu.vector_store %arg11[%c0_60, %c32_61], %121 {strides = array<i32>} : memref<8x64xf32, #tpu.memory_space<vmem>>, vector<8x32xf32>,
    %c0_62 = arith.constant 0 : index
    %c0_63 = arith.constant 0 : index
    %130 = vector.load %arg10[%c0_62, %c0_63] : memref<8x64xf32, #tpu.memory_space<vmem>>, vector<8x32xf32>
    tpu.vector_store %arg10[%c0_62, %c0_63], %124 {strides = array<i32>} : memref<8x64xf32, #tpu.memory_space<vmem>>, vector<8x32xf32>,
    %c0_64 = arith.constant 0 : index
    %c32_65 = arith.constant 32 : index
    %131 = vector.load %arg10[%c0_64, %c32_65] : memref<8x64xf32, #tpu.memory_space<vmem>>, vector<8x32xf32>
    tpu.vector_store %arg10[%c0_64, %c32_65], %127 {strides = array<i32>} : memref<8x64xf32, #tpu.memory_space<vmem>>, vector<8x32xf32>,
    %132 = arith.index_cast %80 : i32 to index
    %c0_66 = arith.constant 0 : index
    %133 = vector.load %arg6[%132, %c0_66] : memref<64x32xf32, #tpu.memory_space<vmem>>, vector<8x32xf32>
    tpu.vector_store %arg6[%132, %c0_66], %124 {strides = array<i32>} : memref<64x32xf32, #tpu.memory_space<vmem>>, vector<8x32xf32>,
    %134 = arith.index_cast %83 : i32 to index
    %c0_67 = arith.constant 0 : index
    %135 = vector.load %arg7[%134, %c0_67] : memref<64x32xf32, #tpu.memory_space<vmem>>, vector<8x32xf32>
    tpu.vector_store %arg7[%134, %c0_67], %127 {strides = array<i32>} : memref<64x32xf32, #tpu.memory_space<vmem>>, vector<8x32xf32>,
    %c2_i32 = arith.constant 2 : i32
    %c8_i32_68 = arith.constant 8 : i32
    %136 = arith.muli %c2_i32, %c8_i32_68 : i32
    %137 = tpu.assume_multiple %136, 8 : i32
    %c7_i32_69 = arith.constant 7 : i32
    %138 = arith.subi %c7_i32_69, %c2_i32 : i32
    %c8_i32_70 = arith.constant 8 : i32
    %139 = arith.muli %138, %c8_i32_70 : i32
    %140 = tpu.assume_multiple %139, 8 : i32
    %c0_71 = arith.constant 0 : index
    %c0_72 = arith.constant 0 : index
    %141 = vector.load %arg10[%c0_71, %c0_72] : memref<8x64xf32, #tpu.memory_space<vmem>>, vector<8x64xf32>
    %cst_73 = arith.constant dense<0.000000e+00> : vector<8x256xf32>
    %142 = tpu.matmul %141, %21, %cst_73 {dimension_numbers = #tpu.dot_dimension_numbers<[1], [0], [0], [1], [0, 0, 1, 1], [], []>} : vector<8x64xf32>, vector<64x256xf32>, vector<8x256xf32> -> vector<8x256xf32>
    %143 = arith.index_cast %137 : i32 to index
    %c0_74 = arith.constant 0 : index
    %144 = vector.load %arg8[%143, %c0_74] : memref<64x128xf32, #tpu.memory_space<vmem>>, vector<8x128xf32>
    %145 = vector.extract_strided_slice %142 {offsets = [0, 0], sizes = [8, 128], strides = [1, 1]} : vector<8x256xf32> to vector<8x128xf32>
    %146 = arith.addf %144, %145 : vector<8x128xf32>
    %147 = arith.index_cast %140 : i32 to index
    %c0_75 = arith.constant 0 : index
    %148 = vector.load %arg9[%147, %c0_75] : memref<64x128xf32, #tpu.memory_space<vmem>>, vector<8x128xf32>
    %149 = vector.extract_strided_slice %142 {offsets = [0, 128], sizes = [8, 128], strides = [1, 1]} : vector<8x256xf32> to vector<8x128xf32>
    %150 = arith.addf %148, %149 : vector<8x128xf32>
    %151 = vector.extract_strided_slice %146 {offsets = [0, 0], sizes = [8, 96], strides = [1, 1]} : vector<8x128xf32> to vector<8x96xf32>
    %152 = arith.negf %151 : vector<8x96xf32>
    %153 = math.exp %152 : vector<8x96xf32>
    %cst_76 = arith.constant 1.000000e+00 : f32
    %154 = vector.broadcast %cst_76 : f32 to vector<8x96xf32>
    %155 = arith.addf %154, %153 : vector<8x96xf32>
    %156 = arith.divf %154, %155 : vector<8x96xf32>
    %157 = vector.extract_strided_slice %150 {offsets = [0, 0], sizes = [8, 96], strides = [1, 1]} : vector<8x128xf32> to vector<8x96xf32>
    %158 = arith.negf %157 : vector<8x96xf32>
    %159 = math.exp %158 : vector<8x96xf32>
    %cst_77 = arith.constant 1.000000e+00 : f32
    %160 = vector.broadcast %cst_77 : f32 to vector<8x96xf32>
    %161 = arith.addf %160, %159 : vector<8x96xf32>
    %162 = arith.divf %160, %161 : vector<8x96xf32>
    %163 = vector.extract_strided_slice %146 {offsets = [0, 96], sizes = [8, 32], strides = [1, 1]} : vector<8x128xf32> to vector<8x32xf32>
    %164 = math.tanh %163 : vector<8x32xf32>
    %165 = vector.extract_strided_slice %150 {offsets = [0, 96], sizes = [8, 32], strides = [1, 1]} : vector<8x128xf32> to vector<8x32xf32>
    %166 = math.tanh %165 : vector<8x32xf32>
    %167 = vector.extract_strided_slice %156 {offsets = [0, 32], sizes = [8, 32], strides = [1, 1]} : vector<8x96xf32> to vector<8x32xf32>
    %c0_78 = arith.constant 0 : index
    %c0_79 = arith.constant 0 : index
    %168 = vector.load %arg11[%c0_78, %c0_79] : memref<8x64xf32, #tpu.memory_space<vmem>>, vector<8x32xf32>
    %169 = arith.mulf %167, %168 : vector<8x32xf32>
    %170 = vector.extract_strided_slice %156 {offsets = [0, 0], sizes = [8, 32], strides = [1, 1]} : vector<8x96xf32> to vector<8x32xf32>
    %171 = arith.mulf %170, %164 : vector<8x32xf32>
    %172 = arith.addf %169, %171 : vector<8x32xf32>
    %173 = vector.extract_strided_slice %162 {offsets = [0, 32], sizes = [8, 32], strides = [1, 1]} : vector<8x96xf32> to vector<8x32xf32>
    %c0_80 = arith.constant 0 : index
    %c32_81 = arith.constant 32 : index
    %174 = vector.load %arg11[%c0_80, %c32_81] : memref<8x64xf32, #tpu.memory_space<vmem>>, vector<8x32xf32>
    %175 = arith.mulf %173, %174 : vector<8x32xf32>
    %176 = vector.extract_strided_slice %162 {offsets = [0, 0], sizes = [8, 32], strides = [1, 1]} : vector<8x96xf32> to vector<8x32xf32>
    %177 = arith.mulf %176, %166 : vector<8x32xf32>
    %178 = arith.addf %175, %177 : vector<8x32xf32>
    %179 = vector.extract_strided_slice %156 {offsets = [0, 64], sizes = [8, 32], strides = [1, 1]} : vector<8x96xf32> to vector<8x32xf32>
    %180 = math.tanh %172 : vector<8x32xf32>
    %181 = arith.mulf %179, %180 : vector<8x32xf32>
    %182 = vector.extract_strided_slice %162 {offsets = [0, 64], sizes = [8, 32], strides = [1, 1]} : vector<8x96xf32> to vector<8x32xf32>
    %183 = math.tanh %178 : vector<8x32xf32>
    %184 = arith.mulf %182, %183 : vector<8x32xf32>
    %c0_82 = arith.constant 0 : index
    %c0_83 = arith.constant 0 : index
    %185 = vector.load %arg11[%c0_82, %c0_83] : memref<8x64xf32, #tpu.memory_space<vmem>>, vector<8x32xf32>
    tpu.vector_store %arg11[%c0_82, %c0_83], %172 {strides = array<i32>} : memref<8x64xf32, #tpu.memory_space<vmem>>, vector<8x32xf32>,
    %c0_84 = arith.constant 0 : index
    %c32_85 = arith.constant 32 : index
    %186 = vector.load %arg11[%c0_84, %c32_85] : memref<8x64xf32, #tpu.memory_space<vmem>>, vector<8x32xf32>
    tpu.vector_store %arg11[%c0_84, %c32_85], %178 {strides = array<i32>} : memref<8x64xf32, #tpu.memory_space<vmem>>, vector<8x32xf32>,
    %c0_86 = arith.constant 0 : index
    %c0_87 = arith.constant 0 : index
    %187 = vector.load %arg10[%c0_86, %c0_87] : memref<8x64xf32, #tpu.memory_space<vmem>>, vector<8x32xf32>
    tpu.vector_store %arg10[%c0_86, %c0_87], %181 {strides = array<i32>} : memref<8x64xf32, #tpu.memory_space<vmem>>, vector<8x32xf32>,
    %c0_88 = arith.constant 0 : index
    %c32_89 = arith.constant 32 : index
    %188 = vector.load %arg10[%c0_88, %c32_89] : memref<8x64xf32, #tpu.memory_space<vmem>>, vector<8x32xf32>
    tpu.vector_store %arg10[%c0_88, %c32_89], %184 {strides = array<i32>} : memref<8x64xf32, #tpu.memory_space<vmem>>, vector<8x32xf32>,
    %189 = arith.index_cast %137 : i32 to index
    %c0_90 = arith.constant 0 : index
    %190 = vector.load %arg6[%189, %c0_90] : memref<64x32xf32, #tpu.memory_space<vmem>>, vector<8x32xf32>
    tpu.vector_store %arg6[%189, %c0_90], %181 {strides = array<i32>} : memref<64x32xf32, #tpu.memory_space<vmem>>, vector<8x32xf32>,
    %191 = arith.index_cast %140 : i32 to index
    %c0_91 = arith.constant 0 : index
    %192 = vector.load %arg7[%191, %c0_91] : memref<64x32xf32, #tpu.memory_space<vmem>>, vector<8x32xf32>
    tpu.vector_store %arg7[%191, %c0_91], %184 {strides = array<i32>} : memref<64x32xf32, #tpu.memory_space<vmem>>, vector<8x32xf32>,
    %c3_i32 = arith.constant 3 : i32
    %c8_i32_92 = arith.constant 8 : i32
    %193 = arith.muli %c3_i32, %c8_i32_92 : i32
    %194 = tpu.assume_multiple %193, 8 : i32
    %c7_i32_93 = arith.constant 7 : i32
    %195 = arith.subi %c7_i32_93, %c3_i32 : i32
    %c8_i32_94 = arith.constant 8 : i32
    %196 = arith.muli %195, %c8_i32_94 : i32
    %197 = tpu.assume_multiple %196, 8 : i32
    %c0_95 = arith.constant 0 : index
    %c0_96 = arith.constant 0 : index
    %198 = vector.load %arg10[%c0_95, %c0_96] : memref<8x64xf32, #tpu.memory_space<vmem>>, vector<8x64xf32>
    %cst_97 = arith.constant dense<0.000000e+00> : vector<8x256xf32>
    %199 = tpu.matmul %198, %21, %cst_97 {dimension_numbers = #tpu.dot_dimension_numbers<[1], [0], [0], [1], [0, 0, 1, 1], [], []>} : vector<8x64xf32>, vector<64x256xf32>, vector<8x256xf32> -> vector<8x256xf32>
    %200 = arith.index_cast %194 : i32 to index
    %c0_98 = arith.constant 0 : index
    %201 = vector.load %arg8[%200, %c0_98] : memref<64x128xf32, #tpu.memory_space<vmem>>, vector<8x128xf32>
    %202 = vector.extract_strided_slice %199 {offsets = [0, 0], sizes = [8, 128], strides = [1, 1]} : vector<8x256xf32> to vector<8x128xf32>
    %203 = arith.addf %201, %202 : vector<8x128xf32>
    %204 = arith.index_cast %197 : i32 to index
    %c0_99 = arith.constant 0 : index
    %205 = vector.load %arg9[%204, %c0_99] : memref<64x128xf32, #tpu.memory_space<vmem>>, vector<8x128xf32>
    %206 = vector.extract_strided_slice %199 {offsets = [0, 128], sizes = [8, 128], strides = [1, 1]} : vector<8x256xf32> to vector<8x128xf32>
    %207 = arith.addf %205, %206 : vector<8x128xf32>
    %208 = vector.extract_strided_slice %203 {offsets = [0, 0], sizes = [8, 96], strides = [1, 1]} : vector<8x128xf32> to vector<8x96xf32>
    %209 = arith.negf %208 : vector<8x96xf32>
    %210 = math.exp %209 : vector<8x96xf32>
    %cst_100 = arith.constant 1.000000e+00 : f32
    %211 = vector.broadcast %cst_100 : f32 to vector<8x96xf32>
    %212 = arith.addf %211, %210 : vector<8x96xf32>
    %213 = arith.divf %211, %212 : vector<8x96xf32>
    %214 = vector.extract_strided_slice %207 {offsets = [0, 0], sizes = [8, 96], strides = [1, 1]} : vector<8x128xf32> to vector<8x96xf32>
    %215 = arith.negf %214 : vector<8x96xf32>
    %216 = math.exp %215 : vector<8x96xf32>
    %cst_101 = arith.constant 1.000000e+00 : f32
    %217 = vector.broadcast %cst_101 : f32 to vector<8x96xf32>
    %218 = arith.addf %217, %216 : vector<8x96xf32>
    %219 = arith.divf %217, %218 : vector<8x96xf32>
    %220 = vector.extract_strided_slice %203 {offsets = [0, 96], sizes = [8, 32], strides = [1, 1]} : vector<8x128xf32> to vector<8x32xf32>
    %221 = math.tanh %220 : vector<8x32xf32>
    %222 = vector.extract_strided_slice %207 {offsets = [0, 96], sizes = [8, 32], strides = [1, 1]} : vector<8x128xf32> to vector<8x32xf32>
    %223 = math.tanh %222 : vector<8x32xf32>
    %224 = vector.extract_strided_slice %213 {offsets = [0, 32], sizes = [8, 32], strides = [1, 1]} : vector<8x96xf32> to vector<8x32xf32>
    %c0_102 = arith.constant 0 : index
    %c0_103 = arith.constant 0 : index
    %225 = vector.load %arg11[%c0_102, %c0_103] : memref<8x64xf32, #tpu.memory_space<vmem>>, vector<8x32xf32>
    %226 = arith.mulf %224, %225 : vector<8x32xf32>
    %227 = vector.extract_strided_slice %213 {offsets = [0, 0], sizes = [8, 32], strides = [1, 1]} : vector<8x96xf32> to vector<8x32xf32>
    %228 = arith.mulf %227, %221 : vector<8x32xf32>
    %229 = arith.addf %226, %228 : vector<8x32xf32>
    %230 = vector.extract_strided_slice %219 {offsets = [0, 32], sizes = [8, 32], strides = [1, 1]} : vector<8x96xf32> to vector<8x32xf32>
    %c0_104 = arith.constant 0 : index
    %c32_105 = arith.constant 32 : index
    %231 = vector.load %arg11[%c0_104, %c32_105] : memref<8x64xf32, #tpu.memory_space<vmem>>, vector<8x32xf32>
    %232 = arith.mulf %230, %231 : vector<8x32xf32>
    %233 = vector.extract_strided_slice %219 {offsets = [0, 0], sizes = [8, 32], strides = [1, 1]} : vector<8x96xf32> to vector<8x32xf32>
    %234 = arith.mulf %233, %223 : vector<8x32xf32>
    %235 = arith.addf %232, %234 : vector<8x32xf32>
    %236 = vector.extract_strided_slice %213 {offsets = [0, 64], sizes = [8, 32], strides = [1, 1]} : vector<8x96xf32> to vector<8x32xf32>
    %237 = math.tanh %229 : vector<8x32xf32>
    %238 = arith.mulf %236, %237 : vector<8x32xf32>
    %239 = vector.extract_strided_slice %219 {offsets = [0, 64], sizes = [8, 32], strides = [1, 1]} : vector<8x96xf32> to vector<8x32xf32>
    %240 = math.tanh %235 : vector<8x32xf32>
    %241 = arith.mulf %239, %240 : vector<8x32xf32>
    %c0_106 = arith.constant 0 : index
    %c0_107 = arith.constant 0 : index
    %242 = vector.load %arg11[%c0_106, %c0_107] : memref<8x64xf32, #tpu.memory_space<vmem>>, vector<8x32xf32>
    tpu.vector_store %arg11[%c0_106, %c0_107], %229 {strides = array<i32>} : memref<8x64xf32, #tpu.memory_space<vmem>>, vector<8x32xf32>,
    %c0_108 = arith.constant 0 : index
    %c32_109 = arith.constant 32 : index
    %243 = vector.load %arg11[%c0_108, %c32_109] : memref<8x64xf32, #tpu.memory_space<vmem>>, vector<8x32xf32>
    tpu.vector_store %arg11[%c0_108, %c32_109], %235 {strides = array<i32>} : memref<8x64xf32, #tpu.memory_space<vmem>>, vector<8x32xf32>,
    %c0_110 = arith.constant 0 : index
    %c0_111 = arith.constant 0 : index
    %244 = vector.load %arg10[%c0_110, %c0_111] : memref<8x64xf32, #tpu.memory_space<vmem>>, vector<8x32xf32>
    tpu.vector_store %arg10[%c0_110, %c0_111], %238 {strides = array<i32>} : memref<8x64xf32, #tpu.memory_space<vmem>>, vector<8x32xf32>,
    %c0_112 = arith.constant 0 : index
    %c32_113 = arith.constant 32 : index
    %245 = vector.load %arg10[%c0_112, %c32_113] : memref<8x64xf32, #tpu.memory_space<vmem>>, vector<8x32xf32>
    tpu.vector_store %arg10[%c0_112, %c32_113], %241 {strides = array<i32>} : memref<8x64xf32, #tpu.memory_space<vmem>>, vector<8x32xf32>,
    %246 = arith.index_cast %194 : i32 to index
    %c0_114 = arith.constant 0 : index
    %247 = vector.load %arg6[%246, %c0_114] : memref<64x32xf32, #tpu.memory_space<vmem>>, vector<8x32xf32>
    tpu.vector_store %arg6[%246, %c0_114], %238 {strides = array<i32>} : memref<64x32xf32, #tpu.memory_space<vmem>>, vector<8x32xf32>,
    %248 = arith.index_cast %197 : i32 to index
    %c0_115 = arith.constant 0 : index
    %249 = vector.load %arg7[%248, %c0_115] : memref<64x32xf32, #tpu.memory_space<vmem>>, vector<8x32xf32>
    tpu.vector_store %arg7[%248, %c0_115], %241 {strides = array<i32>} : memref<64x32xf32, #tpu.memory_space<vmem>>, vector<8x32xf32>,
    %c4_i32 = arith.constant 4 : i32
    %c8_i32_116 = arith.constant 8 : i32
    %250 = arith.muli %c4_i32, %c8_i32_116 : i32
    %251 = tpu.assume_multiple %250, 8 : i32
    %c7_i32_117 = arith.constant 7 : i32
    %252 = arith.subi %c7_i32_117, %c4_i32 : i32
    %c8_i32_118 = arith.constant 8 : i32
    %253 = arith.muli %252, %c8_i32_118 : i32
    %254 = tpu.assume_multiple %253, 8 : i32
    %c0_119 = arith.constant 0 : index
    %c0_120 = arith.constant 0 : index
    %255 = vector.load %arg10[%c0_119, %c0_120] : memref<8x64xf32, #tpu.memory_space<vmem>>, vector<8x64xf32>
    %cst_121 = arith.constant dense<0.000000e+00> : vector<8x256xf32>
    %256 = tpu.matmul %255, %21, %cst_121 {dimension_numbers = #tpu.dot_dimension_numbers<[1], [0], [0], [1], [0, 0, 1, 1], [], []>} : vector<8x64xf32>, vector<64x256xf32>, vector<8x256xf32> -> vector<8x256xf32>
    %257 = arith.index_cast %251 : i32 to index
    %c0_122 = arith.constant 0 : index
    %258 = vector.load %arg8[%257, %c0_122] : memref<64x128xf32, #tpu.memory_space<vmem>>, vector<8x128xf32>
    %259 = vector.extract_strided_slice %256 {offsets = [0, 0], sizes = [8, 128], strides = [1, 1]} : vector<8x256xf32> to vector<8x128xf32>
    %260 = arith.addf %258, %259 : vector<8x128xf32>
    %261 = arith.index_cast %254 : i32 to index
    %c0_123 = arith.constant 0 : index
    %262 = vector.load %arg9[%261, %c0_123] : memref<64x128xf32, #tpu.memory_space<vmem>>, vector<8x128xf32>
    %263 = vector.extract_strided_slice %256 {offsets = [0, 128], sizes = [8, 128], strides = [1, 1]} : vector<8x256xf32> to vector<8x128xf32>
    %264 = arith.addf %262, %263 : vector<8x128xf32>
    %265 = vector.extract_strided_slice %260 {offsets = [0, 0], sizes = [8, 96], strides = [1, 1]} : vector<8x128xf32> to vector<8x96xf32>
    %266 = arith.negf %265 : vector<8x96xf32>
    %267 = math.exp %266 : vector<8x96xf32>
    %cst_124 = arith.constant 1.000000e+00 : f32
    %268 = vector.broadcast %cst_124 : f32 to vector<8x96xf32>
    %269 = arith.addf %268, %267 : vector<8x96xf32>
    %270 = arith.divf %268, %269 : vector<8x96xf32>
    %271 = vector.extract_strided_slice %264 {offsets = [0, 0], sizes = [8, 96], strides = [1, 1]} : vector<8x128xf32> to vector<8x96xf32>
    %272 = arith.negf %271 : vector<8x96xf32>
    %273 = math.exp %272 : vector<8x96xf32>
    %cst_125 = arith.constant 1.000000e+00 : f32
    %274 = vector.broadcast %cst_125 : f32 to vector<8x96xf32>
    %275 = arith.addf %274, %273 : vector<8x96xf32>
    %276 = arith.divf %274, %275 : vector<8x96xf32>
    %277 = vector.extract_strided_slice %260 {offsets = [0, 96], sizes = [8, 32], strides = [1, 1]} : vector<8x128xf32> to vector<8x32xf32>
    %278 = math.tanh %277 : vector<8x32xf32>
    %279 = vector.extract_strided_slice %264 {offsets = [0, 96], sizes = [8, 32], strides = [1, 1]} : vector<8x128xf32> to vector<8x32xf32>
    %280 = math.tanh %279 : vector<8x32xf32>
    %281 = vector.extract_strided_slice %270 {offsets = [0, 32], sizes = [8, 32], strides = [1, 1]} : vector<8x96xf32> to vector<8x32xf32>
    %c0_126 = arith.constant 0 : index
    %c0_127 = arith.constant 0 : index
    %282 = vector.load %arg11[%c0_126, %c0_127] : memref<8x64xf32, #tpu.memory_space<vmem>>, vector<8x32xf32>
    %283 = arith.mulf %281, %282 : vector<8x32xf32>
    %284 = vector.extract_strided_slice %270 {offsets = [0, 0], sizes = [8, 32], strides = [1, 1]} : vector<8x96xf32> to vector<8x32xf32>
    %285 = arith.mulf %284, %278 : vector<8x32xf32>
    %286 = arith.addf %283, %285 : vector<8x32xf32>
    %287 = vector.extract_strided_slice %276 {offsets = [0, 32], sizes = [8, 32], strides = [1, 1]} : vector<8x96xf32> to vector<8x32xf32>
    %c0_128 = arith.constant 0 : index
    %c32_129 = arith.constant 32 : index
    %288 = vector.load %arg11[%c0_128, %c32_129] : memref<8x64xf32, #tpu.memory_space<vmem>>, vector<8x32xf32>
    %289 = arith.mulf %287, %288 : vector<8x32xf32>
    %290 = vector.extract_strided_slice %276 {offsets = [0, 0], sizes = [8, 32], strides = [1, 1]} : vector<8x96xf32> to vector<8x32xf32>
    %291 = arith.mulf %290, %280 : vector<8x32xf32>
    %292 = arith.addf %289, %291 : vector<8x32xf32>
    %293 = vector.extract_strided_slice %270 {offsets = [0, 64], sizes = [8, 32], strides = [1, 1]} : vector<8x96xf32> to vector<8x32xf32>
    %294 = math.tanh %286 : vector<8x32xf32>
    %295 = arith.mulf %293, %294 : vector<8x32xf32>
    %296 = vector.extract_strided_slice %276 {offsets = [0, 64], sizes = [8, 32], strides = [1, 1]} : vector<8x96xf32> to vector<8x32xf32>
    %297 = math.tanh %292 : vector<8x32xf32>
    %298 = arith.mulf %296, %297 : vector<8x32xf32>
    %c0_130 = arith.constant 0 : index
    %c0_131 = arith.constant 0 : index
    %299 = vector.load %arg11[%c0_130, %c0_131] : memref<8x64xf32, #tpu.memory_space<vmem>>, vector<8x32xf32>
    tpu.vector_store %arg11[%c0_130, %c0_131], %286 {strides = array<i32>} : memref<8x64xf32, #tpu.memory_space<vmem>>, vector<8x32xf32>,
    %c0_132 = arith.constant 0 : index
    %c32_133 = arith.constant 32 : index
    %300 = vector.load %arg11[%c0_132, %c32_133] : memref<8x64xf32, #tpu.memory_space<vmem>>, vector<8x32xf32>
    tpu.vector_store %arg11[%c0_132, %c32_133], %292 {strides = array<i32>} : memref<8x64xf32, #tpu.memory_space<vmem>>, vector<8x32xf32>,
    %c0_134 = arith.constant 0 : index
    %c0_135 = arith.constant 0 : index
    %301 = vector.load %arg10[%c0_134, %c0_135] : memref<8x64xf32, #tpu.memory_space<vmem>>, vector<8x32xf32>
    tpu.vector_store %arg10[%c0_134, %c0_135], %295 {strides = array<i32>} : memref<8x64xf32, #tpu.memory_space<vmem>>, vector<8x32xf32>,
    %c0_136 = arith.constant 0 : index
    %c32_137 = arith.constant 32 : index
    %302 = vector.load %arg10[%c0_136, %c32_137] : memref<8x64xf32, #tpu.memory_space<vmem>>, vector<8x32xf32>
    tpu.vector_store %arg10[%c0_136, %c32_137], %298 {strides = array<i32>} : memref<8x64xf32, #tpu.memory_space<vmem>>, vector<8x32xf32>,
    %303 = arith.index_cast %251 : i32 to index
    %c0_138 = arith.constant 0 : index
    %304 = vector.load %arg6[%303, %c0_138] : memref<64x32xf32, #tpu.memory_space<vmem>>, vector<8x32xf32>
    tpu.vector_store %arg6[%303, %c0_138], %295 {strides = array<i32>} : memref<64x32xf32, #tpu.memory_space<vmem>>, vector<8x32xf32>,
    %305 = arith.index_cast %254 : i32 to index
    %c0_139 = arith.constant 0 : index
    %306 = vector.load %arg7[%305, %c0_139] : memref<64x32xf32, #tpu.memory_space<vmem>>, vector<8x32xf32>
    tpu.vector_store %arg7[%305, %c0_139], %298 {strides = array<i32>} : memref<64x32xf32, #tpu.memory_space<vmem>>, vector<8x32xf32>,
    %c5_i32 = arith.constant 5 : i32
    %c8_i32_140 = arith.constant 8 : i32
    %307 = arith.muli %c5_i32, %c8_i32_140 : i32
    %308 = tpu.assume_multiple %307, 8 : i32
    %c7_i32_141 = arith.constant 7 : i32
    %309 = arith.subi %c7_i32_141, %c5_i32 : i32
    %c8_i32_142 = arith.constant 8 : i32
    %310 = arith.muli %309, %c8_i32_142 : i32
    %311 = tpu.assume_multiple %310, 8 : i32
    %c0_143 = arith.constant 0 : index
    %c0_144 = arith.constant 0 : index
    %312 = vector.load %arg10[%c0_143, %c0_144] : memref<8x64xf32, #tpu.memory_space<vmem>>, vector<8x64xf32>
    %cst_145 = arith.constant dense<0.000000e+00> : vector<8x256xf32>
    %313 = tpu.matmul %312, %21, %cst_145 {dimension_numbers = #tpu.dot_dimension_numbers<[1], [0], [0], [1], [0, 0, 1, 1], [], []>} : vector<8x64xf32>, vector<64x256xf32>, vector<8x256xf32> -> vector<8x256xf32>
    %314 = arith.index_cast %308 : i32 to index
    %c0_146 = arith.constant 0 : index
    %315 = vector.load %arg8[%314, %c0_146] : memref<64x128xf32, #tpu.memory_space<vmem>>, vector<8x128xf32>
    %316 = vector.extract_strided_slice %313 {offsets = [0, 0], sizes = [8, 128], strides = [1, 1]} : vector<8x256xf32> to vector<8x128xf32>
    %317 = arith.addf %315, %316 : vector<8x128xf32>
    %318 = arith.index_cast %311 : i32 to index
    %c0_147 = arith.constant 0 : index
    %319 = vector.load %arg9[%318, %c0_147] : memref<64x128xf32, #tpu.memory_space<vmem>>, vector<8x128xf32>
    %320 = vector.extract_strided_slice %313 {offsets = [0, 128], sizes = [8, 128], strides = [1, 1]} : vector<8x256xf32> to vector<8x128xf32>
    %321 = arith.addf %319, %320 : vector<8x128xf32>
    %322 = vector.extract_strided_slice %317 {offsets = [0, 0], sizes = [8, 96], strides = [1, 1]} : vector<8x128xf32> to vector<8x96xf32>
    %323 = arith.negf %322 : vector<8x96xf32>
    %324 = math.exp %323 : vector<8x96xf32>
    %cst_148 = arith.constant 1.000000e+00 : f32
    %325 = vector.broadcast %cst_148 : f32 to vector<8x96xf32>
    %326 = arith.addf %325, %324 : vector<8x96xf32>
    %327 = arith.divf %325, %326 : vector<8x96xf32>
    %328 = vector.extract_strided_slice %321 {offsets = [0, 0], sizes = [8, 96], strides = [1, 1]} : vector<8x128xf32> to vector<8x96xf32>
    %329 = arith.negf %328 : vector<8x96xf32>
    %330 = math.exp %329 : vector<8x96xf32>
    %cst_149 = arith.constant 1.000000e+00 : f32
    %331 = vector.broadcast %cst_149 : f32 to vector<8x96xf32>
    %332 = arith.addf %331, %330 : vector<8x96xf32>
    %333 = arith.divf %331, %332 : vector<8x96xf32>
    %334 = vector.extract_strided_slice %317 {offsets = [0, 96], sizes = [8, 32], strides = [1, 1]} : vector<8x128xf32> to vector<8x32xf32>
    %335 = math.tanh %334 : vector<8x32xf32>
    %336 = vector.extract_strided_slice %321 {offsets = [0, 96], sizes = [8, 32], strides = [1, 1]} : vector<8x128xf32> to vector<8x32xf32>
    %337 = math.tanh %336 : vector<8x32xf32>
    %338 = vector.extract_strided_slice %327 {offsets = [0, 32], sizes = [8, 32], strides = [1, 1]} : vector<8x96xf32> to vector<8x32xf32>
    %c0_150 = arith.constant 0 : index
    %c0_151 = arith.constant 0 : index
    %339 = vector.load %arg11[%c0_150, %c0_151] : memref<8x64xf32, #tpu.memory_space<vmem>>, vector<8x32xf32>
    %340 = arith.mulf %338, %339 : vector<8x32xf32>
    %341 = vector.extract_strided_slice %327 {offsets = [0, 0], sizes = [8, 32], strides = [1, 1]} : vector<8x96xf32> to vector<8x32xf32>
    %342 = arith.mulf %341, %335 : vector<8x32xf32>
    %343 = arith.addf %340, %342 : vector<8x32xf32>
    %344 = vector.extract_strided_slice %333 {offsets = [0, 32], sizes = [8, 32], strides = [1, 1]} : vector<8x96xf32> to vector<8x32xf32>
    %c0_152 = arith.constant 0 : index
    %c32_153 = arith.constant 32 : index
    %345 = vector.load %arg11[%c0_152, %c32_153] : memref<8x64xf32, #tpu.memory_space<vmem>>, vector<8x32xf32>
    %346 = arith.mulf %344, %345 : vector<8x32xf32>
    %347 = vector.extract_strided_slice %333 {offsets = [0, 0], sizes = [8, 32], strides = [1, 1]} : vector<8x96xf32> to vector<8x32xf32>
    %348 = arith.mulf %347, %337 : vector<8x32xf32>
    %349 = arith.addf %346, %348 : vector<8x32xf32>
    %350 = vector.extract_strided_slice %327 {offsets = [0, 64], sizes = [8, 32], strides = [1, 1]} : vector<8x96xf32> to vector<8x32xf32>
    %351 = math.tanh %343 : vector<8x32xf32>
    %352 = arith.mulf %350, %351 : vector<8x32xf32>
    %353 = vector.extract_strided_slice %333 {offsets = [0, 64], sizes = [8, 32], strides = [1, 1]} : vector<8x96xf32> to vector<8x32xf32>
    %354 = math.tanh %349 : vector<8x32xf32>
    %355 = arith.mulf %353, %354 : vector<8x32xf32>
    %c0_154 = arith.constant 0 : index
    %c0_155 = arith.constant 0 : index
    %356 = vector.load %arg11[%c0_154, %c0_155] : memref<8x64xf32, #tpu.memory_space<vmem>>, vector<8x32xf32>
    tpu.vector_store %arg11[%c0_154, %c0_155], %343 {strides = array<i32>} : memref<8x64xf32, #tpu.memory_space<vmem>>, vector<8x32xf32>,
    %c0_156 = arith.constant 0 : index
    %c32_157 = arith.constant 32 : index
    %357 = vector.load %arg11[%c0_156, %c32_157] : memref<8x64xf32, #tpu.memory_space<vmem>>, vector<8x32xf32>
    tpu.vector_store %arg11[%c0_156, %c32_157], %349 {strides = array<i32>} : memref<8x64xf32, #tpu.memory_space<vmem>>, vector<8x32xf32>,
    %c0_158 = arith.constant 0 : index
    %c0_159 = arith.constant 0 : index
    %358 = vector.load %arg10[%c0_158, %c0_159] : memref<8x64xf32, #tpu.memory_space<vmem>>, vector<8x32xf32>
    tpu.vector_store %arg10[%c0_158, %c0_159], %352 {strides = array<i32>} : memref<8x64xf32, #tpu.memory_space<vmem>>, vector<8x32xf32>,
    %c0_160 = arith.constant 0 : index
    %c32_161 = arith.constant 32 : index
    %359 = vector.load %arg10[%c0_160, %c32_161] : memref<8x64xf32, #tpu.memory_space<vmem>>, vector<8x32xf32>
    tpu.vector_store %arg10[%c0_160, %c32_161], %355 {strides = array<i32>} : memref<8x64xf32, #tpu.memory_space<vmem>>, vector<8x32xf32>,
    %360 = arith.index_cast %308 : i32 to index
    %c0_162 = arith.constant 0 : index
    %361 = vector.load %arg6[%360, %c0_162] : memref<64x32xf32, #tpu.memory_space<vmem>>, vector<8x32xf32>
    tpu.vector_store %arg6[%360, %c0_162], %352 {strides = array<i32>} : memref<64x32xf32, #tpu.memory_space<vmem>>, vector<8x32xf32>,
    %362 = arith.index_cast %311 : i32 to index
    %c0_163 = arith.constant 0 : index
    %363 = vector.load %arg7[%362, %c0_163] : memref<64x32xf32, #tpu.memory_space<vmem>>, vector<8x32xf32>
    tpu.vector_store %arg7[%362, %c0_163], %355 {strides = array<i32>} : memref<64x32xf32, #tpu.memory_space<vmem>>, vector<8x32xf32>,
    %c6_i32 = arith.constant 6 : i32
    %c8_i32_164 = arith.constant 8 : i32
    %364 = arith.muli %c6_i32, %c8_i32_164 : i32
    %365 = tpu.assume_multiple %364, 8 : i32
    %c7_i32_165 = arith.constant 7 : i32
    %366 = arith.subi %c7_i32_165, %c6_i32 : i32
    %c8_i32_166 = arith.constant 8 : i32
    %367 = arith.muli %366, %c8_i32_166 : i32
    %368 = tpu.assume_multiple %367, 8 : i32
    %c0_167 = arith.constant 0 : index
    %c0_168 = arith.constant 0 : index
    %369 = vector.load %arg10[%c0_167, %c0_168] : memref<8x64xf32, #tpu.memory_space<vmem>>, vector<8x64xf32>
    %cst_169 = arith.constant dense<0.000000e+00> : vector<8x256xf32>
    %370 = tpu.matmul %369, %21, %cst_169 {dimension_numbers = #tpu.dot_dimension_numbers<[1], [0], [0], [1], [0, 0, 1, 1], [], []>} : vector<8x64xf32>, vector<64x256xf32>, vector<8x256xf32> -> vector<8x256xf32>
    %371 = arith.index_cast %365 : i32 to index
    %c0_170 = arith.constant 0 : index
    %372 = vector.load %arg8[%371, %c0_170] : memref<64x128xf32, #tpu.memory_space<vmem>>, vector<8x128xf32>
    %373 = vector.extract_strided_slice %370 {offsets = [0, 0], sizes = [8, 128], strides = [1, 1]} : vector<8x256xf32> to vector<8x128xf32>
    %374 = arith.addf %372, %373 : vector<8x128xf32>
    %375 = arith.index_cast %368 : i32 to index
    %c0_171 = arith.constant 0 : index
    %376 = vector.load %arg9[%375, %c0_171] : memref<64x128xf32, #tpu.memory_space<vmem>>, vector<8x128xf32>
    %377 = vector.extract_strided_slice %370 {offsets = [0, 128], sizes = [8, 128], strides = [1, 1]} : vector<8x256xf32> to vector<8x128xf32>
    %378 = arith.addf %376, %377 : vector<8x128xf32>
    %379 = vector.extract_strided_slice %374 {offsets = [0, 0], sizes = [8, 96], strides = [1, 1]} : vector<8x128xf32> to vector<8x96xf32>
    %380 = arith.negf %379 : vector<8x96xf32>
    %381 = math.exp %380 : vector<8x96xf32>
    %cst_172 = arith.constant 1.000000e+00 : f32
    %382 = vector.broadcast %cst_172 : f32 to vector<8x96xf32>
    %383 = arith.addf %382, %381 : vector<8x96xf32>
    %384 = arith.divf %382, %383 : vector<8x96xf32>
    %385 = vector.extract_strided_slice %378 {offsets = [0, 0], sizes = [8, 96], strides = [1, 1]} : vector<8x128xf32> to vector<8x96xf32>
    %386 = arith.negf %385 : vector<8x96xf32>
    %387 = math.exp %386 : vector<8x96xf32>
    %cst_173 = arith.constant 1.000000e+00 : f32
    %388 = vector.broadcast %cst_173 : f32 to vector<8x96xf32>
    %389 = arith.addf %388, %387 : vector<8x96xf32>
    %390 = arith.divf %388, %389 : vector<8x96xf32>
    %391 = vector.extract_strided_slice %374 {offsets = [0, 96], sizes = [8, 32], strides = [1, 1]} : vector<8x128xf32> to vector<8x32xf32>
    %392 = math.tanh %391 : vector<8x32xf32>
    %393 = vector.extract_strided_slice %378 {offsets = [0, 96], sizes = [8, 32], strides = [1, 1]} : vector<8x128xf32> to vector<8x32xf32>
    %394 = math.tanh %393 : vector<8x32xf32>
    %395 = vector.extract_strided_slice %384 {offsets = [0, 32], sizes = [8, 32], strides = [1, 1]} : vector<8x96xf32> to vector<8x32xf32>
    %c0_174 = arith.constant 0 : index
    %c0_175 = arith.constant 0 : index
    %396 = vector.load %arg11[%c0_174, %c0_175] : memref<8x64xf32, #tpu.memory_space<vmem>>, vector<8x32xf32>
    %397 = arith.mulf %395, %396 : vector<8x32xf32>
    %398 = vector.extract_strided_slice %384 {offsets = [0, 0], sizes = [8, 32], strides = [1, 1]} : vector<8x96xf32> to vector<8x32xf32>
    %399 = arith.mulf %398, %392 : vector<8x32xf32>
    %400 = arith.addf %397, %399 : vector<8x32xf32>
    %401 = vector.extract_strided_slice %390 {offsets = [0, 32], sizes = [8, 32], strides = [1, 1]} : vector<8x96xf32> to vector<8x32xf32>
    %c0_176 = arith.constant 0 : index
    %c32_177 = arith.constant 32 : index
    %402 = vector.load %arg11[%c0_176, %c32_177] : memref<8x64xf32, #tpu.memory_space<vmem>>, vector<8x32xf32>
    %403 = arith.mulf %401, %402 : vector<8x32xf32>
    %404 = vector.extract_strided_slice %390 {offsets = [0, 0], sizes = [8, 32], strides = [1, 1]} : vector<8x96xf32> to vector<8x32xf32>
    %405 = arith.mulf %404, %394 : vector<8x32xf32>
    %406 = arith.addf %403, %405 : vector<8x32xf32>
    %407 = vector.extract_strided_slice %384 {offsets = [0, 64], sizes = [8, 32], strides = [1, 1]} : vector<8x96xf32> to vector<8x32xf32>
    %408 = math.tanh %400 : vector<8x32xf32>
    %409 = arith.mulf %407, %408 : vector<8x32xf32>
    %410 = vector.extract_strided_slice %390 {offsets = [0, 64], sizes = [8, 32], strides = [1, 1]} : vector<8x96xf32> to vector<8x32xf32>
    %411 = math.tanh %406 : vector<8x32xf32>
    %412 = arith.mulf %410, %411 : vector<8x32xf32>
    %c0_178 = arith.constant 0 : index
    %c0_179 = arith.constant 0 : index
    %413 = vector.load %arg11[%c0_178, %c0_179] : memref<8x64xf32, #tpu.memory_space<vmem>>, vector<8x32xf32>
    tpu.vector_store %arg11[%c0_178, %c0_179], %400 {strides = array<i32>} : memref<8x64xf32, #tpu.memory_space<vmem>>, vector<8x32xf32>,
    %c0_180 = arith.constant 0 : index
    %c32_181 = arith.constant 32 : index
    %414 = vector.load %arg11[%c0_180, %c32_181] : memref<8x64xf32, #tpu.memory_space<vmem>>, vector<8x32xf32>
    tpu.vector_store %arg11[%c0_180, %c32_181], %406 {strides = array<i32>} : memref<8x64xf32, #tpu.memory_space<vmem>>, vector<8x32xf32>,
    %c0_182 = arith.constant 0 : index
    %c0_183 = arith.constant 0 : index
    %415 = vector.load %arg10[%c0_182, %c0_183] : memref<8x64xf32, #tpu.memory_space<vmem>>, vector<8x32xf32>
    tpu.vector_store %arg10[%c0_182, %c0_183], %409 {strides = array<i32>} : memref<8x64xf32, #tpu.memory_space<vmem>>, vector<8x32xf32>,
    %c0_184 = arith.constant 0 : index
    %c32_185 = arith.constant 32 : index
    %416 = vector.load %arg10[%c0_184, %c32_185] : memref<8x64xf32, #tpu.memory_space<vmem>>, vector<8x32xf32>
    tpu.vector_store %arg10[%c0_184, %c32_185], %412 {strides = array<i32>} : memref<8x64xf32, #tpu.memory_space<vmem>>, vector<8x32xf32>,
    %417 = arith.index_cast %365 : i32 to index
    %c0_186 = arith.constant 0 : index
    %418 = vector.load %arg6[%417, %c0_186] : memref<64x32xf32, #tpu.memory_space<vmem>>, vector<8x32xf32>
    tpu.vector_store %arg6[%417, %c0_186], %409 {strides = array<i32>} : memref<64x32xf32, #tpu.memory_space<vmem>>, vector<8x32xf32>,
    %419 = arith.index_cast %368 : i32 to index
    %c0_187 = arith.constant 0 : index
    %420 = vector.load %arg7[%419, %c0_187] : memref<64x32xf32, #tpu.memory_space<vmem>>, vector<8x32xf32>
    tpu.vector_store %arg7[%419, %c0_187], %412 {strides = array<i32>} : memref<64x32xf32, #tpu.memory_space<vmem>>, vector<8x32xf32>,
    %c7_i32_188 = arith.constant 7 : i32
    %c8_i32_189 = arith.constant 8 : i32
    %421 = arith.muli %c7_i32_188, %c8_i32_189 : i32
    %422 = tpu.assume_multiple %421, 8 : i32
    %c7_i32_190 = arith.constant 7 : i32
    %423 = arith.subi %c7_i32_190, %c7_i32_188 : i32
    %c8_i32_191 = arith.constant 8 : i32
    %424 = arith.muli %423, %c8_i32_191 : i32
    %425 = tpu.assume_multiple %424, 8 : i32
    %c0_192 = arith.constant 0 : index
    %c0_193 = arith.constant 0 : index
    %426 = vector.load %arg10[%c0_192, %c0_193] : memref<8x64xf32, #tpu.memory_space<vmem>>, vector<8x64xf32>
    %cst_194 = arith.constant dense<0.000000e+00> : vector<8x256xf32>
    %427 = tpu.matmul %426, %21, %cst_194 {dimension_numbers = #tpu.dot_dimension_numbers<[1], [0], [0], [1], [0, 0, 1, 1], [], []>} : vector<8x64xf32>, vector<64x256xf32>, vector<8x256xf32> -> vector<8x256xf32>
    %428 = arith.index_cast %422 : i32 to index
    %c0_195 = arith.constant 0 : index
    %429 = vector.load %arg8[%428, %c0_195] : memref<64x128xf32, #tpu.memory_space<vmem>>, vector<8x128xf32>
    %430 = vector.extract_strided_slice %427 {offsets = [0, 0], sizes = [8, 128], strides = [1, 1]} : vector<8x256xf32> to vector<8x128xf32>
    %431 = arith.addf %429, %430 : vector<8x128xf32>
    %432 = arith.index_cast %425 : i32 to index
    %c0_196 = arith.constant 0 : index
    %433 = vector.load %arg9[%432, %c0_196] : memref<64x128xf32, #tpu.memory_space<vmem>>, vector<8x128xf32>
    %434 = vector.extract_strided_slice %427 {offsets = [0, 128], sizes = [8, 128], strides = [1, 1]} : vector<8x256xf32> to vector<8x128xf32>
    %435 = arith.addf %433, %434 : vector<8x128xf32>
    %436 = vector.extract_strided_slice %431 {offsets = [0, 0], sizes = [8, 96], strides = [1, 1]} : vector<8x128xf32> to vector<8x96xf32>
    %437 = arith.negf %436 : vector<8x96xf32>
    %438 = math.exp %437 : vector<8x96xf32>
    %cst_197 = arith.constant 1.000000e+00 : f32
    %439 = vector.broadcast %cst_197 : f32 to vector<8x96xf32>
    %440 = arith.addf %439, %438 : vector<8x96xf32>
    %441 = arith.divf %439, %440 : vector<8x96xf32>
    %442 = vector.extract_strided_slice %435 {offsets = [0, 0], sizes = [8, 96], strides = [1, 1]} : vector<8x128xf32> to vector<8x96xf32>
    %443 = arith.negf %442 : vector<8x96xf32>
    %444 = math.exp %443 : vector<8x96xf32>
    %cst_198 = arith.constant 1.000000e+00 : f32
    %445 = vector.broadcast %cst_198 : f32 to vector<8x96xf32>
    %446 = arith.addf %445, %444 : vector<8x96xf32>
    %447 = arith.divf %445, %446 : vector<8x96xf32>
    %448 = vector.extract_strided_slice %431 {offsets = [0, 96], sizes = [8, 32], strides = [1, 1]} : vector<8x128xf32> to vector<8x32xf32>
    %449 = math.tanh %448 : vector<8x32xf32>
    %450 = vector.extract_strided_slice %435 {offsets = [0, 96], sizes = [8, 32], strides = [1, 1]} : vector<8x128xf32> to vector<8x32xf32>
    %451 = math.tanh %450 : vector<8x32xf32>
    %452 = vector.extract_strided_slice %441 {offsets = [0, 32], sizes = [8, 32], strides = [1, 1]} : vector<8x96xf32> to vector<8x32xf32>
    %c0_199 = arith.constant 0 : index
    %c0_200 = arith.constant 0 : index
    %453 = vector.load %arg11[%c0_199, %c0_200] : memref<8x64xf32, #tpu.memory_space<vmem>>, vector<8x32xf32>
    %454 = arith.mulf %452, %453 : vector<8x32xf32>
    %455 = vector.extract_strided_slice %441 {offsets = [0, 0], sizes = [8, 32], strides = [1, 1]} : vector<8x96xf32> to vector<8x32xf32>
    %456 = arith.mulf %455, %449 : vector<8x32xf32>
    %457 = arith.addf %454, %456 : vector<8x32xf32>
    %458 = vector.extract_strided_slice %447 {offsets = [0, 32], sizes = [8, 32], strides = [1, 1]} : vector<8x96xf32> to vector<8x32xf32>
    %c0_201 = arith.constant 0 : index
    %c32_202 = arith.constant 32 : index
    %459 = vector.load %arg11[%c0_201, %c32_202] : memref<8x64xf32, #tpu.memory_space<vmem>>, vector<8x32xf32>
    %460 = arith.mulf %458, %459 : vector<8x32xf32>
    %461 = vector.extract_strided_slice %447 {offsets = [0, 0], sizes = [8, 32], strides = [1, 1]} : vector<8x96xf32> to vector<8x32xf32>
    %462 = arith.mulf %461, %451 : vector<8x32xf32>
    %463 = arith.addf %460, %462 : vector<8x32xf32>
    %464 = vector.extract_strided_slice %441 {offsets = [0, 64], sizes = [8, 32], strides = [1, 1]} : vector<8x96xf32> to vector<8x32xf32>
    %465 = math.tanh %457 : vector<8x32xf32>
    %466 = arith.mulf %464, %465 : vector<8x32xf32>
    %467 = vector.extract_strided_slice %447 {offsets = [0, 64], sizes = [8, 32], strides = [1, 1]} : vector<8x96xf32> to vector<8x32xf32>
    %468 = math.tanh %463 : vector<8x32xf32>
    %469 = arith.mulf %467, %468 : vector<8x32xf32>
    %c0_203 = arith.constant 0 : index
    %c0_204 = arith.constant 0 : index
    %470 = vector.load %arg11[%c0_203, %c0_204] : memref<8x64xf32, #tpu.memory_space<vmem>>, vector<8x32xf32>
    tpu.vector_store %arg11[%c0_203, %c0_204], %457 {strides = array<i32>} : memref<8x64xf32, #tpu.memory_space<vmem>>, vector<8x32xf32>,
    %c0_205 = arith.constant 0 : index
    %c32_206 = arith.constant 32 : index
    %471 = vector.load %arg11[%c0_205, %c32_206] : memref<8x64xf32, #tpu.memory_space<vmem>>, vector<8x32xf32>
    tpu.vector_store %arg11[%c0_205, %c32_206], %463 {strides = array<i32>} : memref<8x64xf32, #tpu.memory_space<vmem>>, vector<8x32xf32>,
    %c0_207 = arith.constant 0 : index
    %c0_208 = arith.constant 0 : index
    %472 = vector.load %arg10[%c0_207, %c0_208] : memref<8x64xf32, #tpu.memory_space<vmem>>, vector<8x32xf32>
    tpu.vector_store %arg10[%c0_207, %c0_208], %466 {strides = array<i32>} : memref<8x64xf32, #tpu.memory_space<vmem>>, vector<8x32xf32>,
    %c0_209 = arith.constant 0 : index
    %c32_210 = arith.constant 32 : index
    %473 = vector.load %arg10[%c0_209, %c32_210] : memref<8x64xf32, #tpu.memory_space<vmem>>, vector<8x32xf32>
    tpu.vector_store %arg10[%c0_209, %c32_210], %469 {strides = array<i32>} : memref<8x64xf32, #tpu.memory_space<vmem>>, vector<8x32xf32>,
    %474 = arith.index_cast %422 : i32 to index
    %c0_211 = arith.constant 0 : index
    %475 = vector.load %arg6[%474, %c0_211] : memref<64x32xf32, #tpu.memory_space<vmem>>, vector<8x32xf32>
    tpu.vector_store %arg6[%474, %c0_211], %466 {strides = array<i32>} : memref<64x32xf32, #tpu.memory_space<vmem>>, vector<8x32xf32>,
    %476 = arith.index_cast %425 : i32 to index
    %c0_212 = arith.constant 0 : index
    %477 = vector.load %arg7[%476, %c0_212] : memref<64x32xf32, #tpu.memory_space<vmem>>, vector<8x32xf32>
    tpu.vector_store %arg7[%476, %c0_212], %469 {strides = array<i32>} : memref<64x32xf32, #tpu.memory_space<vmem>>, vector<8x32xf32>,
    %c8_i32_213 = arith.constant 8 : i32
    return
  }
  func.func @transform_0(%arg0: i32) -> (i32, i32) {
    %c0_i32 = arith.constant 0 : i32
    %c0_i32_0 = arith.constant 0 : i32
    return %arg0, %c0_i32 : i32, i32
  }
  func.func @transform_1(%arg0: i32) -> (i32, i32) {
    %c0_i32 = arith.constant 0 : i32
    %0 = arith.subi %c0_i32, %arg0 : i32
    %c0_i32_0 = arith.constant 0 : i32
    %c0_i32_1 = arith.constant 0 : i32
    return %0, %c0_i32_0 : i32, i32
  }
  func.func @transform_2(%arg0: i32) -> (i32, i32, i32) {
    %c0_i32 = arith.constant 0 : i32
    %c0_i32_0 = arith.constant 0 : i32
    %c0_i32_1 = arith.constant 0 : i32
    %c0_i32_2 = arith.constant 0 : i32
    return %c0_i32, %c0_i32_0, %c0_i32_1 : i32, i32, i32
  }
  func.func @transform_3(%arg0: i32) -> (i32, i32) {
    %c0_i32 = arith.constant 0 : i32
    %c0_i32_0 = arith.constant 0 : i32
    %c0_i32_1 = arith.constant 0 : i32
    return %c0_i32, %c0_i32_0 : i32, i32
  }
  func.func @transform_4(%arg0: i32) -> (i32, i32, i32) {
    %c0_i32 = arith.constant 0 : i32
    %c0_i32_0 = arith.constant 0 : i32
    %c0_i32_1 = arith.constant 0 : i32
    %c0_i32_2 = arith.constant 0 : i32
    return %c0_i32, %c0_i32_0, %c0_i32_1 : i32, i32, i32
  }
  func.func @transform_5(%arg0: i32) -> (i32, i32) {
    %c0_i32 = arith.constant 0 : i32
    %c0_i32_0 = arith.constant 0 : i32
    return %arg0, %c0_i32 : i32, i32
  }
  func.func @transform_6(%arg0: i32) -> (i32, i32) {
    %c0_i32 = arith.constant 0 : i32
    %0 = arith.subi %c0_i32, %arg0 : i32
    %c0_i32_0 = arith.constant 0 : i32
    %c0_i32_1 = arith.constant 0 : i32
    return %0, %c0_i32_0 : i32, i32
  }
}

module attributes {stable_mosaic.version = 11 : i64} {
  func.func @_bilstm_kernel(%arg0: i32, %arg1: memref<64x64xbf16, #tpu.memory_space<vmem>>, %arg2: memref<64x64xbf16, #tpu.memory_space<vmem>>, %arg3: memref<2x64x128xbf16, #tpu.memory_space<vmem>>, %arg4: memref<64x256xf32, #tpu.memory_space<vmem>>, %arg5: memref<2x1x128xf32, #tpu.memory_space<vmem>>, %arg6: memref<64x32xf32, #tpu.memory_space<vmem>>, %arg7: memref<64x32xf32, #tpu.memory_space<vmem>>, %arg8: memref<64x128xf32, #tpu.memory_space<vmem>>, %arg9: memref<64x128xf32, #tpu.memory_space<vmem>>, %arg10: memref<8x64xf32, #tpu.memory_space<vmem>>, %arg11: memref<8x64xf32, #tpu.memory_space<vmem>>) attributes {dimension_semantics = [#tpu.dimension_semantics<arbitrary>], iteration_bounds = array<i64: 1>, scalar_prefetch = 0 : i64, scratch_operands = 4 : i64, tpu.core_type = #tpu.core_type<tc>, window_params = [{transform_indices = @transform_0, window_bounds = array<i64: 64, 64>}, {transform_indices = @transform_1, window_bounds = array<i64: 64, 64>}, {pipeline_mode = #tpu.pipeline_mode<synchronous>, transform_indices = @transform_2, window_bounds = array<i64: 2, 64, 128>}, {pipeline_mode = #tpu.pipeline_mode<synchronous>, transform_indices = @transform_3, window_bounds = array<i64: 64, 256>}, {pipeline_mode = #tpu.pipeline_mode<synchronous>, transform_indices = @transform_4, window_bounds = array<i64: 2, 1, 128>}, {transform_indices = @transform_5, window_bounds = array<i64: 64, 32>}, {transform_indices = @transform_6, window_bounds = array<i64: 64, 32>}]} {
    %c0_i32 = arith.constant 0 : i32
    %0 = arith.cmpi eq, %arg0, %c0_i32 : i32
    %1 = arith.extui %0 : i1 to i32
    %c0_i32_0 = arith.constant 0 : i32
    %2 = arith.cmpi ne, %1, %c0_i32_0 : i32
    scf.if %2 {
      %cst_214 = arith.constant 0.000000e+00 : f32
      %478 = vector.broadcast %cst_214 : f32 to vector<8x64xf32>
      %c0_215 = arith.constant 0 : index
      %c0_216 = arith.constant 0 : index
      %479 = vector.load %arg10[%c0_215, %c0_216] : memref<8x64xf32, #tpu.memory_space<vmem>>, vector<8x64xf32>
      tpu.vector_store %arg10[%c0_215, %c0_216], %478 {strides = array<i32>} : memref<8x64xf32, #tpu.memory_space<vmem>>, vector<8x64xf32>,
      %cst_217 = arith.constant 0.000000e+00 : f32
      %480 = vector.broadcast %cst_217 : f32 to vector<8x64xf32>
      %c0_218 = arith.constant 0 : index
      %c0_219 = arith.constant 0 : index
      %481 = vector.load %arg11[%c0_218, %c0_219] : memref<8x64xf32, #tpu.memory_space<vmem>>, vector<8x64xf32>
      tpu.vector_store %arg11[%c0_218, %c0_219], %480 {strides = array<i32>} : memref<8x64xf32, #tpu.memory_space<vmem>>, vector<8x64xf32>,
    } else {
    }
    %c0 = arith.constant 0 : index
    %c0_1 = arith.constant 0 : index
    %3 = vector.load %arg1[%c0, %c0_1] : memref<64x64xbf16, #tpu.memory_space<vmem>>, vector<64x64xbf16>
    %c0_2 = arith.constant 0 : index
    %c0_3 = arith.constant 0 : index
    %c0_4 = arith.constant 0 : index
    %4 = vector.load %arg3[%c0_2, %c0_3, %c0_4] : memref<2x64x128xbf16, #tpu.memory_space<vmem>>, vector<1x64x128xbf16>
    %5 = vector.shape_cast %4 : vector<1x64x128xbf16> to vector<64x128xbf16>
    %cst = arith.constant dense<0.000000e+00> : vector<64x128xf32>
    %6 = tpu.matmul %3, %5, %cst {dimension_numbers = #tpu.dot_dimension_numbers<[1], [0], [0], [1], [0, 0, 1, 1], [], []>} : vector<64x64xbf16>, vector<64x128xbf16>, vector<64x128xf32> -> vector<64x128xf32>
    %c0_5 = arith.constant 0 : index
    %c0_6 = arith.constant 0 : index
    %c0_7 = arith.constant 0 : index
    %7 = vector.load %arg5[%c0_5, %c0_6, %c0_7] : memref<2x1x128xf32, #tpu.memory_space<vmem>>, vector<1x1x128xf32>
    %8 = vector.shape_cast %7 : vector<1x1x128xf32> to vector<1x128xf32>
    %9 = vector.broadcast %8 : vector<1x128xf32> to vector<64x128xf32>
    %10 = arith.addf %6, %9 : vector<64x128xf32>
    %c0_8 = arith.constant 0 : index
    %c0_9 = arith.constant 0 : index
    %11 = vector.load %arg8[%c0_8, %c0_9] : memref<64x128xf32, #tpu.memory_space<vmem>>, vector<64x128xf32>
    tpu.vector_store %arg8[%c0_8, %c0_9], %10 {strides = array<i32>} : memref<64x128xf32, #tpu.memory_space<vmem>>, vector<64x128xf32>,
    %c0_10 = arith.constant 0 : index
    %c0_11 = arith.constant 0 : index
    %12 = vector.load %arg2[%c0_10, %c0_11] : memref<64x64xbf16, #tpu.memory_space<vmem>>, vector<64x64xbf16>
    %c1 = arith.constant 1 : index
    %c0_12 = arith.constant 0 : index
    %c0_13 = arith.constant 0 : index
    %13 = vector.load %arg3[%c1, %c0_12, %c0_13] : memref<2x64x128xbf16, #tpu.memory_space<vmem>>, vector<1x64x128xbf16>
    %14 = vector.shape_cast %13 : vector<1x64x128xbf16> to vector<64x128xbf16>
    %cst_14 = arith.constant dense<0.000000e+00> : vector<64x128xf32>
    %15 = tpu.matmul %12, %14, %cst_14 {dimension_numbers = #tpu.dot_dimension_numbers<[1], [0], [0], [1], [0, 0, 1, 1], [], []>} : vector<64x64xbf16>, vector<64x128xbf16>, vector<64x128xf32> -> vector<64x128xf32>
    %c1_15 = arith.constant 1 : index
    %c0_16 = arith.constant 0 : index
    %c0_17 = arith.constant 0 : index
    %16 = vector.load %arg5[%c1_15, %c0_16, %c0_17] : memref<2x1x128xf32, #tpu.memory_space<vmem>>, vector<1x1x128xf32>
    %17 = vector.shape_cast %16 : vector<1x1x128xf32> to vector<1x128xf32>
    %18 = vector.broadcast %17 : vector<1x128xf32> to vector<64x128xf32>
    %19 = arith.addf %15, %18 : vector<64x128xf32>
    %c0_18 = arith.constant 0 : index
    %c0_19 = arith.constant 0 : index
    %20 = vector.load %arg9[%c0_18, %c0_19] : memref<64x128xf32, #tpu.memory_space<vmem>>, vector<64x128xf32>
    tpu.vector_store %arg9[%c0_18, %c0_19], %19 {strides = array<i32>} : memref<64x128xf32, #tpu.memory_space<vmem>>, vector<64x128xf32>,
    %c0_20 = arith.constant 0 : index
    %c0_21 = arith.constant 0 : index
    %21 = vector.load %arg4[%c0_20, %c0_21] : memref<64x256xf32, #tpu.memory_space<vmem>>, vector<64x256xf32>
    %c0_i32_22 = arith.constant 0 : i32
    %c8_i32 = arith.constant 8 : i32
    %22 = arith.muli %c0_i32_22, %c8_i32 : i32
    %23 = tpu.assume_multiple %22, 8 : i32
    %c7_i32 = arith.constant 7 : i32
    %24 = arith.subi %c7_i32, %c0_i32_22 : i32
    %c8_i32_23 = arith.constant 8 : i32
    %25 = arith.muli %24, %c8_i32_23 : i32
    %26 = tpu.assume_multiple %25, 8 : i32
    %c0_24 = arith.constant 0 : index
    %c0_25 = arith.constant 0 : index
    %27 = vector.load %arg10[%c0_24, %c0_25] : memref<8x64xf32, #tpu.memory_space<vmem>>, vector<8x64xf32>
    %cst_26 = arith.constant dense<0.000000e+00> : vector<8x256xf32>
    %28 = tpu.matmul %27, %21, %cst_26 {dimension_numbers = #tpu.dot_dimension_numbers<[1], [0], [0], [1], [0, 0, 1, 1], [], []>} : vector<8x64xf32>, vector<64x256xf32>, vector<8x256xf32> -> vector<8x256xf32>
    %29 = arith.index_cast %23 : i32 to index
    %c0_27 = arith.constant 0 : index
    %30 = vector.load %arg8[%29, %c0_27] : memref<64x128xf32, #tpu.memory_space<vmem>>, vector<8x128xf32>
    %31 = vector.extract_strided_slice %28 {offsets = [0, 0], sizes = [8, 128], strides = [1, 1]} : vector<8x256xf32> to vector<8x128xf32>
    %32 = arith.addf %30, %31 : vector<8x128xf32>
    %33 = arith.index_cast %26 : i32 to index
    %c0_28 = arith.constant 0 : index
    %34 = vector.load %arg9[%33, %c0_28] : memref<64x128xf32, #tpu.memory_space<vmem>>, vector<8x128xf32>
    %35 = vector.extract_strided_slice %28 {offsets = [0, 128], sizes = [8, 128], strides = [1, 1]} : vector<8x256xf32> to vector<8x128xf32>
    %36 = arith.addf %34, %35 : vector<8x128xf32>
    %37 = vector.extract_strided_slice %32 {offsets = [0, 0], sizes = [8, 96], strides = [1, 1]} : vector<8x128xf32> to vector<8x96xf32>
    %38 = arith.negf %37 : vector<8x96xf32>
    %39 = math.exp %38 : vector<8x96xf32>
    %cst_29 = arith.constant 1.000000e+00 : f32
    %40 = vector.broadcast %cst_29 : f32 to vector<8x96xf32>
    %41 = arith.addf %40, %39 : vector<8x96xf32>
    %42 = arith.divf %40, %41 : vector<8x96xf32>
    %43 = vector.extract_strided_slice %36 {offsets = [0, 0], sizes = [8, 96], strides = [1, 1]} : vector<8x128xf32> to vector<8x96xf32>
    %44 = arith.negf %43 : vector<8x96xf32>
    %45 = math.exp %44 : vector<8x96xf32>
    %cst_30 = arith.constant 1.000000e+00 : f32
    %46 = vector.broadcast %cst_30 : f32 to vector<8x96xf32>
    %47 = arith.addf %46, %45 : vector<8x96xf32>
    %48 = arith.divf %46, %47 : vector<8x96xf32>
    %49 = vector.extract_strided_slice %32 {offsets = [0, 96], sizes = [8, 32], strides = [1, 1]} : vector<8x128xf32> to vector<8x32xf32>
    %50 = math.tanh %49 : vector<8x32xf32>
    %51 = vector.extract_strided_slice %36 {offsets = [0, 96], sizes = [8, 32], strides = [1, 1]} : vector<8x128xf32> to vector<8x32xf32>
    %52 = math.tanh %51 : vector<8x32xf32>
    %53 = vector.extract_strided_slice %42 {offsets = [0, 32], sizes = [8, 32], strides = [1, 1]} : vector<8x96xf32> to vector<8x32xf32>
    %c0_31 = arith.constant 0 : index
    %c0_32 = arith.constant 0 : index
    %54 = vector.load %arg11[%c0_31, %c0_32] : memref<8x64xf32, #tpu.memory_space<vmem>>, vector<8x32xf32>
    %55 = arith.mulf %53, %54 : vector<8x32xf32>
    %56 = vector.extract_strided_slice %42 {offsets = [0, 0], sizes = [8, 32], strides = [1, 1]} : vector<8x96xf32> to vector<8x32xf32>
    %57 = arith.mulf %56, %50 : vector<8x32xf32>
    %58 = arith.addf %55, %57 : vector<8x32xf32>
    %59 = vector.extract_strided_slice %48 {offsets = [0, 32], sizes = [8, 32], strides = [1, 1]} : vector<8x96xf32> to vector<8x32xf32>
    %c0_33 = arith.constant 0 : index
    %c32 = arith.constant 32 : index
    %60 = vector.load %arg11[%c0_33, %c32] : memref<8x64xf32, #tpu.memory_space<vmem>>, vector<8x32xf32>
    %61 = arith.mulf %59, %60 : vector<8x32xf32>
    %62 = vector.extract_strided_slice %48 {offsets = [0, 0], sizes = [8, 32], strides = [1, 1]} : vector<8x96xf32> to vector<8x32xf32>
    %63 = arith.mulf %62, %52 : vector<8x32xf32>
    %64 = arith.addf %61, %63 : vector<8x32xf32>
    %65 = vector.extract_strided_slice %42 {offsets = [0, 64], sizes = [8, 32], strides = [1, 1]} : vector<8x96xf32> to vector<8x32xf32>
    %66 = math.tanh %58 : vector<8x32xf32>
    %67 = arith.mulf %65, %66 : vector<8x32xf32>
    %68 = vector.extract_strided_slice %48 {offsets = [0, 64], sizes = [8, 32], strides = [1, 1]} : vector<8x96xf32> to vector<8x32xf32>
    %69 = math.tanh %64 : vector<8x32xf32>
    %70 = arith.mulf %68, %69 : vector<8x32xf32>
    %c0_34 = arith.constant 0 : index
    %c0_35 = arith.constant 0 : index
    %71 = vector.load %arg11[%c0_34, %c0_35] : memref<8x64xf32, #tpu.memory_space<vmem>>, vector<8x32xf32>
    tpu.vector_store %arg11[%c0_34, %c0_35], %58 {strides = array<i32>} : memref<8x64xf32, #tpu.memory_space<vmem>>, vector<8x32xf32>,
    %c0_36 = arith.constant 0 : index
    %c32_37 = arith.constant 32 : index
    %72 = vector.load %arg11[%c0_36, %c32_37] : memref<8x64xf32, #tpu.memory_space<vmem>>, vector<8x32xf32>
    tpu.vector_store %arg11[%c0_36, %c32_37], %64 {strides = array<i32>} : memref<8x64xf32, #tpu.memory_space<vmem>>, vector<8x32xf32>,
    %c0_38 = arith.constant 0 : index
    %c0_39 = arith.constant 0 : index
    %73 = vector.load %arg10[%c0_38, %c0_39] : memref<8x64xf32, #tpu.memory_space<vmem>>, vector<8x32xf32>
    tpu.vector_store %arg10[%c0_38, %c0_39], %67 {strides = array<i32>} : memref<8x64xf32, #tpu.memory_space<vmem>>, vector<8x32xf32>,
    %c0_40 = arith.constant 0 : index
    %c32_41 = arith.constant 32 : index
    %74 = vector.load %arg10[%c0_40, %c32_41] : memref<8x64xf32, #tpu.memory_space<vmem>>, vector<8x32xf32>
    tpu.vector_store %arg10[%c0_40, %c32_41], %70 {strides = array<i32>} : memref<8x64xf32, #tpu.memory_space<vmem>>, vector<8x32xf32>,
    %75 = arith.index_cast %23 : i32 to index
    %c0_42 = arith.constant 0 : index
    %76 = vector.load %arg6[%75, %c0_42] : memref<64x32xf32, #tpu.memory_space<vmem>>, vector<8x32xf32>
    tpu.vector_store %arg6[%75, %c0_42], %67 {strides = array<i32>} : memref<64x32xf32, #tpu.memory_space<vmem>>, vector<8x32xf32>,
    %77 = arith.index_cast %26 : i32 to index
    %c0_43 = arith.constant 0 : index
    %78 = vector.load %arg7[%77, %c0_43] : memref<64x32xf32, #tpu.memory_space<vmem>>, vector<8x32xf32>
    tpu.vector_store %arg7[%77, %c0_43], %70 {strides = array<i32>} : memref<64x32xf32, #tpu.memory_space<vmem>>, vector<8x32xf32>,
    %c1_i32 = arith.constant 1 : i32
    %c8_i32_44 = arith.constant 8 : i32
    %79 = arith.muli %c1_i32, %c8_i32_44 : i32
    %80 = tpu.assume_multiple %79, 8 : i32
    %c7_i32_45 = arith.constant 7 : i32
    %81 = arith.subi %c7_i32_45, %c1_i32 : i32
    %c8_i32_46 = arith.constant 8 : i32
    %82 = arith.muli %81, %c8_i32_46 : i32
    %83 = tpu.assume_multiple %82, 8 : i32
    %c0_47 = arith.constant 0 : index
    %c0_48 = arith.constant 0 : index
    %84 = vector.load %arg10[%c0_47, %c0_48] : memref<8x64xf32, #tpu.memory_space<vmem>>, vector<8x64xf32>
    %cst_49 = arith.constant dense<0.000000e+00> : vector<8x256xf32>
    %85 = tpu.matmul %84, %21, %cst_49 {dimension_numbers = #tpu.dot_dimension_numbers<[1], [0], [0], [1], [0, 0, 1, 1], [], []>} : vector<8x64xf32>, vector<64x256xf32>, vector<8x256xf32> -> vector<8x256xf32>
    %86 = arith.index_cast %80 : i32 to index
    %c0_50 = arith.constant 0 : index
    %87 = vector.load %arg8[%86, %c0_50] : memref<64x128xf32, #tpu.memory_space<vmem>>, vector<8x128xf32>
    %88 = vector.extract_strided_slice %85 {offsets = [0, 0], sizes = [8, 128], strides = [1, 1]} : vector<8x256xf32> to vector<8x128xf32>
    %89 = arith.addf %87, %88 : vector<8x128xf32>
    %90 = arith.index_cast %83 : i32 to index
    %c0_51 = arith.constant 0 : index
    %91 = vector.load %arg9[%90, %c0_51] : memref<64x128xf32, #tpu.memory_space<vmem>>, vector<8x128xf32>
    %92 = vector.extract_strided_slice %85 {offsets = [0, 128], sizes = [8, 128], strides = [1, 1]} : vector<8x256xf32> to vector<8x128xf32>
    %93 = arith.addf %91, %92 : vector<8x128xf32>
    %94 = vector.extract_strided_slice %89 {offsets = [0, 0], sizes = [8, 96], strides = [1, 1]} : vector<8x128xf32> to vector<8x96xf32>
    %95 = arith.negf %94 : vector<8x96xf32>
    %96 = math.exp %95 : vector<8x96xf32>
    %cst_52 = arith.constant 1.000000e+00 : f32
    %97 = vector.broadcast %cst_52 : f32 to vector<8x96xf32>
    %98 = arith.addf %97, %96 : vector<8x96xf32>
    %99 = arith.divf %97, %98 : vector<8x96xf32>
    %100 = vector.extract_strided_slice %93 {offsets = [0, 0], sizes = [8, 96], strides = [1, 1]} : vector<8x128xf32> to vector<8x96xf32>
    %101 = arith.negf %100 : vector<8x96xf32>
    %102 = math.exp %101 : vector<8x96xf32>
    %cst_53 = arith.constant 1.000000e+00 : f32
    %103 = vector.broadcast %cst_53 : f32 to vector<8x96xf32>
    %104 = arith.addf %103, %102 : vector<8x96xf32>
    %105 = arith.divf %103, %104 : vector<8x96xf32>
    %106 = vector.extract_strided_slice %89 {offsets = [0, 96], sizes = [8, 32], strides = [1, 1]} : vector<8x128xf32> to vector<8x32xf32>
    %107 = math.tanh %106 : vector<8x32xf32>
    %108 = vector.extract_strided_slice %93 {offsets = [0, 96], sizes = [8, 32], strides = [1, 1]} : vector<8x128xf32> to vector<8x32xf32>
    %109 = math.tanh %108 : vector<8x32xf32>
    %110 = vector.extract_strided_slice %99 {offsets = [0, 32], sizes = [8, 32], strides = [1, 1]} : vector<8x96xf32> to vector<8x32xf32>
    %c0_54 = arith.constant 0 : index
    %c0_55 = arith.constant 0 : index
    %111 = vector.load %arg11[%c0_54, %c0_55] : memref<8x64xf32, #tpu.memory_space<vmem>>, vector<8x32xf32>
    %112 = arith.mulf %110, %111 : vector<8x32xf32>
    %113 = vector.extract_strided_slice %99 {offsets = [0, 0], sizes = [8, 32], strides = [1, 1]} : vector<8x96xf32> to vector<8x32xf32>
    %114 = arith.mulf %113, %107 : vector<8x32xf32>
    %115 = arith.addf %112, %114 : vector<8x32xf32>
    %116 = vector.extract_strided_slice %105 {offsets = [0, 32], sizes = [8, 32], strides = [1, 1]} : vector<8x96xf32> to vector<8x32xf32>
    %c0_56 = arith.constant 0 : index
    %c32_57 = arith.constant 32 : index
    %117 = vector.load %arg11[%c0_56, %c32_57] : memref<8x64xf32, #tpu.memory_space<vmem>>, vector<8x32xf32>
    %118 = arith.mulf %116, %117 : vector<8x32xf32>
    %119 = vector.extract_strided_slice %105 {offsets = [0, 0], sizes = [8, 32], strides = [1, 1]} : vector<8x96xf32> to vector<8x32xf32>
    %120 = arith.mulf %119, %109 : vector<8x32xf32>
    %121 = arith.addf %118, %120 : vector<8x32xf32>
    %122 = vector.extract_strided_slice %99 {offsets = [0, 64], sizes = [8, 32], strides = [1, 1]} : vector<8x96xf32> to vector<8x32xf32>
    %123 = math.tanh %115 : vector<8x32xf32>
    %124 = arith.mulf %122, %123 : vector<8x32xf32>
    %125 = vector.extract_strided_slice %105 {offsets = [0, 64], sizes = [8, 32], strides = [1, 1]} : vector<8x96xf32> to vector<8x32xf32>
    %126 = math.tanh %121 : vector<8x32xf32>
    %127 = arith.mulf %125, %126 : vector<8x32xf32>
    %c0_58 = arith.constant 0 : index
    %c0_59 = arith.constant 0 : index
    %128 = vector.load %arg11[%c0_58, %c0_59] : memref<8x64xf32, #tpu.memory_space<vmem>>, vector<8x32xf32>
    tpu.vector_store %arg11[%c0_58, %c0_59], %115 {strides = array<i32>} : memref<8x64xf32, #tpu.memory_space<vmem>>, vector<8x32xf32>,
    %c0_60 = arith.constant 0 : index
    %c32_61 = arith.constant 32 : index
    %129 = vector.load %arg11[%c0_60, %c32_61] : memref<8x64xf32, #tpu.memory_space<vmem>>, vector<8x32xf32>
    tpu.vector_store %arg11[%c0_60, %c32_61], %121 {strides = array<i32>} : memref<8x64xf32, #tpu.memory_space<vmem>>, vector<8x32xf32>,
    %c0_62 = arith.constant 0 : index
    %c0_63 = arith.constant 0 : index
    %130 = vector.load %arg10[%c0_62, %c0_63] : memref<8x64xf32, #tpu.memory_space<vmem>>, vector<8x32xf32>
    tpu.vector_store %arg10[%c0_62, %c0_63], %124 {strides = array<i32>} : memref<8x64xf32, #tpu.memory_space<vmem>>, vector<8x32xf32>,
    %c0_64 = arith.constant 0 : index
    %c32_65 = arith.constant 32 : index
    %131 = vector.load %arg10[%c0_64, %c32_65] : memref<8x64xf32, #tpu.memory_space<vmem>>, vector<8x32xf32>
    tpu.vector_store %arg10[%c0_64, %c32_65], %127 {strides = array<i32>} : memref<8x64xf32, #tpu.memory_space<vmem>>, vector<8x32xf32>,
    %132 = arith.index_cast %80 : i32 to index
    %c0_66 = arith.constant 0 : index
    %133 = vector.load %arg6[%132, %c0_66] : memref<64x32xf32, #tpu.memory_space<vmem>>, vector<8x32xf32>
    tpu.vector_store %arg6[%132, %c0_66], %124 {strides = array<i32>} : memref<64x32xf32, #tpu.memory_space<vmem>>, vector<8x32xf32>,
    %134 = arith.index_cast %83 : i32 to index
    %c0_67 = arith.constant 0 : index
    %135 = vector.load %arg7[%134, %c0_67] : memref<64x32xf32, #tpu.memory_space<vmem>>, vector<8x32xf32>
    tpu.vector_store %arg7[%134, %c0_67], %127 {strides = array<i32>} : memref<64x32xf32, #tpu.memory_space<vmem>>, vector<8x32xf32>,
    %c2_i32 = arith.constant 2 : i32
    %c8_i32_68 = arith.constant 8 : i32
    %136 = arith.muli %c2_i32, %c8_i32_68 : i32
    %137 = tpu.assume_multiple %136, 8 : i32
    %c7_i32_69 = arith.constant 7 : i32
    %138 = arith.subi %c7_i32_69, %c2_i32 : i32
    %c8_i32_70 = arith.constant 8 : i32
    %139 = arith.muli %138, %c8_i32_70 : i32
    %140 = tpu.assume_multiple %139, 8 : i32
    %c0_71 = arith.constant 0 : index
    %c0_72 = arith.constant 0 : index
    %141 = vector.load %arg10[%c0_71, %c0_72] : memref<8x64xf32, #tpu.memory_space<vmem>>, vector<8x64xf32>
    %cst_73 = arith.constant dense<0.000000e+00> : vector<8x256xf32>
    %142 = tpu.matmul %141, %21, %cst_73 {dimension_numbers = #tpu.dot_dimension_numbers<[1], [0], [0], [1], [0, 0, 1, 1], [], []>} : vector<8x64xf32>, vector<64x256xf32>, vector<8x256xf32> -> vector<8x256xf32>
    %143 = arith.index_cast %137 : i32 to index
    %c0_74 = arith.constant 0 : index
    %144 = vector.load %arg8[%143, %c0_74] : memref<64x128xf32, #tpu.memory_space<vmem>>, vector<8x128xf32>
    %145 = vector.extract_strided_slice %142 {offsets = [0, 0], sizes = [8, 128], strides = [1, 1]} : vector<8x256xf32> to vector<8x128xf32>
    %146 = arith.addf %144, %145 : vector<8x128xf32>
    %147 = arith.index_cast %140 : i32 to index
    %c0_75 = arith.constant 0 : index
    %148 = vector.load %arg9[%147, %c0_75] : memref<64x128xf32, #tpu.memory_space<vmem>>, vector<8x128xf32>
    %149 = vector.extract_strided_slice %142 {offsets = [0, 128], sizes = [8, 128], strides = [1, 1]} : vector<8x256xf32> to vector<8x128xf32>
    %150 = arith.addf %148, %149 : vector<8x128xf32>
    %151 = vector.extract_strided_slice %146 {offsets = [0, 0], sizes = [8, 96], strides = [1, 1]} : vector<8x128xf32> to vector<8x96xf32>
    %152 = arith.negf %151 : vector<8x96xf32>
    %153 = math.exp %152 : vector<8x96xf32>
    %cst_76 = arith.constant 1.000000e+00 : f32
    %154 = vector.broadcast %cst_76 : f32 to vector<8x96xf32>
    %155 = arith.addf %154, %153 : vector<8x96xf32>
    %156 = arith.divf %154, %155 : vector<8x96xf32>
    %157 = vector.extract_strided_slice %150 {offsets = [0, 0], sizes = [8, 96], strides = [1, 1]} : vector<8x128xf32> to vector<8x96xf32>
    %158 = arith.negf %157 : vector<8x96xf32>
    %159 = math.exp %158 : vector<8x96xf32>
    %cst_77 = arith.constant 1.000000e+00 : f32
    %160 = vector.broadcast %cst_77 : f32 to vector<8x96xf32>
    %161 = arith.addf %160, %159 : vector<8x96xf32>
    %162 = arith.divf %160, %161 : vector<8x96xf32>
    %163 = vector.extract_strided_slice %146 {offsets = [0, 96], sizes = [8, 32], strides = [1, 1]} : vector<8x128xf32> to vector<8x32xf32>
    %164 = math.tanh %163 : vector<8x32xf32>
    %165 = vector.extract_strided_slice %150 {offsets = [0, 96], sizes = [8, 32], strides = [1, 1]} : vector<8x128xf32> to vector<8x32xf32>
    %166 = math.tanh %165 : vector<8x32xf32>
    %167 = vector.extract_strided_slice %156 {offsets = [0, 32], sizes = [8, 32], strides = [1, 1]} : vector<8x96xf32> to vector<8x32xf32>
    %c0_78 = arith.constant 0 : index
    %c0_79 = arith.constant 0 : index
    %168 = vector.load %arg11[%c0_78, %c0_79] : memref<8x64xf32, #tpu.memory_space<vmem>>, vector<8x32xf32>
    %169 = arith.mulf %167, %168 : vector<8x32xf32>
    %170 = vector.extract_strided_slice %156 {offsets = [0, 0], sizes = [8, 32], strides = [1, 1]} : vector<8x96xf32> to vector<8x32xf32>
    %171 = arith.mulf %170, %164 : vector<8x32xf32>
    %172 = arith.addf %169, %171 : vector<8x32xf32>
    %173 = vector.extract_strided_slice %162 {offsets = [0, 32], sizes = [8, 32], strides = [1, 1]} : vector<8x96xf32> to vector<8x32xf32>
    %c0_80 = arith.constant 0 : index
    %c32_81 = arith.constant 32 : index
    %174 = vector.load %arg11[%c0_80, %c32_81] : memref<8x64xf32, #tpu.memory_space<vmem>>, vector<8x32xf32>
    %175 = arith.mulf %173, %174 : vector<8x32xf32>
    %176 = vector.extract_strided_slice %162 {offsets = [0, 0], sizes = [8, 32], strides = [1, 1]} : vector<8x96xf32> to vector<8x32xf32>
    %177 = arith.mulf %176, %166 : vector<8x32xf32>
    %178 = arith.addf %175, %177 : vector<8x32xf32>
    %179 = vector.extract_strided_slice %156 {offsets = [0, 64], sizes = [8, 32], strides = [1, 1]} : vector<8x96xf32> to vector<8x32xf32>
    %180 = math.tanh %172 : vector<8x32xf32>
    %181 = arith.mulf %179, %180 : vector<8x32xf32>
    %182 = vector.extract_strided_slice %162 {offsets = [0, 64], sizes = [8, 32], strides = [1, 1]} : vector<8x96xf32> to vector<8x32xf32>
    %183 = math.tanh %178 : vector<8x32xf32>
    %184 = arith.mulf %182, %183 : vector<8x32xf32>
    %c0_82 = arith.constant 0 : index
    %c0_83 = arith.constant 0 : index
    %185 = vector.load %arg11[%c0_82, %c0_83] : memref<8x64xf32, #tpu.memory_space<vmem>>, vector<8x32xf32>
    tpu.vector_store %arg11[%c0_82, %c0_83], %172 {strides = array<i32>} : memref<8x64xf32, #tpu.memory_space<vmem>>, vector<8x32xf32>,
    %c0_84 = arith.constant 0 : index
    %c32_85 = arith.constant 32 : index
    %186 = vector.load %arg11[%c0_84, %c32_85] : memref<8x64xf32, #tpu.memory_space<vmem>>, vector<8x32xf32>
    tpu.vector_store %arg11[%c0_84, %c32_85], %178 {strides = array<i32>} : memref<8x64xf32, #tpu.memory_space<vmem>>, vector<8x32xf32>,
    %c0_86 = arith.constant 0 : index
    %c0_87 = arith.constant 0 : index
    %187 = vector.load %arg10[%c0_86, %c0_87] : memref<8x64xf32, #tpu.memory_space<vmem>>, vector<8x32xf32>
    tpu.vector_store %arg10[%c0_86, %c0_87], %181 {strides = array<i32>} : memref<8x64xf32, #tpu.memory_space<vmem>>, vector<8x32xf32>,
    %c0_88 = arith.constant 0 : index
    %c32_89 = arith.constant 32 : index
    %188 = vector.load %arg10[%c0_88, %c32_89] : memref<8x64xf32, #tpu.memory_space<vmem>>, vector<8x32xf32>
    tpu.vector_store %arg10[%c0_88, %c32_89], %184 {strides = array<i32>} : memref<8x64xf32, #tpu.memory_space<vmem>>, vector<8x32xf32>,
    %189 = arith.index_cast %137 : i32 to index
    %c0_90 = arith.constant 0 : index
    %190 = vector.load %arg6[%189, %c0_90] : memref<64x32xf32, #tpu.memory_space<vmem>>, vector<8x32xf32>
    tpu.vector_store %arg6[%189, %c0_90], %181 {strides = array<i32>} : memref<64x32xf32, #tpu.memory_space<vmem>>, vector<8x32xf32>,
    %191 = arith.index_cast %140 : i32 to index
    %c0_91 = arith.constant 0 : index
    %192 = vector.load %arg7[%191, %c0_91] : memref<64x32xf32, #tpu.memory_space<vmem>>, vector<8x32xf32>
    tpu.vector_store %arg7[%191, %c0_91], %184 {strides = array<i32>} : memref<64x32xf32, #tpu.memory_space<vmem>>, vector<8x32xf32>,
    %c3_i32 = arith.constant 3 : i32
    %c8_i32_92 = arith.constant 8 : i32
    %193 = arith.muli %c3_i32, %c8_i32_92 : i32
    %194 = tpu.assume_multiple %193, 8 : i32
    %c7_i32_93 = arith.constant 7 : i32
    %195 = arith.subi %c7_i32_93, %c3_i32 : i32
    %c8_i32_94 = arith.constant 8 : i32
    %196 = arith.muli %195, %c8_i32_94 : i32
    %197 = tpu.assume_multiple %196, 8 : i32
    %c0_95 = arith.constant 0 : index
    %c0_96 = arith.constant 0 : index
    %198 = vector.load %arg10[%c0_95, %c0_96] : memref<8x64xf32, #tpu.memory_space<vmem>>, vector<8x64xf32>
    %cst_97 = arith.constant dense<0.000000e+00> : vector<8x256xf32>
    %199 = tpu.matmul %198, %21, %cst_97 {dimension_numbers = #tpu.dot_dimension_numbers<[1], [0], [0], [1], [0, 0, 1, 1], [], []>} : vector<8x64xf32>, vector<64x256xf32>, vector<8x256xf32> -> vector<8x256xf32>
    %200 = arith.index_cast %194 : i32 to index
    %c0_98 = arith.constant 0 : index
    %201 = vector.load %arg8[%200, %c0_98] : memref<64x128xf32, #tpu.memory_space<vmem>>, vector<8x128xf32>
    %202 = vector.extract_strided_slice %199 {offsets = [0, 0], sizes = [8, 128], strides = [1, 1]} : vector<8x256xf32> to vector<8x128xf32>
    %203 = arith.addf %201, %202 : vector<8x128xf32>
    %204 = arith.index_cast %197 : i32 to index
    %c0_99 = arith.constant 0 : index
    %205 = vector.load %arg9[%204, %c0_99] : memref<64x128xf32, #tpu.memory_space<vmem>>, vector<8x128xf32>
    %206 = vector.extract_strided_slice %199 {offsets = [0, 128], sizes = [8, 128], strides = [1, 1]} : vector<8x256xf32> to vector<8x128xf32>
    %207 = arith.addf %205, %206 : vector<8x128xf32>
    %208 = vector.extract_strided_slice %203 {offsets = [0, 0], sizes = [8, 96], strides = [1, 1]} : vector<8x128xf32> to vector<8x96xf32>
    %209 = arith.negf %208 : vector<8x96xf32>
    %210 = math.exp %209 : vector<8x96xf32>
    %cst_100 = arith.constant 1.000000e+00 : f32
    %211 = vector.broadcast %cst_100 : f32 to vector<8x96xf32>
    %212 = arith.addf %211, %210 : vector<8x96xf32>
    %213 = arith.divf %211, %212 : vector<8x96xf32>
    %214 = vector.extract_strided_slice %207 {offsets = [0, 0], sizes = [8, 96], strides = [1, 1]} : vector<8x128xf32> to vector<8x96xf32>
    %215 = arith.negf %214 : vector<8x96xf32>
    %216 = math.exp %215 : vector<8x96xf32>
    %cst_101 = arith.constant 1.000000e+00 : f32
    %217 = vector.broadcast %cst_101 : f32 to vector<8x96xf32>
    %218 = arith.addf %217, %216 : vector<8x96xf32>
    %219 = arith.divf %217, %218 : vector<8x96xf32>
    %220 = vector.extract_strided_slice %203 {offsets = [0, 96], sizes = [8, 32], strides = [1, 1]} : vector<8x128xf32> to vector<8x32xf32>
    %221 = math.tanh %220 : vector<8x32xf32>
    %222 = vector.extract_strided_slice %207 {offsets = [0, 96], sizes = [8, 32], strides = [1, 1]} : vector<8x128xf32> to vector<8x32xf32>
    %223 = math.tanh %222 : vector<8x32xf32>
    %224 = vector.extract_strided_slice %213 {offsets = [0, 32], sizes = [8, 32], strides = [1, 1]} : vector<8x96xf32> to vector<8x32xf32>
    %c0_102 = arith.constant 0 : index
    %c0_103 = arith.constant 0 : index
    %225 = vector.load %arg11[%c0_102, %c0_103] : memref<8x64xf32, #tpu.memory_space<vmem>>, vector<8x32xf32>
    %226 = arith.mulf %224, %225 : vector<8x32xf32>
    %227 = vector.extract_strided_slice %213 {offsets = [0, 0], sizes = [8, 32], strides = [1, 1]} : vector<8x96xf32> to vector<8x32xf32>
    %228 = arith.mulf %227, %221 : vector<8x32xf32>
    %229 = arith.addf %226, %228 : vector<8x32xf32>
    %230 = vector.extract_strided_slice %219 {offsets = [0, 32], sizes = [8, 32], strides = [1, 1]} : vector<8x96xf32> to vector<8x32xf32>
    %c0_104 = arith.constant 0 : index
    %c32_105 = arith.constant 32 : index
    %231 = vector.load %arg11[%c0_104, %c32_105] : memref<8x64xf32, #tpu.memory_space<vmem>>, vector<8x32xf32>
    %232 = arith.mulf %230, %231 : vector<8x32xf32>
    %233 = vector.extract_strided_slice %219 {offsets = [0, 0], sizes = [8, 32], strides = [1, 1]} : vector<8x96xf32> to vector<8x32xf32>
    %234 = arith.mulf %233, %223 : vector<8x32xf32>
    %235 = arith.addf %232, %234 : vector<8x32xf32>
    %236 = vector.extract_strided_slice %213 {offsets = [0, 64], sizes = [8, 32], strides = [1, 1]} : vector<8x96xf32> to vector<8x32xf32>
    %237 = math.tanh %229 : vector<8x32xf32>
    %238 = arith.mulf %236, %237 : vector<8x32xf32>
    %239 = vector.extract_strided_slice %219 {offsets = [0, 64], sizes = [8, 32], strides = [1, 1]} : vector<8x96xf32> to vector<8x32xf32>
    %240 = math.tanh %235 : vector<8x32xf32>
    %241 = arith.mulf %239, %240 : vector<8x32xf32>
    %c0_106 = arith.constant 0 : index
    %c0_107 = arith.constant 0 : index
    %242 = vector.load %arg11[%c0_106, %c0_107] : memref<8x64xf32, #tpu.memory_space<vmem>>, vector<8x32xf32>
    tpu.vector_store %arg11[%c0_106, %c0_107], %229 {strides = array<i32>} : memref<8x64xf32, #tpu.memory_space<vmem>>, vector<8x32xf32>,
    %c0_108 = arith.constant 0 : index
    %c32_109 = arith.constant 32 : index
    %243 = vector.load %arg11[%c0_108, %c32_109] : memref<8x64xf32, #tpu.memory_space<vmem>>, vector<8x32xf32>
    tpu.vector_store %arg11[%c0_108, %c32_109], %235 {strides = array<i32>} : memref<8x64xf32, #tpu.memory_space<vmem>>, vector<8x32xf32>,
    %c0_110 = arith.constant 0 : index
    %c0_111 = arith.constant 0 : index
    %244 = vector.load %arg10[%c0_110, %c0_111] : memref<8x64xf32, #tpu.memory_space<vmem>>, vector<8x32xf32>
    tpu.vector_store %arg10[%c0_110, %c0_111], %238 {strides = array<i32>} : memref<8x64xf32, #tpu.memory_space<vmem>>, vector<8x32xf32>,
    %c0_112 = arith.constant 0 : index
    %c32_113 = arith.constant 32 : index
    %245 = vector.load %arg10[%c0_112, %c32_113] : memref<8x64xf32, #tpu.memory_space<vmem>>, vector<8x32xf32>
    tpu.vector_store %arg10[%c0_112, %c32_113], %241 {strides = array<i32>} : memref<8x64xf32, #tpu.memory_space<vmem>>, vector<8x32xf32>,
    %246 = arith.index_cast %194 : i32 to index
    %c0_114 = arith.constant 0 : index
    %247 = vector.load %arg6[%246, %c0_114] : memref<64x32xf32, #tpu.memory_space<vmem>>, vector<8x32xf32>
    tpu.vector_store %arg6[%246, %c0_114], %238 {strides = array<i32>} : memref<64x32xf32, #tpu.memory_space<vmem>>, vector<8x32xf32>,
    %248 = arith.index_cast %197 : i32 to index
    %c0_115 = arith.constant 0 : index
    %249 = vector.load %arg7[%248, %c0_115] : memref<64x32xf32, #tpu.memory_space<vmem>>, vector<8x32xf32>
    tpu.vector_store %arg7[%248, %c0_115], %241 {strides = array<i32>} : memref<64x32xf32, #tpu.memory_space<vmem>>, vector<8x32xf32>,
    %c4_i32 = arith.constant 4 : i32
    %c8_i32_116 = arith.constant 8 : i32
    %250 = arith.muli %c4_i32, %c8_i32_116 : i32
    %251 = tpu.assume_multiple %250, 8 : i32
    %c7_i32_117 = arith.constant 7 : i32
    %252 = arith.subi %c7_i32_117, %c4_i32 : i32
    %c8_i32_118 = arith.constant 8 : i32
    %253 = arith.muli %252, %c8_i32_118 : i32
    %254 = tpu.assume_multiple %253, 8 : i32
    %c0_119 = arith.constant 0 : index
    %c0_120 = arith.constant 0 : index
    %255 = vector.load %arg10[%c0_119, %c0_120] : memref<8x64xf32, #tpu.memory_space<vmem>>, vector<8x64xf32>
    %cst_121 = arith.constant dense<0.000000e+00> : vector<8x256xf32>
    %256 = tpu.matmul %255, %21, %cst_121 {dimension_numbers = #tpu.dot_dimension_numbers<[1], [0], [0], [1], [0, 0, 1, 1], [], []>} : vector<8x64xf32>, vector<64x256xf32>, vector<8x256xf32> -> vector<8x256xf32>
    %257 = arith.index_cast %251 : i32 to index
    %c0_122 = arith.constant 0 : index
    %258 = vector.load %arg8[%257, %c0_122] : memref<64x128xf32, #tpu.memory_space<vmem>>, vector<8x128xf32>
    %259 = vector.extract_strided_slice %256 {offsets = [0, 0], sizes = [8, 128], strides = [1, 1]} : vector<8x256xf32> to vector<8x128xf32>
    %260 = arith.addf %258, %259 : vector<8x128xf32>
    %261 = arith.index_cast %254 : i32 to index
    %c0_123 = arith.constant 0 : index
    %262 = vector.load %arg9[%261, %c0_123] : memref<64x128xf32, #tpu.memory_space<vmem>>, vector<8x128xf32>
    %263 = vector.extract_strided_slice %256 {offsets = [0, 128], sizes = [8, 128], strides = [1, 1]} : vector<8x256xf32> to vector<8x128xf32>
    %264 = arith.addf %262, %263 : vector<8x128xf32>
    %265 = vector.extract_strided_slice %260 {offsets = [0, 0], sizes = [8, 96], strides = [1, 1]} : vector<8x128xf32> to vector<8x96xf32>
    %266 = arith.negf %265 : vector<8x96xf32>
    %267 = math.exp %266 : vector<8x96xf32>
    %cst_124 = arith.constant 1.000000e+00 : f32
    %268 = vector.broadcast %cst_124 : f32 to vector<8x96xf32>
    %269 = arith.addf %268, %267 : vector<8x96xf32>
    %270 = arith.divf %268, %269 : vector<8x96xf32>
    %271 = vector.extract_strided_slice %264 {offsets = [0, 0], sizes = [8, 96], strides = [1, 1]} : vector<8x128xf32> to vector<8x96xf32>
    %272 = arith.negf %271 : vector<8x96xf32>
    %273 = math.exp %272 : vector<8x96xf32>
    %cst_125 = arith.constant 1.000000e+00 : f32
    %274 = vector.broadcast %cst_125 : f32 to vector<8x96xf32>
    %275 = arith.addf %274, %273 : vector<8x96xf32>
    %276 = arith.divf %274, %275 : vector<8x96xf32>
    %277 = vector.extract_strided_slice %260 {offsets = [0, 96], sizes = [8, 32], strides = [1, 1]} : vector<8x128xf32> to vector<8x32xf32>
    %278 = math.tanh %277 : vector<8x32xf32>
    %279 = vector.extract_strided_slice %264 {offsets = [0, 96], sizes = [8, 32], strides = [1, 1]} : vector<8x128xf32> to vector<8x32xf32>
    %280 = math.tanh %279 : vector<8x32xf32>
    %281 = vector.extract_strided_slice %270 {offsets = [0, 32], sizes = [8, 32], strides = [1, 1]} : vector<8x96xf32> to vector<8x32xf32>
    %c0_126 = arith.constant 0 : index
    %c0_127 = arith.constant 0 : index
    %282 = vector.load %arg11[%c0_126, %c0_127] : memref<8x64xf32, #tpu.memory_space<vmem>>, vector<8x32xf32>
    %283 = arith.mulf %281, %282 : vector<8x32xf32>
    %284 = vector.extract_strided_slice %270 {offsets = [0, 0], sizes = [8, 32], strides = [1, 1]} : vector<8x96xf32> to vector<8x32xf32>
    %285 = arith.mulf %284, %278 : vector<8x32xf32>
    %286 = arith.addf %283, %285 : vector<8x32xf32>
    %287 = vector.extract_strided_slice %276 {offsets = [0, 32], sizes = [8, 32], strides = [1, 1]} : vector<8x96xf32> to vector<8x32xf32>
    %c0_128 = arith.constant 0 : index
    %c32_129 = arith.constant 32 : index
    %288 = vector.load %arg11[%c0_128, %c32_129] : memref<8x64xf32, #tpu.memory_space<vmem>>, vector<8x32xf32>
    %289 = arith.mulf %287, %288 : vector<8x32xf32>
    %290 = vector.extract_strided_slice %276 {offsets = [0, 0], sizes = [8, 32], strides = [1, 1]} : vector<8x96xf32> to vector<8x32xf32>
    %291 = arith.mulf %290, %280 : vector<8x32xf32>
    %292 = arith.addf %289, %291 : vector<8x32xf32>
    %293 = vector.extract_strided_slice %270 {offsets = [0, 64], sizes = [8, 32], strides = [1, 1]} : vector<8x96xf32> to vector<8x32xf32>
    %294 = math.tanh %286 : vector<8x32xf32>
    %295 = arith.mulf %293, %294 : vector<8x32xf32>
    %296 = vector.extract_strided_slice %276 {offsets = [0, 64], sizes = [8, 32], strides = [1, 1]} : vector<8x96xf32> to vector<8x32xf32>
    %297 = math.tanh %292 : vector<8x32xf32>
    %298 = arith.mulf %296, %297 : vector<8x32xf32>
    %c0_130 = arith.constant 0 : index
    %c0_131 = arith.constant 0 : index
    %299 = vector.load %arg11[%c0_130, %c0_131] : memref<8x64xf32, #tpu.memory_space<vmem>>, vector<8x32xf32>
    tpu.vector_store %arg11[%c0_130, %c0_131], %286 {strides = array<i32>} : memref<8x64xf32, #tpu.memory_space<vmem>>, vector<8x32xf32>,
    %c0_132 = arith.constant 0 : index
    %c32_133 = arith.constant 32 : index
    %300 = vector.load %arg11[%c0_132, %c32_133] : memref<8x64xf32, #tpu.memory_space<vmem>>, vector<8x32xf32>
    tpu.vector_store %arg11[%c0_132, %c32_133], %292 {strides = array<i32>} : memref<8x64xf32, #tpu.memory_space<vmem>>, vector<8x32xf32>,
    %c0_134 = arith.constant 0 : index
    %c0_135 = arith.constant 0 : index
    %301 = vector.load %arg10[%c0_134, %c0_135] : memref<8x64xf32, #tpu.memory_space<vmem>>, vector<8x32xf32>
    tpu.vector_store %arg10[%c0_134, %c0_135], %295 {strides = array<i32>} : memref<8x64xf32, #tpu.memory_space<vmem>>, vector<8x32xf32>,
    %c0_136 = arith.constant 0 : index
    %c32_137 = arith.constant 32 : index
    %302 = vector.load %arg10[%c0_136, %c32_137] : memref<8x64xf32, #tpu.memory_space<vmem>>, vector<8x32xf32>
    tpu.vector_store %arg10[%c0_136, %c32_137], %298 {strides = array<i32>} : memref<8x64xf32, #tpu.memory_space<vmem>>, vector<8x32xf32>,
    %303 = arith.index_cast %251 : i32 to index
    %c0_138 = arith.constant 0 : index
    %304 = vector.load %arg6[%303, %c0_138] : memref<64x32xf32, #tpu.memory_space<vmem>>, vector<8x32xf32>
    tpu.vector_store %arg6[%303, %c0_138], %295 {strides = array<i32>} : memref<64x32xf32, #tpu.memory_space<vmem>>, vector<8x32xf32>,
    %305 = arith.index_cast %254 : i32 to index
    %c0_139 = arith.constant 0 : index
    %306 = vector.load %arg7[%305, %c0_139] : memref<64x32xf32, #tpu.memory_space<vmem>>, vector<8x32xf32>
    tpu.vector_store %arg7[%305, %c0_139], %298 {strides = array<i32>} : memref<64x32xf32, #tpu.memory_space<vmem>>, vector<8x32xf32>,
    %c5_i32 = arith.constant 5 : i32
    %c8_i32_140 = arith.constant 8 : i32
    %307 = arith.muli %c5_i32, %c8_i32_140 : i32
    %308 = tpu.assume_multiple %307, 8 : i32
    %c7_i32_141 = arith.constant 7 : i32
    %309 = arith.subi %c7_i32_141, %c5_i32 : i32
    %c8_i32_142 = arith.constant 8 : i32
    %310 = arith.muli %309, %c8_i32_142 : i32
    %311 = tpu.assume_multiple %310, 8 : i32
    %c0_143 = arith.constant 0 : index
    %c0_144 = arith.constant 0 : index
    %312 = vector.load %arg10[%c0_143, %c0_144] : memref<8x64xf32, #tpu.memory_space<vmem>>, vector<8x64xf32>
    %cst_145 = arith.constant dense<0.000000e+00> : vector<8x256xf32>
    %313 = tpu.matmul %312, %21, %cst_145 {dimension_numbers = #tpu.dot_dimension_numbers<[1], [0], [0], [1], [0, 0, 1, 1], [], []>} : vector<8x64xf32>, vector<64x256xf32>, vector<8x256xf32> -> vector<8x256xf32>
    %314 = arith.index_cast %308 : i32 to index
    %c0_146 = arith.constant 0 : index
    %315 = vector.load %arg8[%314, %c0_146] : memref<64x128xf32, #tpu.memory_space<vmem>>, vector<8x128xf32>
    %316 = vector.extract_strided_slice %313 {offsets = [0, 0], sizes = [8, 128], strides = [1, 1]} : vector<8x256xf32> to vector<8x128xf32>
    %317 = arith.addf %315, %316 : vector<8x128xf32>
    %318 = arith.index_cast %311 : i32 to index
    %c0_147 = arith.constant 0 : index
    %319 = vector.load %arg9[%318, %c0_147] : memref<64x128xf32, #tpu.memory_space<vmem>>, vector<8x128xf32>
    %320 = vector.extract_strided_slice %313 {offsets = [0, 128], sizes = [8, 128], strides = [1, 1]} : vector<8x256xf32> to vector<8x128xf32>
    %321 = arith.addf %319, %320 : vector<8x128xf32>
    %322 = vector.extract_strided_slice %317 {offsets = [0, 0], sizes = [8, 96], strides = [1, 1]} : vector<8x128xf32> to vector<8x96xf32>
    %323 = arith.negf %322 : vector<8x96xf32>
    %324 = math.exp %323 : vector<8x96xf32>
    %cst_148 = arith.constant 1.000000e+00 : f32
    %325 = vector.broadcast %cst_148 : f32 to vector<8x96xf32>
    %326 = arith.addf %325, %324 : vector<8x96xf32>
    %327 = arith.divf %325, %326 : vector<8x96xf32>
    %328 = vector.extract_strided_slice %321 {offsets = [0, 0], sizes = [8, 96], strides = [1, 1]} : vector<8x128xf32> to vector<8x96xf32>
    %329 = arith.negf %328 : vector<8x96xf32>
    %330 = math.exp %329 : vector<8x96xf32>
    %cst_149 = arith.constant 1.000000e+00 : f32
    %331 = vector.broadcast %cst_149 : f32 to vector<8x96xf32>
    %332 = arith.addf %331, %330 : vector<8x96xf32>
    %333 = arith.divf %331, %332 : vector<8x96xf32>
    %334 = vector.extract_strided_slice %317 {offsets = [0, 96], sizes = [8, 32], strides = [1, 1]} : vector<8x128xf32> to vector<8x32xf32>
    %335 = math.tanh %334 : vector<8x32xf32>
    %336 = vector.extract_strided_slice %321 {offsets = [0, 96], sizes = [8, 32], strides = [1, 1]} : vector<8x128xf32> to vector<8x32xf32>
    %337 = math.tanh %336 : vector<8x32xf32>
    %338 = vector.extract_strided_slice %327 {offsets = [0, 32], sizes = [8, 32], strides = [1, 1]} : vector<8x96xf32> to vector<8x32xf32>
    %c0_150 = arith.constant 0 : index
    %c0_151 = arith.constant 0 : index
    %339 = vector.load %arg11[%c0_150, %c0_151] : memref<8x64xf32, #tpu.memory_space<vmem>>, vector<8x32xf32>
    %340 = arith.mulf %338, %339 : vector<8x32xf32>
    %341 = vector.extract_strided_slice %327 {offsets = [0, 0], sizes = [8, 32], strides = [1, 1]} : vector<8x96xf32> to vector<8x32xf32>
    %342 = arith.mulf %341, %335 : vector<8x32xf32>
    %343 = arith.addf %340, %342 : vector<8x32xf32>
    %344 = vector.extract_strided_slice %333 {offsets = [0, 32], sizes = [8, 32], strides = [1, 1]} : vector<8x96xf32> to vector<8x32xf32>
    %c0_152 = arith.constant 0 : index
    %c32_153 = arith.constant 32 : index
    %345 = vector.load %arg11[%c0_152, %c32_153] : memref<8x64xf32, #tpu.memory_space<vmem>>, vector<8x32xf32>
    %346 = arith.mulf %344, %345 : vector<8x32xf32>
    %347 = vector.extract_strided_slice %333 {offsets = [0, 0], sizes = [8, 32], strides = [1, 1]} : vector<8x96xf32> to vector<8x32xf32>
    %348 = arith.mulf %347, %337 : vector<8x32xf32>
    %349 = arith.addf %346, %348 : vector<8x32xf32>
    %350 = vector.extract_strided_slice %327 {offsets = [0, 64], sizes = [8, 32], strides = [1, 1]} : vector<8x96xf32> to vector<8x32xf32>
    %351 = math.tanh %343 : vector<8x32xf32>
    %352 = arith.mulf %350, %351 : vector<8x32xf32>
    %353 = vector.extract_strided_slice %333 {offsets = [0, 64], sizes = [8, 32], strides = [1, 1]} : vector<8x96xf32> to vector<8x32xf32>
    %354 = math.tanh %349 : vector<8x32xf32>
    %355 = arith.mulf %353, %354 : vector<8x32xf32>
    %c0_154 = arith.constant 0 : index
    %c0_155 = arith.constant 0 : index
    %356 = vector.load %arg11[%c0_154, %c0_155] : memref<8x64xf32, #tpu.memory_space<vmem>>, vector<8x32xf32>
    tpu.vector_store %arg11[%c0_154, %c0_155], %343 {strides = array<i32>} : memref<8x64xf32, #tpu.memory_space<vmem>>, vector<8x32xf32>,
    %c0_156 = arith.constant 0 : index
    %c32_157 = arith.constant 32 : index
    %357 = vector.load %arg11[%c0_156, %c32_157] : memref<8x64xf32, #tpu.memory_space<vmem>>, vector<8x32xf32>
    tpu.vector_store %arg11[%c0_156, %c32_157], %349 {strides = array<i32>} : memref<8x64xf32, #tpu.memory_space<vmem>>, vector<8x32xf32>,
    %c0_158 = arith.constant 0 : index
    %c0_159 = arith.constant 0 : index
    %358 = vector.load %arg10[%c0_158, %c0_159] : memref<8x64xf32, #tpu.memory_space<vmem>>, vector<8x32xf32>
    tpu.vector_store %arg10[%c0_158, %c0_159], %352 {strides = array<i32>} : memref<8x64xf32, #tpu.memory_space<vmem>>, vector<8x32xf32>,
    %c0_160 = arith.constant 0 : index
    %c32_161 = arith.constant 32 : index
    %359 = vector.load %arg10[%c0_160, %c32_161] : memref<8x64xf32, #tpu.memory_space<vmem>>, vector<8x32xf32>
    tpu.vector_store %arg10[%c0_160, %c32_161], %355 {strides = array<i32>} : memref<8x64xf32, #tpu.memory_space<vmem>>, vector<8x32xf32>,
    %360 = arith.index_cast %308 : i32 to index
    %c0_162 = arith.constant 0 : index
    %361 = vector.load %arg6[%360, %c0_162] : memref<64x32xf32, #tpu.memory_space<vmem>>, vector<8x32xf32>
    tpu.vector_store %arg6[%360, %c0_162], %352 {strides = array<i32>} : memref<64x32xf32, #tpu.memory_space<vmem>>, vector<8x32xf32>,
    %362 = arith.index_cast %311 : i32 to index
    %c0_163 = arith.constant 0 : index
    %363 = vector.load %arg7[%362, %c0_163] : memref<64x32xf32, #tpu.memory_space<vmem>>, vector<8x32xf32>
    tpu.vector_store %arg7[%362, %c0_163], %355 {strides = array<i32>} : memref<64x32xf32, #tpu.memory_space<vmem>>, vector<8x32xf32>,
    %c6_i32 = arith.constant 6 : i32
    %c8_i32_164 = arith.constant 8 : i32
    %364 = arith.muli %c6_i32, %c8_i32_164 : i32
    %365 = tpu.assume_multiple %364, 8 : i32
    %c7_i32_165 = arith.constant 7 : i32
    %366 = arith.subi %c7_i32_165, %c6_i32 : i32
    %c8_i32_166 = arith.constant 8 : i32
    %367 = arith.muli %366, %c8_i32_166 : i32
    %368 = tpu.assume_multiple %367, 8 : i32
    %c0_167 = arith.constant 0 : index
    %c0_168 = arith.constant 0 : index
    %369 = vector.load %arg10[%c0_167, %c0_168] : memref<8x64xf32, #tpu.memory_space<vmem>>, vector<8x64xf32>
    %cst_169 = arith.constant dense<0.000000e+00> : vector<8x256xf32>
    %370 = tpu.matmul %369, %21, %cst_169 {dimension_numbers = #tpu.dot_dimension_numbers<[1], [0], [0], [1], [0, 0, 1, 1], [], []>} : vector<8x64xf32>, vector<64x256xf32>, vector<8x256xf32> -> vector<8x256xf32>
    %371 = arith.index_cast %365 : i32 to index
    %c0_170 = arith.constant 0 : index
    %372 = vector.load %arg8[%371, %c0_170] : memref<64x128xf32, #tpu.memory_space<vmem>>, vector<8x128xf32>
    %373 = vector.extract_strided_slice %370 {offsets = [0, 0], sizes = [8, 128], strides = [1, 1]} : vector<8x256xf32> to vector<8x128xf32>
    %374 = arith.addf %372, %373 : vector<8x128xf32>
    %375 = arith.index_cast %368 : i32 to index
    %c0_171 = arith.constant 0 : index
    %376 = vector.load %arg9[%375, %c0_171] : memref<64x128xf32, #tpu.memory_space<vmem>>, vector<8x128xf32>
    %377 = vector.extract_strided_slice %370 {offsets = [0, 128], sizes = [8, 128], strides = [1, 1]} : vector<8x256xf32> to vector<8x128xf32>
    %378 = arith.addf %376, %377 : vector<8x128xf32>
    %379 = vector.extract_strided_slice %374 {offsets = [0, 0], sizes = [8, 96], strides = [1, 1]} : vector<8x128xf32> to vector<8x96xf32>
    %380 = arith.negf %379 : vector<8x96xf32>
    %381 = math.exp %380 : vector<8x96xf32>
    %cst_172 = arith.constant 1.000000e+00 : f32
    %382 = vector.broadcast %cst_172 : f32 to vector<8x96xf32>
    %383 = arith.addf %382, %381 : vector<8x96xf32>
    %384 = arith.divf %382, %383 : vector<8x96xf32>
    %385 = vector.extract_strided_slice %378 {offsets = [0, 0], sizes = [8, 96], strides = [1, 1]} : vector<8x128xf32> to vector<8x96xf32>
    %386 = arith.negf %385 : vector<8x96xf32>
    %387 = math.exp %386 : vector<8x96xf32>
    %cst_173 = arith.constant 1.000000e+00 : f32
    %388 = vector.broadcast %cst_173 : f32 to vector<8x96xf32>
    %389 = arith.addf %388, %387 : vector<8x96xf32>
    %390 = arith.divf %388, %389 : vector<8x96xf32>
    %391 = vector.extract_strided_slice %374 {offsets = [0, 96], sizes = [8, 32], strides = [1, 1]} : vector<8x128xf32> to vector<8x32xf32>
    %392 = math.tanh %391 : vector<8x32xf32>
    %393 = vector.extract_strided_slice %378 {offsets = [0, 96], sizes = [8, 32], strides = [1, 1]} : vector<8x128xf32> to vector<8x32xf32>
    %394 = math.tanh %393 : vector<8x32xf32>
    %395 = vector.extract_strided_slice %384 {offsets = [0, 32], sizes = [8, 32], strides = [1, 1]} : vector<8x96xf32> to vector<8x32xf32>
    %c0_174 = arith.constant 0 : index
    %c0_175 = arith.constant 0 : index
    %396 = vector.load %arg11[%c0_174, %c0_175] : memref<8x64xf32, #tpu.memory_space<vmem>>, vector<8x32xf32>
    %397 = arith.mulf %395, %396 : vector<8x32xf32>
    %398 = vector.extract_strided_slice %384 {offsets = [0, 0], sizes = [8, 32], strides = [1, 1]} : vector<8x96xf32> to vector<8x32xf32>
    %399 = arith.mulf %398, %392 : vector<8x32xf32>
    %400 = arith.addf %397, %399 : vector<8x32xf32>
    %401 = vector.extract_strided_slice %390 {offsets = [0, 32], sizes = [8, 32], strides = [1, 1]} : vector<8x96xf32> to vector<8x32xf32>
    %c0_176 = arith.constant 0 : index
    %c32_177 = arith.constant 32 : index
    %402 = vector.load %arg11[%c0_176, %c32_177] : memref<8x64xf32, #tpu.memory_space<vmem>>, vector<8x32xf32>
    %403 = arith.mulf %401, %402 : vector<8x32xf32>
    %404 = vector.extract_strided_slice %390 {offsets = [0, 0], sizes = [8, 32], strides = [1, 1]} : vector<8x96xf32> to vector<8x32xf32>
    %405 = arith.mulf %404, %394 : vector<8x32xf32>
    %406 = arith.addf %403, %405 : vector<8x32xf32>
    %407 = vector.extract_strided_slice %384 {offsets = [0, 64], sizes = [8, 32], strides = [1, 1]} : vector<8x96xf32> to vector<8x32xf32>
    %408 = math.tanh %400 : vector<8x32xf32>
    %409 = arith.mulf %407, %408 : vector<8x32xf32>
    %410 = vector.extract_strided_slice %390 {offsets = [0, 64], sizes = [8, 32], strides = [1, 1]} : vector<8x96xf32> to vector<8x32xf32>
    %411 = math.tanh %406 : vector<8x32xf32>
    %412 = arith.mulf %410, %411 : vector<8x32xf32>
    %c0_178 = arith.constant 0 : index
    %c0_179 = arith.constant 0 : index
    %413 = vector.load %arg11[%c0_178, %c0_179] : memref<8x64xf32, #tpu.memory_space<vmem>>, vector<8x32xf32>
    tpu.vector_store %arg11[%c0_178, %c0_179], %400 {strides = array<i32>} : memref<8x64xf32, #tpu.memory_space<vmem>>, vector<8x32xf32>,
    %c0_180 = arith.constant 0 : index
    %c32_181 = arith.constant 32 : index
    %414 = vector.load %arg11[%c0_180, %c32_181] : memref<8x64xf32, #tpu.memory_space<vmem>>, vector<8x32xf32>
    tpu.vector_store %arg11[%c0_180, %c32_181], %406 {strides = array<i32>} : memref<8x64xf32, #tpu.memory_space<vmem>>, vector<8x32xf32>,
    %c0_182 = arith.constant 0 : index
    %c0_183 = arith.constant 0 : index
    %415 = vector.load %arg10[%c0_182, %c0_183] : memref<8x64xf32, #tpu.memory_space<vmem>>, vector<8x32xf32>
    tpu.vector_store %arg10[%c0_182, %c0_183], %409 {strides = array<i32>} : memref<8x64xf32, #tpu.memory_space<vmem>>, vector<8x32xf32>,
    %c0_184 = arith.constant 0 : index
    %c32_185 = arith.constant 32 : index
    %416 = vector.load %arg10[%c0_184, %c32_185] : memref<8x64xf32, #tpu.memory_space<vmem>>, vector<8x32xf32>
    tpu.vector_store %arg10[%c0_184, %c32_185], %412 {strides = array<i32>} : memref<8x64xf32, #tpu.memory_space<vmem>>, vector<8x32xf32>,
    %417 = arith.index_cast %365 : i32 to index
    %c0_186 = arith.constant 0 : index
    %418 = vector.load %arg6[%417, %c0_186] : memref<64x32xf32, #tpu.memory_space<vmem>>, vector<8x32xf32>
    tpu.vector_store %arg6[%417, %c0_186], %409 {strides = array<i32>} : memref<64x32xf32, #tpu.memory_space<vmem>>, vector<8x32xf32>,
    %419 = arith.index_cast %368 : i32 to index
    %c0_187 = arith.constant 0 : index
    %420 = vector.load %arg7[%419, %c0_187] : memref<64x32xf32, #tpu.memory_space<vmem>>, vector<8x32xf32>
    tpu.vector_store %arg7[%419, %c0_187], %412 {strides = array<i32>} : memref<64x32xf32, #tpu.memory_space<vmem>>, vector<8x32xf32>,
    %c7_i32_188 = arith.constant 7 : i32
    %c8_i32_189 = arith.constant 8 : i32
    %421 = arith.muli %c7_i32_188, %c8_i32_189 : i32
    %422 = tpu.assume_multiple %421, 8 : i32
    %c7_i32_190 = arith.constant 7 : i32
    %423 = arith.subi %c7_i32_190, %c7_i32_188 : i32
    %c8_i32_191 = arith.constant 8 : i32
    %424 = arith.muli %423, %c8_i32_191 : i32
    %425 = tpu.assume_multiple %424, 8 : i32
    %c0_192 = arith.constant 0 : index
    %c0_193 = arith.constant 0 : index
    %426 = vector.load %arg10[%c0_192, %c0_193] : memref<8x64xf32, #tpu.memory_space<vmem>>, vector<8x64xf32>
    %cst_194 = arith.constant dense<0.000000e+00> : vector<8x256xf32>
    %427 = tpu.matmul %426, %21, %cst_194 {dimension_numbers = #tpu.dot_dimension_numbers<[1], [0], [0], [1], [0, 0, 1, 1], [], []>} : vector<8x64xf32>, vector<64x256xf32>, vector<8x256xf32> -> vector<8x256xf32>
    %428 = arith.index_cast %422 : i32 to index
    %c0_195 = arith.constant 0 : index
    %429 = vector.load %arg8[%428, %c0_195] : memref<64x128xf32, #tpu.memory_space<vmem>>, vector<8x128xf32>
    %430 = vector.extract_strided_slice %427 {offsets = [0, 0], sizes = [8, 128], strides = [1, 1]} : vector<8x256xf32> to vector<8x128xf32>
    %431 = arith.addf %429, %430 : vector<8x128xf32>
    %432 = arith.index_cast %425 : i32 to index
    %c0_196 = arith.constant 0 : index
    %433 = vector.load %arg9[%432, %c0_196] : memref<64x128xf32, #tpu.memory_space<vmem>>, vector<8x128xf32>
    %434 = vector.extract_strided_slice %427 {offsets = [0, 128], sizes = [8, 128], strides = [1, 1]} : vector<8x256xf32> to vector<8x128xf32>
    %435 = arith.addf %433, %434 : vector<8x128xf32>
    %436 = vector.extract_strided_slice %431 {offsets = [0, 0], sizes = [8, 96], strides = [1, 1]} : vector<8x128xf32> to vector<8x96xf32>
    %437 = arith.negf %436 : vector<8x96xf32>
    %438 = math.exp %437 : vector<8x96xf32>
    %cst_197 = arith.constant 1.000000e+00 : f32
    %439 = vector.broadcast %cst_197 : f32 to vector<8x96xf32>
    %440 = arith.addf %439, %438 : vector<8x96xf32>
    %441 = arith.divf %439, %440 : vector<8x96xf32>
    %442 = vector.extract_strided_slice %435 {offsets = [0, 0], sizes = [8, 96], strides = [1, 1]} : vector<8x128xf32> to vector<8x96xf32>
    %443 = arith.negf %442 : vector<8x96xf32>
    %444 = math.exp %443 : vector<8x96xf32>
    %cst_198 = arith.constant 1.000000e+00 : f32
    %445 = vector.broadcast %cst_198 : f32 to vector<8x96xf32>
    %446 = arith.addf %445, %444 : vector<8x96xf32>
    %447 = arith.divf %445, %446 : vector<8x96xf32>
    %448 = vector.extract_strided_slice %431 {offsets = [0, 96], sizes = [8, 32], strides = [1, 1]} : vector<8x128xf32> to vector<8x32xf32>
    %449 = math.tanh %448 : vector<8x32xf32>
    %450 = vector.extract_strided_slice %435 {offsets = [0, 96], sizes = [8, 32], strides = [1, 1]} : vector<8x128xf32> to vector<8x32xf32>
    %451 = math.tanh %450 : vector<8x32xf32>
    %452 = vector.extract_strided_slice %441 {offsets = [0, 32], sizes = [8, 32], strides = [1, 1]} : vector<8x96xf32> to vector<8x32xf32>
    %c0_199 = arith.constant 0 : index
    %c0_200 = arith.constant 0 : index
    %453 = vector.load %arg11[%c0_199, %c0_200] : memref<8x64xf32, #tpu.memory_space<vmem>>, vector<8x32xf32>
    %454 = arith.mulf %452, %453 : vector<8x32xf32>
    %455 = vector.extract_strided_slice %441 {offsets = [0, 0], sizes = [8, 32], strides = [1, 1]} : vector<8x96xf32> to vector<8x32xf32>
    %456 = arith.mulf %455, %449 : vector<8x32xf32>
    %457 = arith.addf %454, %456 : vector<8x32xf32>
    %458 = vector.extract_strided_slice %447 {offsets = [0, 32], sizes = [8, 32], strides = [1, 1]} : vector<8x96xf32> to vector<8x32xf32>
    %c0_201 = arith.constant 0 : index
    %c32_202 = arith.constant 32 : index
    %459 = vector.load %arg11[%c0_201, %c32_202] : memref<8x64xf32, #tpu.memory_space<vmem>>, vector<8x32xf32>
    %460 = arith.mulf %458, %459 : vector<8x32xf32>
    %461 = vector.extract_strided_slice %447 {offsets = [0, 0], sizes = [8, 32], strides = [1, 1]} : vector<8x96xf32> to vector<8x32xf32>
    %462 = arith.mulf %461, %451 : vector<8x32xf32>
    %463 = arith.addf %460, %462 : vector<8x32xf32>
    %464 = vector.extract_strided_slice %441 {offsets = [0, 64], sizes = [8, 32], strides = [1, 1]} : vector<8x96xf32> to vector<8x32xf32>
    %465 = math.tanh %457 : vector<8x32xf32>
    %466 = arith.mulf %464, %465 : vector<8x32xf32>
    %467 = vector.extract_strided_slice %447 {offsets = [0, 64], sizes = [8, 32], strides = [1, 1]} : vector<8x96xf32> to vector<8x32xf32>
    %468 = math.tanh %463 : vector<8x32xf32>
    %469 = arith.mulf %467, %468 : vector<8x32xf32>
    %c0_203 = arith.constant 0 : index
    %c0_204 = arith.constant 0 : index
    %470 = vector.load %arg11[%c0_203, %c0_204] : memref<8x64xf32, #tpu.memory_space<vmem>>, vector<8x32xf32>
    tpu.vector_store %arg11[%c0_203, %c0_204], %457 {strides = array<i32>} : memref<8x64xf32, #tpu.memory_space<vmem>>, vector<8x32xf32>,
    %c0_205 = arith.constant 0 : index
    %c32_206 = arith.constant 32 : index
    %471 = vector.load %arg11[%c0_205, %c32_206] : memref<8x64xf32, #tpu.memory_space<vmem>>, vector<8x32xf32>
    tpu.vector_store %arg11[%c0_205, %c32_206], %463 {strides = array<i32>} : memref<8x64xf32, #tpu.memory_space<vmem>>, vector<8x32xf32>,
    %c0_207 = arith.constant 0 : index
    %c0_208 = arith.constant 0 : index
    %472 = vector.load %arg10[%c0_207, %c0_208] : memref<8x64xf32, #tpu.memory_space<vmem>>, vector<8x32xf32>
    tpu.vector_store %arg10[%c0_207, %c0_208], %466 {strides = array<i32>} : memref<8x64xf32, #tpu.memory_space<vmem>>, vector<8x32xf32>,
    %c0_209 = arith.constant 0 : index
    %c32_210 = arith.constant 32 : index
    %473 = vector.load %arg10[%c0_209, %c32_210] : memref<8x64xf32, #tpu.memory_space<vmem>>, vector<8x32xf32>
    tpu.vector_store %arg10[%c0_209, %c32_210], %469 {strides = array<i32>} : memref<8x64xf32, #tpu.memory_space<vmem>>, vector<8x32xf32>,
    %474 = arith.index_cast %422 : i32 to index
    %c0_211 = arith.constant 0 : index
    %475 = vector.load %arg6[%474, %c0_211] : memref<64x32xf32, #tpu.memory_space<vmem>>, vector<8x32xf32>
    tpu.vector_store %arg6[%474, %c0_211], %466 {strides = array<i32>} : memref<64x32xf32, #tpu.memory_space<vmem>>, vector<8x32xf32>,
    %476 = arith.index_cast %425 : i32 to index
    %c0_212 = arith.constant 0 : index
    %477 = vector.load %arg7[%476, %c0_212] : memref<64x32xf32, #tpu.memory_space<vmem>>, vector<8x32xf32>
    tpu.vector_store %arg7[%476, %c0_212], %469 {strides = array<i32>} : memref<64x32xf32, #tpu.memory_space<vmem>>, vector<8x32xf32>,
    %c8_i32_213 = arith.constant 8 : i32
    return
  }
  func.func @transform_0(%arg0: i32) -> (i32, i32) {
    %c0_i32 = arith.constant 0 : i32
    %c0_i32_0 = arith.constant 0 : i32
    return %arg0, %c0_i32 : i32, i32
  }
  func.func @transform_1(%arg0: i32) -> (i32, i32) {
    %c0_i32 = arith.constant 0 : i32
    %0 = arith.subi %c0_i32, %arg0 : i32
    %c0_i32_0 = arith.constant 0 : i32
    %c0_i32_1 = arith.constant 0 : i32
    return %0, %c0_i32_0 : i32, i32
  }
  func.func @transform_2(%arg0: i32) -> (i32, i32, i32) {
    %c0_i32 = arith.constant 0 : i32
    %c0_i32_0 = arith.constant 0 : i32
    %c0_i32_1 = arith.constant 0 : i32
    %c0_i32_2 = arith.constant 0 : i32
    return %c0_i32, %c0_i32_0, %c0_i32_1 : i32, i32, i32
  }
  func.func @transform_3(%arg0: i32) -> (i32, i32) {
    %c0_i32 = arith.constant 0 : i32
    %c0_i32_0 = arith.constant 0 : i32
    %c0_i32_1 = arith.constant 0 : i32
    return %c0_i32, %c0_i32_0 : i32, i32
  }
  func.func @transform_4(%arg0: i32) -> (i32, i32, i32) {
    %c0_i32 = arith.constant 0 : i32
    %c0_i32_0 = arith.constant 0 : i32
    %c0_i32_1 = arith.constant 0 : i32
    %c0_i32_2 = arith.constant 0 : i32
    return %c0_i32, %c0_i32_0, %c0_i32_1 : i32, i32, i32
  }
  func.func @transform_5(%arg0: i32) -> (i32, i32) {
    %c0_i32 = arith.constant 0 : i32
    %c0_i32_0 = arith.constant 0 : i32
    return %arg0, %c0_i32 : i32, i32
  }
  func.func @transform_6(%arg0: i32) -> (i32, i32) {
    %c0_i32 = arith.constant 0 : i32
    %0 = arith.subi %c0_i32, %arg0 : i32
    %c0_i32_0 = arith.constant 0 : i32
    %c0_i32_1 = arith.constant 0 : i32
    return %0, %c0_i32_0 : i32, i32
  }
}

</mosaic_0001>

<bundles_post_ra>
// kernel: lstm_forward.5
= control target key start
LH: loop header
LB: loop body
LE: loop exit
PB: predicated region body
PF: predicated region fallthrough
CT: control target
= control target key end

     0   :  { %v451_v0 = vmov 0.0|0.0   ;;  %vm452_vm0 = vmmov 0   ;;  %v453_v4 = vmov 0.0   ;;  %vm42_vm1 = vcmask 523264   ;;  %s610_s1 = inlined_call_operand.vmem [shape: f32[64,128], index: 1, kind: input, shape index: {}]   ;;  %s611_s3 = inlined_call_operand.vmem [shape: f32[128,32], index: 3, kind: input, shape index: {}]   ;;  %s612_s0 = inlined_call_operand.vmem [shape: f32[8,64], index: 0, kind: input, shape index: {}]   ;;  %s613_s5 = inlined_call_operand.vmem [shape: f32[32,128], index: 5, kind: input, shape index: {}]   ;;  %s614_s2 = inlined_call_operand.vmem [shape: f32[1,128], index: 2, kind: input, shape index: {}]   ;;  %s615_s4 = inlined_call_operand.vmem [shape: f32[1,32], index: 4, kind: input, shape index: {}]   ;;  %s616_s6 = inlined_call_operand.vmem [shape: f32[1,128], index: 6, kind: input, shape index: {}]   ;;  %s617_s7 = inlined_call_operand.vmem [shape: f32[8,128], index: 7, kind: output, shape index: {}]  }
   0x1   :  { %406 = vmatprep.subr.bf16.mxu0 %v451_v0  ;;  %v27_v1 = vld [vmem:[%s610_s1] sm:$0xff]  ;;  %v28_v2 = vld [vmem:[%s610_s1 + $0x8] sm:$0xff]  ;;  %v29_v3 = vld [vmem:[%s610_s1 + $0x10] sm:$0xff]  ;;  %357 = vmatprep.mubr.msk.f32.mxu0 %vm452_vm0, %v453_v4  ;;  %vm226_vm4 = vcmask 261120  }
   0x2   :  { %v407_v5 = vpack.c.bf16 %v28_v2, %v27_v1  ;;  %v30_v6 = vld [vmem:[%s610_s1 + $0x18] sm:$0xff]  ;;  %418 = vmatprep.subr.bf16.mxu1 %v451_v0  ;;  %392 = vmatprep.mubr.msk.f32.mxu1 %vm452_vm0, %v453_v4  ;;  %v119_v8 = vld [vmem:[%s611_s3] sm:$0xff]  ;;  %v120_v9 = vld [vmem:[%s611_s3 + $0x8] sm:$0xff] }
   0x3   :  { %v410_v7 = vpack.c.bf16 %v30_v6, %v29_v3  ;;  %v121_v10 = vld [vmem:[%s611_s3 + $0x10] sm:$0xff]  ;;  %v31_v11 = vld [vmem:[%s610_s1 + $0x20] sm:$0xff]  ;;  %v32_v12 = vld [vmem:[%s610_s1 + $0x28] sm:$0xff]  ;;  %v419_v13 = vpack.c.bf16 %v120_v9, %v119_v8 }
   0x4   :  { %408 = vmatpush3.bf16.msra.mxu0 %v407_v5  ;;  %v122_v14 = vld [vmem:[%s611_s3 + $0x18] sm:$0xff]  ;;  %v413_v16 = vpack.c.bf16 %v32_v12, %v31_v11  ;;  %v123_v17 = vld [vmem:[%s611_s3 + $0x20] sm:$0xff]  ;;  %v124_v18 = vld [vmem:[%s611_s3 + $0x28] sm:$0xff] }
   0x5   :  { %409 = vmatprep.subr.bf16.mxu0 %v451_v0  ;;  %420 = vmatpush3.bf16.msra.mxu1 %v419_v13  ;;  %v422_v15 = vpack.c.bf16 %v122_v14, %v121_v10  ;;  %v33_v19 = vld [vmem:[%s610_s1 + $0x30] sm:$0xff]  ;;  %v34_v20 = vld [vmem:[%s610_s1 + $0x38] sm:$0xff]  ;;  %v425_v21 = vpack.c.bf16 %v124_v18, %v123_v17  ;;  %v26_v26 = vld [vmem:[%s612_s0] sm:$0xff] }
   0x6   :  { %421 = vmatprep.subr.bf16.mxu1 %v451_v0  ;;  %v416_v22 = vpack.c.bf16 %v34_v20, %v33_v19  ;;  %v125_v23 = vld [vmem:[%s611_s3 + $0x30] sm:$0xff]  ;;  %v126_v24 = vld [vmem:[%s611_s3 + $0x38] sm:$0xff]  ;;  %v127_v27 = vld [vmem:[%s611_s3 + $0x40] sm:$0xff] }
   0x7   :  { %v428_v25 = vpack.c.bf16 %v126_v24, %v125_v23  ;;  %v128_v28 = vld [vmem:[%s611_s3 + $0x48] sm:$0xff]  ;;  %v129_v30 = vld [vmem:[%s611_s3 + $0x50] sm:$0xff]  ;;  %v130_v31 = vld [vmem:[%s611_s3 + $0x58] sm:$0xff] }
   0x8   :  { %411 = vmatpush3.bf16.msra.mxu0 %v410_v7  ;;  %v431_v29 = vpack.c.bf16 %v128_v28, %v127_v27  ;;  %v434_v32 = vpack.c.bf16 %v130_v31, %v129_v30  ;;  %v131_v33 = vld [vmem:[%s611_s3 + $0x60] sm:$0xff]  ;;  %v132_v34 = vld [vmem:[%s611_s3 + $0x68] sm:$0xff]  ;;  %v133_v36 = vld [vmem:[%s611_s3 + $0x70] sm:$0xff] }
   0x9   :  { %412 = vmatprep.subr.bf16.mxu0 %v451_v0  ;;  %423 = vmatpush3.bf16.msra.mxu1 %v422_v15  ;;  %v437_v35 = vpack.c.bf16 %v132_v34, %v131_v33  ;;  %v134_v37 = vld [vmem:[%s611_s3 + $0x78] sm:$0xff]  ;;  %v215_v39 = vld [vmem:[%s613_s5] sm:$0xff]  ;;  %v216_v40 = vld [vmem:[%s613_s5 + $0x8] sm:$0xff] }
   0xa   :  { %424 = vmatprep.subr.bf16.mxu1 %v451_v0  ;;  %v440_v38 = vpack.c.bf16 %v134_v37, %v133_v36  ;;  %v443_v41 = vpack.c.bf16 %v216_v40, %v215_v39  ;;  %v305_v42 = vld [vmem:[%s614_s2] ss:$0 sm:$0xff]  ;;  %v217_v48 = vld [vmem:[%s613_s5 + $0x10] sm:$0xff]  ;;  %v218_v49 = vld [vmem:[%s613_s5 + $0x18] sm:$0xff] }
   0xb   :  { %v446_v50 = vpack.c.bf16 %v218_v49, %v217_v48  ;;  %v307_v51 = vld [vmem:[%s615_s4] ss:$0 sm:$0xff] }
   0xc   :  { %414 = vmatpush3.bf16.msra.mxu0 %v413_v16  ;;  %v308_v57 = vld [vmem:[%s616_s6] ss:$0 sm:$0xff] }
   0xd   :  { %415 = vmatprep.subr.bf16.mxu0 %v451_v0  ;;  %426 = vmatpush3.bf16.msra.mxu1 %v425_v21 }
   0xe   :  { %427 = vmatprep.subr.bf16.mxu1 %v451_v0 }
  0x10   :  { %417 = vmatpush3.bf16.msra.mxu0 %v416_v22 }
  0x11   :  { %442 = vmatprep.subr.bf16.mxu0 %v451_v0  ;;  %429 = vmatpush3.bf16.msra.mxu1 %v428_v25 }
  0x12   :  { %430 = vmatprep.subr.bf16.mxu1 %v451_v0 }
  0x13   :  { %358 = vmatmul.mubr.msk.f32.vlgmr.msra.gmra.mrb[0].mxu0 %vm42_vm1, %v26_v26 }
  0x14   :  { %403 = vmatprep.mubr.msk.f32.mxu0 %vm452_vm0, %v453_v4  ;;  %444 = vmatpush3.bf16.msra.mxu0 %v443_v41 }
  0x15   :  { %432 = vmatpush3.bf16.msra.mxu1 %v431_v29  ;;  %445 = vmatprep.subr.bf16.mxu0 %v451_v0 }
  0x16   :  { %433 = vmatprep.subr.bf16.mxu1 %v451_v0 }
  0x18   :  { %447 = vmatpush3.bf16.msra.mxu0 %v446_v50 }
  0x19   :  { %435 = vmatpush3.bf16.msra.mxu1 %v434_v32 }
  0x1a   :  { %436 = vmatprep.subr.bf16.mxu1 %v451_v0 }
  0x1d   :  { %438 = vmatpush3.bf16.msra.mxu1 %v437_v35 }
  0x1e   :  { %439 = vmatprep.subr.bf16.mxu1 %v451_v0 }
  0x21   :  { %441 = vmatpush3.bf16.msra.mxu1 %v440_v38 }
  0xe6   :  { %v112_v43 = vpop.f32.mrb[0].mxu0 }
  0xe7   :  { %v113_v44 = vadd.f32 %v305_v42, %v112_v43  ;;  %v359_v45 = vpop.f32.mrb[1].mxu0 }
  0xe9   :  { %v117_v46 = vmul.f32 0.01, %v113_v44  ;;  %vm116_vm2 = vcmp.gt.f32.partialorder %v113_v44, 0.0 }
  0xeb   :  { %v118_v47 = vsel %vm116_vm2, %v113_v44, %v117_v46 }
  0xec   :  { %393 = vmatmul.mubr.f32.vlgmr.msra.gmra.mrb[0].mxu1 %v118_v47 }
 0x1bf   :  { %v208_v52 = vpop.f32.mrb[0].mxu1 }
 0x1c0   :  { %v209_v53 = vadd.f32 %v307_v51, %v208_v52  ;;  %v394_v54 = vpop.f32.mrb[1].mxu1 }
 0x1c2   :  { %vm212_vm3 = vcmp.gt.f32.partialorder %v209_v53, 0.0  ;;  %v213_v55 = vmul.f32 0.01, %v209_v53 }
 0x1c4   :  { %v214_v56 = vsel %vm212_vm3, %v209_v53, %v213_v55 }
 0x1c5   :  { %404 = vmatmul.mubr.msk.f32.vlgmr.msra.gmra.mrb[2].mxu0 %vm226_vm4, %v214_v56 }
 0x298   :  { %v296_v58 = vpop.f32.mrb[2].mxu0 }
 0x299   :  { %v297_v59 = vadd.f32 %v308_v57, %v296_v58  ;;  %v405_v60 = vpop.f32.mrb[3].mxu0 }
 0x29b   :  { %300 = vst [vmem:[%s617_s7] sm:$0xff] %v297_v59 }

// kernel: lstm_forward.4
= control target key start
LH: loop header
LB: loop body
LE: loop exit
PB: predicated region body
PF: predicated region fallthrough
CT: control target
= control target key end

     0   :  { %vm63_vm0 = vcmask 523264   ;;  %v2076_v1 = vmov 0.0   ;;  %s2077_s29 = smov 32   ;;  %s2079_s13 = smov 96   ;;  %vm526_vm1 = vcmask 261120   ;;  %vm528_vm2 = vcmask 523520   ;;  %s2583_s2 = inlined_call_operand.vmem [shape: bf16[2,64,128], index: 2, kind: input, shape index: {}]   ;;  %s2584_s0 = inlined_call_operand.vmem [shape: bf16[64,64], index: 0, kind: input, shape index: {}, may-alias: {0,1}]   ;;  %s2585_s3 = inlined_call_operand.vmem [shape: f32[64,256], index: 3, kind: input, shape index: {}]   ;;  %s2586_s1 = inlined_call_operand.vmem [shape: bf16[64,64], index: 1, kind: input, shape index: {}, may-alias: {0,1}]   ;;  %s2587_s4 = inlined_call_operand.vmem [shape: f32[2,1,128], index: 4, kind: input, shape index: {}]   ;;  %s2588_s5 = inlined_call_operand.vmem [shape: f32[64,32], index: 5, kind: output, shape index: {0}]   ;;  %s2589_s6 = inlined_call_operand.vmem [shape: f32[64,32], index: 6, kind: output, shape index: {1}]  }
   0x1   :  { %v1932_v0 = vld [vmem:[%s2583_s2] sm:$0xff]   ;;  %64 = vst.msk [vmem:[#allocation4] sm:$0xff] %vm63_vm0, %v2076_v1  ;;  %65 = vst.msk [vmem:[#allocation5] sm:$0xff] %vm63_vm0, %v2076_v1  ;;  %v1933_v2 = vld [vmem:[%s2583_s2 + $0x8] sm:$0xff]  }
   0x2   :  { %1768 = vmatprep.subr.bf16.mxu0 %v1932_v0  ;;  %v1934_v3 = vld [vmem:[%s2583_s2 + $0x20] sm:$0xff]   ;;  %v1935_v4 = vld [vmem:[%s2583_s2 + $0x10] sm:$0xff]   ;;  %v1936_v5 = vld [vmem:[%s2583_s2 + $0x28] sm:$0xff]  }
   0x3   :  { %1769 = vmatpush3.bf16.msra.mxu0 %v1932_v0  ;;  %1784 = vmatprep.subr.bf16.mxu1 %v1934_v3  ;;  %v1938_v6 = vld [vmem:[%s2583_s2 + $0x30] sm:$0xff]   ;;  %v1939_v7 = vld [vmem:[%s2584_s0] sm:$0xff]   ;;  %v1937_v8 = vld [vmem:[%s2583_s2 + $0x18] sm:$0xff]  }
   0x4   :  { %1770 = vmatprep.subr.bf16.mxu0 %v1933_v2  ;;  %1785 = vmatpush3.bf16.msra.mxu1 %v1934_v3  ;;  %v374_v9 = vld [vmem:[%s2585_s3 + $0x8] sm:$0xff]  ;;  %v376_v10 = vld [vmem:[%s2585_s3 + $0x18] sm:$0xff]  ;;  %v373_v12 = vld [vmem:[%s2585_s3] sm:$0xff] }
   0x5   :  { %1786 = vmatprep.subr.bf16.mxu1 %v1936_v5  ;;  %1776 = vmatprep.mubr.msk.bf16.mxu0 %vm63_vm0, %v1939_v7  ;;  %v1941_v11 = vld [vmem:[%s2583_s2 + $0x38] sm:$0xff]   ;;  %v2156_v13 = vpack.c.bf16 %v376_v10, %v374_v9  ;;  %v375_v14 = vld [vmem:[%s2585_s3 + $0x10] sm:$0xff]  ;;  %v1942_v15 = vld [vmem:[%s2586_s1] sm:$0xff]  }
   0x6   :  { %v378_v16 = vld [vmem:[%s2585_s3 + $0x28] sm:$0xff]  ;;  %v380_v17 = vld [vmem:[%s2585_s3 + $0x38] sm:$0xff]  ;;  %1792 = vmatprep.mubr.msk.bf16.mxu1 %vm63_vm0, %v1942_v15  ;;  %v2177_v20 = vpack.c.bf16 %v375_v14, %v373_v12  ;;  %v1944_v21 = vld [vmem:[%s2584_s0 + $0x10] sm:$0xff]  }
   0x7   :  { %1771 = vmatpush3.bf16.msra.mxu0 %v1933_v2  ;;  %v1940_v18 = vld [vmem:[%s2584_s0 + $0x8] sm:$0xff]   ;;  %v2183_v22 = vpack.c.bf16 %v380_v17, %v378_v16  ;;  %v377_v23 = vld [vmem:[%s2585_s3 + $0x20] sm:$0xff]  ;;  %v379_v24 = vld [vmem:[%s2585_s3 + $0x30] sm:$0xff] }
   0x8   :  { %1772 = vmatprep.subr.bf16.mxu0 %v1935_v4  ;;  %1787 = vmatpush3.bf16.msra.mxu1 %v1936_v5  ;;  %v1943_v19 = vld [vmem:[%s2586_s1 + $0x8] sm:$0xff]   ;;  %v384_v26 = vld [vmem:[%s2585_s3 + $0x58] sm:$0xff]  ;;  %v1946_v27 = vld [vmem:[%s2586_s1 + $0x10] sm:$0xff]   ;;  %v2203_v28 = vpack.c.bf16 %v379_v24, %v377_v23 }
   0x9   :  { %1788 = vmatprep.subr.bf16.mxu1 %v1938_v6  ;;  %v382_v25 = vld [vmem:[%s2585_s3 + $0x48] sm:$0xff]  ;;  %v381_v30 = vld [vmem:[%s2585_s3 + $0x40] sm:$0xff]  ;;  %v383_v31 = vld [vmem:[%s2585_s3 + $0x50] sm:$0xff] }
   0xa   :  { %v2208_v29 = vpack.c.bf16 %v384_v26, %v382_v25  ;;  %v386_v32 = vld [vmem:[%s2585_s3 + $0x68] sm:$0xff]  ;;  %v388_v33 = vld [vmem:[%s2585_s3 + $0x78] sm:$0xff]  ;;  %v2233_v36 = vpack.c.bf16 %v383_v31, %v381_v30  ;;  %v385_v39 = vld [vmem:[%s2585_s3 + $0x60] sm:$0xff] }
   0xb   :  { %1773 = vmatpush3.bf16.msra.mxu0 %v1935_v4  ;;  %v2223_v34 = vld [vmem:[#allocation5] sm:$0xff]  ;;  %v1945_v35 = vld [vmem:[%s2584_s0 + $0x18] sm:$0xff]   ;;  %v2236_v37 = vpack.c.bf16 %v388_v33, %v386_v32  ;;  %v387_v40 = vld [vmem:[%s2585_s3 + $0x70] sm:$0xff] }
   0xc   :  { %1774 = vmatprep.subr.bf16.mxu0 %v1937_v8  ;;  %1789 = vmatpush3.bf16.msra.mxu1 %v1938_v6  ;;  %v1947_v38 = vld [vmem:[%s2586_s1 + $0x18] sm:$0xff]   ;;  %v2251_v41 = vpack.c.bf16 %v387_v40, %v385_v39  ;;  %v389_v42 = vld [vmem:[#allocation4] sm:$0xff] }
   0xd   :  { %1790 = vmatprep.subr.bf16.mxu1 %v1941_v11  ;;  %485 = vrot.lane.b32.xlu1 %v2223_v34, %s2077_s29  ;;  %v1679_v43 = vld [vmem:[%s2587_s4] ss:$0 sm:$0xff]  ;;  %v1701_v45 = vld [vmem:[%s2587_s4 + $0x1] ss:$0 sm:$0xff]  ;;  %s2078_s4 = smov 64  }
   0xf   :  { %1775 = vmatpush3.bf16.msra.mxu0 %v1937_v8 }
  0x10   :  { %1801 = vmatprep.subr.bf16.mxu0 %v2156_v13  ;;  %1791 = vmatpush3.bf16.msra.mxu1 %v1941_v11 }
  0x11   :  { %1817 = vmatprep.subr.bf16.mxu1 %v2156_v13 }
  0x12   :  { %1777 = vmatmul.mubr.msk.bf16.vlgmr.msra.gmra.mrb[0].mxu0 %vm63_vm0, %v1940_v18 }
  0x13   :  { %1803 = vmatpush1.bf16.msra.mxu0 %v2177_v20  ;;  %1780 = vmatprep.mubr.msk.bf16.mxu0 %vm63_vm0, %v1944_v21 }
  0x14   :  { %1805 = vmatprep.subr.bf16.mxu0 %v2183_v22  ;;  %1793 = vmatmul.mubr.msk.bf16.vlgmr.msra.gmra.mrb[0].mxu1 %vm63_vm0, %v1943_v19 }
  0x15   :  { %1796 = vmatprep.mubr.msk.bf16.mxu1 %vm63_vm0, %v1946_v27  ;;  %1819 = vmatpush1.bf16.msra.mxu1 %v2177_v20 }
  0x16   :  { %1821 = vmatprep.subr.bf16.mxu1 %v2183_v22 }
  0x17   :  { %1807 = vmatpush1.bf16.msra.mxu0 %v2203_v28 }
  0x18   :  { %1809 = vmatprep.subr.bf16.mxu0 %v2208_v29 }
  0x19   :  { %1823 = vmatpush1.bf16.msra.mxu1 %v2203_v28 }
  0x1a   :  { %1781 = vmatmul.mubr.msk.bf16.gmra.mrb[4].mxu0 %vm63_vm0, %v1945_v35  ;;  %1825 = vmatprep.subr.bf16.mxu1 %v2208_v29 }
  0x1b   :  { %1811 = vmatpush1.bf16.msra.mxu0 %v2233_v36  ;;  %457 = vmatprep.mubr.f32.mxu0 %v2076_v1 }
  0x1c   :  { %1813 = vmatprep.subr.bf16.mxu0 %v2236_v37  ;;  %1797 = vmatmul.mubr.msk.bf16.gmra.mrb[4].mxu1 %vm63_vm0, %v1947_v38 }
  0x1d   :  { %1827 = vmatpush1.bf16.msra.mxu1 %v2233_v36  ;;  %614 = vmatprep.mubr.f32.mxu1 %v2076_v1 }
  0x1e   :  { %1829 = vmatprep.subr.bf16.mxu1 %v2236_v37 }
  0x1f   :  { %1815 = vmatpush1.bf16.msra.mxu0 %v2251_v41 }
  0x20   :  { %1833 = vmatprep.subr.bf16.mxu0 %v2156_v13 }
  0x21   :  { %1831 = vmatpush1.bf16.msra.mxu1 %v2251_v41 }
  0x22   :  { %1714 = vmatmul.mubr.msk.f32.vlgmr.msra.gmra.mrb[8].mxu0 %vm63_vm0, %v389_v42  ;;  %1849 = vmatprep.subr.bf16.mxu1 %v2156_v13 }
  0x23   :  { %1835 = vmatpush1.bf16.msra.mxu0 %v2177_v20  ;;  %771 = vmatprep.mubr.f32.mxu0 %v2076_v1 }
  0x24   :  { %1837 = vmatprep.subr.bf16.mxu0 %v2183_v22 }
  0x27   :  { %1839 = vmatpush1.bf16.msra.mxu0 %v2203_v28 }
  0x28   :  { %1841 = vmatprep.subr.bf16.mxu0 %v2208_v29 }
  0x2b   :  { %1843 = vmatpush1.bf16.msra.mxu0 %v2233_v36 }
  0x2c   :  { %1845 = vmatprep.subr.bf16.mxu0 %v2236_v37 }
  0x2f   :  { %1847 = vmatpush1.bf16.msra.mxu0 %v2251_v41 }
  0x30   :  { %1865 = vmatprep.subr.bf16.mxu0 %v2156_v13 }
  0x7f   :  { %v486_v40 = vpop.permute.xlu1 %485 }
  0xe5   :  { %v1778_v44 = vpop.f32.mrb[0].mxu0 }
  0xe6   :  { %v2279_v46 = vadd.f32 %v1778_v44, %v1679_v43  ;;  %v180_v47 = vpop.f32.mrb[1].mxu0 }
  0xe7   :  { %v1779_v48 = vpop.f32.mrb[2].mxu0  ;;  %v1794_v49 = vpop.f32.mrb[0].mxu1  ;;  %v181_v14 = vadd.f32 %v1679_v43, %v180_v47 }
  0xe8   :  { %v2281_v50 = vadd.f32 %v1779_v48, %v1679_v43  ;;  %v183_v51 = vpop.f32.mrb[3].mxu0  ;;  %v2283_v52 = vadd.f32 %v1794_v49, %v1701_v45  ;;  %v334_v53 = vpop.f32.mrb[1].mxu1 }
  0xe9   :  { %v2285_v54 = vadd.f32 %v1679_v43, %v183_v51  ;;  %v2287_v55 = vadd.f32 %v1701_v45, %v334_v53  ;;  %v1795_v56 = vpop.f32.mrb[2].mxu1 }
  0xea   :  { %v2289_v57 = vadd.f32 %v1795_v56, %v1701_v45  ;;  %v337_v58 = vpop.f32.mrb[3].mxu1 }
  0xeb   :  { %v2291_v59 = vadd.f32 %v1701_v45, %v337_v58 }
  0xed   :  { %v1782_v60 = vpop.f32.mrb[4].mxu0 }
  0xee   :  { %v2293_v61 = vadd.f32 %v1782_v60, %v1679_v43  ;;  %v196_v62 = vpop.f32.mrb[5].mxu0 }
  0xef   :  { %v2295_v63 = vadd.f32 %v1679_v43, %v196_v62  ;;  %v1783_v0 = vpop.f32.mrb[6].mxu0  ;;  %v1798_v2 = vpop.f32.mrb[4].mxu1 }
  0xf0   :  { %v2297_v3 = vadd.f32 %v1783_v0, %v1679_v43  ;;  %v199_v4 = vpop.f32.mrb[7].mxu0  ;;  %v2299_v5 = vadd.f32 %v1798_v2, %v1701_v45  ;;  %v350_v6 = vpop.f32.mrb[5].mxu1 }
  0xf1   :  { %v2301_v7 = vadd.f32 %v1679_v43, %v199_v4  ;;  %v2303_v8 = vadd.f32 %v1701_v45, %v350_v6  ;;  %v1799_v9 = vpop.f32.mrb[6].mxu1 }
  0xf2   :  { %v353_v10 = vpop.f32.mrb[7].mxu1  ;;  %v362_v11 = vadd.f32 %v1799_v9, %v1701_v45 }
  0xf3   :  { %v2305_v12 = vadd.f32 %v1701_v45, %v353_v10 }
  0xf5   :  { %v459_v15 = vpop.f32.mrb[8].mxu0 }
  0xf6   :  { %v465_v16 = vadd.f32 %v459_v15, %v181_v14  ;;  %v461_v17 = vpop.f32.mrb[9].mxu0 }
  0xf7   :  { %v468_v18 = vadd.f32 %v461_v17, %v362_v11 }
  0xf8   :  { %1948 = vtanh.f32 %v465_v16  ;;  %v1715_v23 = vmul.f32 -1.442695, %v465_v16 }
  0xf9   :  { %1950 = vtanh.f32 %v468_v18  ;;  %v1716_v24 = vmul.f32 -1.442695, %v468_v18 }
  0xfa   :  { %1952 = vpow2.f32 %v1715_v23 }
  0xfb   :  { %1954 = vpow2.f32 %v1716_v24 }
 0x102   :  { %v1949_v19 = vpop.eup %1948 }
 0x103   :  { %490 = vrot.lane.b32.xlu0 %v1949_v19, %s2077_s29  ;;  %v1951_v21 = vpop.eup %1950 }
 0x104   :  { %v1953_v25 = vpop.eup %1952 }
 0x105   :  { %v472_v26 = vadd.f32 1.0, %v1953_v25  ;;  %v1955_v27 = vpop.eup %1954 }
 0x106   :  { %v478_v30 = vadd.f32 1.0, %v1955_v27 }
 0x107   :  { %501 = vrot.lane.b32.xlu0 %v1951_v21, %s2077_s29  ;;  %1956 = vrcp.f32 %v472_v26 }
 0x108   :  { %1958 = vrcp.f32 %v478_v30 }
 0x111   :  { %v1957_v31 = vpop.eup %1956 }
 0x112   :  { %v1959_v35 = vpop.eup %1958  ;;  %v488_v42 = vmul.f32 %v1957_v31, %v486_v40 }
 0x113   :  { %v499_v45 = vmul.f32 %v1959_v35, %v2223_v34 }
 0x175   :  { %v491_v32 = vpop.permute.xlu0 %490 }
 0x176   :  { %v493_v33 = vmul.f32 %v1957_v31, %v491_v32 }
 0x178   :  { %495 = vrot.lane.b32.xlu1 %v493_v33, %s2077_s29 }
 0x179   :  { %v502_v38 = vpop.permute.xlu0 %501 }
 0x17a   :  { %v504_v39 = vmul.f32 %v1959_v35, %v502_v38 }
 0x17c   :  { %506 = vrot.lane.b32.xlu0 %v504_v39, %s2077_s29 }
 0x1ea   :  { %v496_v43 = vpop.permute.xlu1 %495 }
 0x1eb   :  { %v498_v44 = vadd.f32 %v496_v43, %v488_v42 }
 0x1ed   :  { %1960 = vtanh.f32 %v498_v44 }
 0x1ee   :  { %v507_v47 = vpop.permute.xlu0 %506 }
 0x1ef   :  { %v509_v48 = vadd.f32 %v507_v47, %v499_v45 }
 0x1f1   :  { %1962 = vtanh.f32 %v509_v48 }
 0x1f7   :  { %v1961_v49 = vpop.eup %1960 }
 0x1f8   :  { %512 = vrot.lane.b32.xlu1 %v1961_v49, %s2077_s29 }
 0x1fb   :  { %v1963_v51 = vpop.eup %1962 }
 0x1fc   :  { %518 = vrot.lane.b32.xlu0 %v1963_v51, %s2077_s29 }
 0x26a   :  { %v513_v53 = vpop.permute.xlu1 %512 }
 0x26b   :  { %v515_v56 = vmul.f32 %v1957_v31, %v513_v53 }
 0x26d   :  { %531 = vrot.lane.b32.xlu1 %v515_v56, %s2078_s4 }
 0x26e   :  { %v519_v58 = vpop.permute.xlu0 %518 }
 0x26f   :  { %v2315_v60 = vmul.f32 %v1959_v35, %v519_v58 }
 0x271   :  { %536 = vrot.lane.b32.xlu0 %v2315_v60, %s2079_s13  ;;  %523 = vrot.lane.b32.xlu1 %v498_v44, %s2079_s13 }
 0x2df   :  { %v532_v34 = vpop.permute.xlu1 %531 }
 0x2e0   :  { %534 = vst.msk [vmem:[#allocation4] sm:$0xff] %vm526_vm1, %v532_v34  ;;  %540 = vst.msk [vmem:[%s2588_s5] sm:$0xff] %vm526_vm1, %v532_v34 }
 0x2e3   :  { %v537_v62 = vpop.permute.xlu0 %536  ;;  %v524_v0 = vpop.permute.xlu1 %523 }
 0x2e4   :  { %539 = vst.msk [vmem:[#allocation4] sm:$0xff] %vm528_vm2, %v537_v62 }
 0x2e5   :  { %527 = vst.msk [vmem:[#allocation5] sm:$0xff] %vm526_vm1, %v524_v0 }
 0x2e6   :  { %529 = vst.msk [vmem:[#allocation5] sm:$0xff] %vm528_vm2, %v509_v48 }
 0x2eb   :  { %v546_v2 = vld [vmem:[#allocation4] sm:$0xff] }
 0x2ec   :  { %1718 = vmatmul.mubr.msk.f32.vlgmr.msra.gmra.mrb[8].mxu1 %vm63_vm0, %v546_v2 }
 0x2ed   :  { %1851 = vmatpush1.bf16.msra.mxu1 %v2177_v20  ;;  %928 = vmatprep.mubr.f32.mxu1 %v2076_v1  ;;  %v641_v15 = vld [vmem:[#allocation5] sm:$0xff] }
 0x2ee   :  { %1853 = vmatprep.subr.bf16.mxu1 %v2183_v22 }
 0x2f1   :  { %1855 = vmatpush1.bf16.msra.mxu1 %v2203_v28 }
 0x2f2   :  { %1857 = vmatprep.subr.bf16.mxu1 %v2208_v29 }
 0x2f5   :  { %1859 = vmatpush1.bf16.msra.mxu1 %v2233_v36 }
 0x2f6   :  { %1861 = vmatprep.subr.bf16.mxu1 %v2236_v37 }
 0x2f9   :  { %1863 = vmatpush1.bf16.msra.mxu1 %v2251_v41 }
 0x2fa   :  { %1881 = vmatprep.subr.bf16.mxu1 %v2156_v13 }
 0x3bf   :  { %v616_v4 = vpop.f32.mrb[8].mxu1 }
 0x3c0   :  { %v623_v6 = vadd.f32 %v616_v4, %v2285_v54  ;;  %v618_v9 = vpop.f32.mrb[9].mxu1 }
 0x3c1   :  { %v626_v10 = vadd.f32 %v618_v9, %v2299_v5 }
 0x3c2   :  { %1964 = vtanh.f32 %v623_v6  ;;  %v1719_v16 = vmul.f32 -1.442695, %v623_v6 }
 0x3c3   :  { %1966 = vtanh.f32 %v626_v10  ;;  %v1720_v17 = vmul.f32 -1.442695, %v626_v10 }
 0x3c4   :  { %1968 = vpow2.f32 %v1719_v16 }
 0x3c5   :  { %1970 = vpow2.f32 %v1720_v17 }
 0x3cc   :  { %v1965_v11 = vpop.eup %1964 }
 0x3cd   :  { %v1967_v14 = vpop.eup %1966  ;;  %648 = vrot.lane.b32.xlu0 %v1965_v11, %s2077_s29 }
 0x3ce   :  { %659 = vrot.lane.b32.xlu1 %v1967_v14, %s2077_s29  ;;  %v1969_v18 = vpop.eup %1968 }
 0x3cf   :  { %v1971_v54 = vpop.eup %1970  ;;  %v630_v19 = vadd.f32 1.0, %v1969_v18 }
 0x3d0   :  { %v636_v21 = vadd.f32 1.0, %v1971_v54 }
 0x3d1   :  { %643 = vrot.lane.b32.xlu0 %v641_v15, %s2077_s29  ;;  %1972 = vrcp.f32 %v630_v19 }
 0x3d2   :  { %1974 = vrcp.f32 %v636_v21 }
 0x3db   :  { %v1973_v5 = vpop.eup %1972 }
 0x3dc   :  { %v1975_v24 = vpop.eup %1974 }
 0x3dd   :  { %v657_v33 = vmul.f32 %v1975_v24, %v641_v15 }
 0x43f   :  { %v649_v23 = vpop.permute.xlu0 %648 }
 0x440   :  { %v651_v25 = vmul.f32 %v1973_v5, %v649_v23  ;;  %v660_v26 = vpop.permute.xlu1 %659 }
 0x441   :  { %v662_v27 = vmul.f32 %v1975_v24, %v660_v26 }
 0x442   :  { %653 = vrot.lane.b32.xlu1 %v651_v25, %s2077_s29 }
 0x443   :  { %664 = vrot.lane.b32.xlu0 %v662_v27, %s2077_s29  ;;  %v644_v30 = vpop.permute.xlu0 %643 }
 0x444   :  { %v646_v31 = vmul.f32 %v1973_v5, %v644_v30 }
 0x4b4   :  { %v654_v32 = vpop.permute.xlu1 %653 }
 0x4b5   :  { %v656_v35 = vadd.f32 %v654_v32, %v646_v31  ;;  %v665_v38 = vpop.permute.xlu0 %664 }
 0x4b6   :  { %v667_v39 = vadd.f32 %v665_v38, %v657_v33 }
 0x4b7   :  { %1976 = vtanh.f32 %v656_v35 }
 0x4b8   :  { %1978 = vtanh.f32 %v667_v39 }
 0x4c1   :  { %v1977_v40 = vpop.eup %1976 }
 0x4c2   :  { %v1979_v42 = vpop.eup %1978  ;;  %670 = vrot.lane.b32.xlu1 %v1977_v40, %s2077_s29 }
 0x4c3   :  { %676 = vrot.lane.b32.xlu0 %v1979_v42, %s2077_s29 }
 0x534   :  { %v671_v43 = vpop.permute.xlu1 %670 }
 0x535   :  { %v673_v44 = vmul.f32 %v1973_v5, %v671_v43  ;;  %v677_v45 = vpop.permute.xlu0 %676 }
 0x536   :  { %v2347_v47 = vmul.f32 %v1975_v24, %v677_v45 }
 0x537   :  { %687 = vrot.lane.b32.xlu1 %v673_v44, %s2078_s4 }
 0x538   :  { %692 = vrot.lane.b32.xlu0 %v2347_v47, %s2079_s13 }
 0x53b   :  { %681 = vrot.lane.b32.xlu1 %v656_v35, %s2079_s13 }
 0x5a9   :  { %v688_v48 = vpop.permute.xlu1 %687 }
 0x5aa   :  { %690 = vst.msk [vmem:[#allocation4] sm:$0xff] %vm526_vm1, %v688_v48  ;;  %1721 = vst.msk [vmem:[%s2588_s5 + $0x8] sm:$0xff] %vm526_vm1, %v688_v48  ;;  %v693_v49 = vpop.permute.xlu0 %692 }
 0x5ab   :  { %695 = vst.msk [vmem:[#allocation4] sm:$0xff] %vm528_vm2, %v693_v49 }
 0x5ad   :  { %v682_v51 = vpop.permute.xlu1 %681 }
 0x5ae   :  { %684 = vst.msk [vmem:[#allocation5] sm:$0xff] %vm526_vm1, %v682_v51 }
 0x5af   :  { %685 = vst.msk [vmem:[#allocation5] sm:$0xff] %vm528_vm2, %v667_v39 }
 0x5b2   :  { %v703_v53 = vld [vmem:[#allocation4] sm:$0xff] }
 0x5b3   :  { %1723 = vmatmul.mubr.msk.f32.vlgmr.msra.gmra.mrb[10].mxu0 %vm63_vm0, %v703_v53 }
 0x5b4   :  { %1867 = vmatpush1.bf16.msra.mxu0 %v2177_v20  ;;  %1085 = vmatprep.mubr.f32.mxu0 %v2076_v1 }
 0x5b5   :  { %1869 = vmatprep.subr.bf16.mxu0 %v2183_v22 }
 0x5b6   :  { %v798_v4 = vld [vmem:[#allocation5] sm:$0xff] }
 0x5b8   :  { %1871 = vmatpush1.bf16.msra.mxu0 %v2203_v28 }
 0x5b9   :  { %1873 = vmatprep.subr.bf16.mxu0 %v2208_v29 }
 0x5bc   :  { %1875 = vmatpush1.bf16.msra.mxu0 %v2233_v36 }
 0x5bd   :  { %1877 = vmatprep.subr.bf16.mxu0 %v2236_v37 }
 0x5c0   :  { %1879 = vmatpush1.bf16.msra.mxu0 %v2251_v41 }
 0x5c1   :  { %1897 = vmatprep.subr.bf16.mxu0 %v2156_v13 }
 0x686   :  { %v773_v56 = vpop.f32.mrb[10].mxu0 }
 0x687   :  { %v780_v58 = vadd.f32 %v773_v56, %v2279_v46  ;;  %v775_v34 = vpop.f32.mrb[11].mxu0 }
 0x688   :  { %v783_v62 = vadd.f32 %v775_v34, %v2305_v12 }
 0x689   :  { %1980 = vtanh.f32 %v780_v58  ;;  %v1724_v6 = vmul.f32 -1.442695, %v780_v58 }
 0x68a   :  { %1982 = vtanh.f32 %v783_v62  ;;  %v1725_v9 = vmul.f32 -1.442695, %v783_v62 }
 0x68b   :  { %1984 = vpow2.f32 %v1724_v6 }
 0x68c   :  { %1986 = vpow2.f32 %v1725_v9 }
 0x693   :  { %v1981_v0 = vpop.eup %1980 }
 0x694   :  { %v1983_v2 = vpop.eup %1982  ;;  %805 = vrot.lane.b32.xlu0 %v1981_v0, %s2077_s29 }
 0x695   :  { %816 = vrot.lane.b32.xlu1 %v1983_v2, %s2077_s29  ;;  %v1985_v10 = vpop.eup %1984 }
 0x696   :  { %v1987_v46 = vpop.eup %1986  ;;  %v787_v11 = vadd.f32 1.0, %v1985_v10 }
 0x697   :  { %v793_v14 = vadd.f32 1.0, %v1987_v46 }
 0x698   :  { %800 = vrot.lane.b32.xlu0 %v798_v4, %s2077_s29  ;;  %1988 = vrcp.f32 %v787_v11 }
 0x699   :  { %1990 = vrcp.f32 %v793_v14 }
 0x6a2   :  { %v1989_v12 = vpop.eup %1988 }
 0x6a3   :  { %v1991_v16 = vpop.eup %1990 }
 0x6a4   :  { %v814_v23 = vmul.f32 %v1991_v16, %v798_v4 }
 0x706   :  { %v806_v15 = vpop.permute.xlu0 %805 }
 0x707   :  { %v808_v17 = vmul.f32 %v1989_v12, %v806_v15  ;;  %v817_v18 = vpop.permute.xlu1 %816 }
 0x708   :  { %v819_v54 = vmul.f32 %v1991_v16, %v817_v18 }
 0x709   :  { %810 = vrot.lane.b32.xlu1 %v808_v17, %s2077_s29 }
 0x70a   :  { %821 = vrot.lane.b32.xlu0 %v819_v54, %s2077_s29  ;;  %v801_v19 = vpop.permute.xlu0 %800 }
 0x70b   :  { %v803_v21 = vmul.f32 %v1989_v12, %v801_v19 }
 0x77b   :  { %v811_v5 = vpop.permute.xlu1 %810 }
 0x77c   :  { %v813_v24 = vadd.f32 %v811_v5, %v803_v21  ;;  %v822_v25 = vpop.permute.xlu0 %821 }
 0x77d   :  { %v824_v26 = vadd.f32 %v822_v25, %v814_v23 }
 0x77e   :  { %1992 = vtanh.f32 %v813_v24 }
 0x77f   :  { %1994 = vtanh.f32 %v824_v26 }
 0x788   :  { %v1993_v27 = vpop.eup %1992 }
 0x789   :  { %v1995_v30 = vpop.eup %1994  ;;  %827 = vrot.lane.b32.xlu1 %v1993_v27, %s2077_s29 }
 0x78a   :  { %833 = vrot.lane.b32.xlu0 %v1995_v30, %s2077_s29 }
 0x7fb   :  { %v828_v31 = vpop.permute.xlu1 %827 }
 0x7fc   :  { %v830_v32 = vmul.f32 %v1989_v12, %v828_v31  ;;  %v834_v33 = vpop.permute.xlu0 %833 }
 0x7fd   :  { %v2380_v35 = vmul.f32 %v1991_v16, %v834_v33 }
 0x7fe   :  { %844 = vrot.lane.b32.xlu1 %v830_v32, %s2078_s4 }
 0x7ff   :  { %849 = vrot.lane.b32.xlu0 %v2380_v35, %s2079_s13 }
 0x802   :  { %838 = vrot.lane.b32.xlu1 %v813_v24, %s2079_s13 }
 0x870   :  { %v845_v38 = vpop.permute.xlu1 %844 }
 0x871   :  { %847 = vst.msk [vmem:[#allocation4] sm:$0xff] %vm526_vm1, %v845_v38  ;;  %1726 = vst.msk [vmem:[%s2588_s5 + $0x10] sm:$0xff] %vm526_vm1, %v845_v38  ;;  %v850_v39 = vpop.permute.xlu0 %849 }
 0x872   :  { %852 = vst.msk [vmem:[#allocation4] sm:$0xff] %vm528_vm2, %v850_v39 }
 0x874   :  { %v839_v40 = vpop.permute.xlu1 %838 }
 0x875   :  { %841 = vst.msk [vmem:[#allocation5] sm:$0xff] %vm526_vm1, %v839_v40 }
 0x876   :  { %842 = vst.msk [vmem:[#allocation5] sm:$0xff] %vm528_vm2, %v824_v26 }
 0x879   :  { %v860_v42 = vld [vmem:[#allocation4] sm:$0xff] }
 0x87a   :  { %1728 = vmatmul.mubr.msk.f32.vlgmr.msra.gmra.mrb[10].mxu1 %vm63_vm0, %v860_v42 }
 0x87b   :  { %1883 = vmatpush1.bf16.msra.mxu1 %v2177_v20  ;;  %1242 = vmatprep.mubr.f32.mxu1 %v2076_v1 }
 0x87c   :  { %1885 = vmatprep.subr.bf16.mxu1 %v2183_v22 }
 0x87d   :  { %v955_v53 = vld [vmem:[#allocation5] sm:$0xff] }
 0x87f   :  { %1887 = vmatpush1.bf16.msra.mxu1 %v2203_v28 }
 0x880   :  { %1889 = vmatprep.subr.bf16.mxu1 %v2208_v29 }
 0x883   :  { %1891 = vmatpush1.bf16.msra.mxu1 %v2233_v36 }
 0x884   :  { %1893 = vmatprep.subr.bf16.mxu1 %v2236_v37 }
 0x887   :  { %1895 = vmatpush1.bf16.msra.mxu1 %v2251_v41 }
 0x888   :  { %1913 = vmatprep.subr.bf16.mxu1 %v2156_v13 }
 0x94d   :  { %v930_v43 = vpop.f32.mrb[10].mxu1 }
 0x94e   :  { %v937_v44 = vadd.f32 %v930_v43, %v2281_v50  ;;  %v932_v45 = vpop.f32.mrb[11].mxu1 }
 0x94f   :  { %v940_v48 = vadd.f32 %v932_v45, %v2303_v8 }
 0x950   :  { %1996 = vtanh.f32 %v937_v44  ;;  %v1729_v56 = vmul.f32 -1.442695, %v937_v44 }
 0x951   :  { %1998 = vtanh.f32 %v940_v48  ;;  %v1730_v58 = vmul.f32 -1.442695, %v940_v48 }
 0x952   :  { %2000 = vpow2.f32 %v1729_v56 }
 0x953   :  { %2002 = vpow2.f32 %v1730_v58 }
 0x95a   :  { %v1997_v49 = vpop.eup %1996 }
 0x95b   :  { %v1999_v51 = vpop.eup %1998  ;;  %962 = vrot.lane.b32.xlu0 %v1997_v49, %s2077_s29 }
 0x95c   :  { %973 = vrot.lane.b32.xlu1 %v1999_v51, %s2077_s29  ;;  %v2001_v13 = vpop.eup %2000 }
 0x95d   :  { %v2003_v50 = vpop.eup %2002  ;;  %v944_v34 = vadd.f32 1.0, %v2001_v13 }
 0x95e   :  { %v950_v62 = vadd.f32 1.0, %v2003_v50 }
 0x95f   :  { %957 = vrot.lane.b32.xlu0 %v955_v53, %s2077_s29  ;;  %2004 = vrcp.f32 %v944_v34 }
 0x960   :  { %2006 = vrcp.f32 %v950_v62 }
 0x969   :  { %v2005_v8 = vpop.eup %2004 }
 0x96a   :  { %v2007_v2 = vpop.eup %2006 }
 0x96b   :  { %v971_v14 = vmul.f32 %v2007_v2, %v955_v53 }
 0x9cd   :  { %v963_v0 = vpop.permute.xlu0 %962 }
 0x9ce   :  { %v965_v4 = vmul.f32 %v2005_v8, %v963_v0  ;;  %v974_v6 = vpop.permute.xlu1 %973 }
 0x9cf   :  { %v976_v9 = vmul.f32 %v2007_v2, %v974_v6 }
 0x9d0   :  { %967 = vrot.lane.b32.xlu1 %v965_v4, %s2077_s29 }
 0x9d1   :  { %978 = vrot.lane.b32.xlu0 %v976_v9, %s2077_s29  ;;  %v958_v10 = vpop.permute.xlu0 %957 }
 0x9d2   :  { %v960_v46 = vmul.f32 %v2005_v8, %v958_v10 }
 0xa42   :  { %v968_v11 = vpop.permute.xlu1 %967 }
 0xa43   :  { %v970_v12 = vadd.f32 %v968_v11, %v960_v46  ;;  %v979_v15 = vpop.permute.xlu0 %978 }
 0xa44   :  { %v981_v16 = vadd.f32 %v979_v15, %v971_v14 }
 0xa45   :  { %2008 = vtanh.f32 %v970_v12 }
 0xa46   :  { %2010 = vtanh.f32 %v981_v16 }
 0xa4f   :  { %v2009_v17 = vpop.eup %2008 }
 0xa50   :  { %v2011_v18 = vpop.eup %2010  ;;  %984 = vrot.lane.b32.xlu1 %v2009_v17, %s2077_s29 }
 0xa51   :  { %990 = vrot.lane.b32.xlu0 %v2011_v18, %s2077_s29 }
 0xac2   :  { %v985_v54 = vpop.permute.xlu1 %984 }
 0xac3   :  { %v987_v19 = vmul.f32 %v2005_v8, %v985_v54  ;;  %v991_v21 = vpop.permute.xlu0 %990 }
 0xac4   :  { %v2413_v5 = vmul.f32 %v2007_v2, %v991_v21 }
 0xac5   :  { %1001 = vrot.lane.b32.xlu1 %v987_v19, %s2078_s4 }
 0xac6   :  { %1006 = vrot.lane.b32.xlu0 %v2413_v5, %s2079_s13 }
 0xac9   :  { %995 = vrot.lane.b32.xlu1 %v970_v12, %s2079_s13 }
 0xb37   :  { %v1002_v23 = vpop.permute.xlu1 %1001 }
 0xb38   :  { %1004 = vst.msk [vmem:[#allocation4] sm:$0xff] %vm526_vm1, %v1002_v23  ;;  %1731 = vst.msk [vmem:[%s2588_s5 + $0x18] sm:$0xff] %vm526_vm1, %v1002_v23  ;;  %v1007_v24 = vpop.permute.xlu0 %1006 }
 0xb39   :  { %1009 = vst.msk [vmem:[#allocation4] sm:$0xff] %vm528_vm2, %v1007_v24 }
 0xb3b   :  { %v996_v25 = vpop.permute.xlu1 %995 }
 0xb3c   :  { %998 = vst.msk [vmem:[#allocation5] sm:$0xff] %vm526_vm1, %v996_v25 }
 0xb3d   :  { %999 = vst.msk [vmem:[#allocation5] sm:$0xff] %vm528_vm2, %v981_v16 }
 0xb40   :  { %v1017_v26 = vld [vmem:[#allocation4] sm:$0xff] }
 0xb41   :  { %1733 = vmatmul.mubr.msk.f32.vlgmr.msra.gmra.mrb[12].mxu0 %vm63_vm0, %v1017_v26 }
 0xb42   :  { %1899 = vmatpush1.bf16.msra.mxu0 %v2177_v20  ;;  %1399 = vmatprep.mubr.f32.mxu0 %v2076_v1 }
 0xb43   :  { %1901 = vmatprep.subr.bf16.mxu0 %v2183_v22 }
 0xb44   :  { %v1112_v39 = vld [vmem:[#allocation5] sm:$0xff] }
 0xb46   :  { %1903 = vmatpush1.bf16.msra.mxu0 %v2203_v28 }
 0xb47   :  { %1905 = vmatprep.subr.bf16.mxu0 %v2208_v29 }
 0xb4a   :  { %1907 = vmatpush1.bf16.msra.mxu0 %v2233_v36 }
 0xb4b   :  { %1909 = vmatprep.subr.bf16.mxu0 %v2236_v37 }
 0xb4e   :  { %1911 = vmatpush1.bf16.msra.mxu0 %v2251_v41 }
 0xc14   :  { %v1087_v27 = vpop.f32.mrb[12].mxu0 }
 0xc15   :  { %v1094_v30 = vadd.f32 %v1087_v27, %v2295_v63  ;;  %v1089_v31 = vpop.f32.mrb[13].mxu0 }
 0xc16   :  { %v1097_v32 = vadd.f32 %v1089_v31, %v2289_v57 }
 0xc17   :  { %2012 = vtanh.f32 %v1094_v30  ;;  %v1734_v40 = vmul.f32 -1.442695, %v1094_v30 }
 0xc18   :  { %2014 = vtanh.f32 %v1097_v32  ;;  %v1735_v42 = vmul.f32 -1.442695, %v1097_v32 }
 0xc19   :  { %2016 = vpow2.f32 %v1734_v40 }
 0xc1a   :  { %2018 = vpow2.f32 %v1735_v42 }
 0xc21   :  { %v2013_v33 = vpop.eup %2012 }
 0xc22   :  { %v2015_v38 = vpop.eup %2014  ;;  %1119 = vrot.lane.b32.xlu0 %v2013_v33, %s2077_s29 }
 0xc23   :  { %1130 = vrot.lane.b32.xlu1 %v2015_v38, %s2077_s29  ;;  %v2017_v43 = vpop.eup %2016 }
 0xc24   :  { %v2019_v63 = vpop.eup %2018  ;;  %v1101_v44 = vadd.f32 1.0, %v2017_v43 }
 0xc25   :  { %v1107_v45 = vadd.f32 1.0, %v2019_v63 }
 0xc26   :  { %1114 = vrot.lane.b32.xlu0 %v1112_v39, %s2077_s29  ;;  %2020 = vrcp.f32 %v1101_v44 }
 0xc27   :  { %2022 = vrcp.f32 %v1107_v45 }
 0xc30   :  { %v2021_v57 = vpop.eup %2020 }
 0xc31   :  { %v2023_v49 = vpop.eup %2022 }
 0xc32   :  { %v1128_v34 = vmul.f32 %v2023_v49, %v1112_v39 }
 0xc94   :  { %v1120_v48 = vpop.permute.xlu0 %1119 }
 0xc95   :  { %v1122_v51 = vmul.f32 %v2021_v57, %v1120_v48  ;;  %v1131_v53 = vpop.permute.xlu1 %1130 }
 0xc96   :  { %v1133_v56 = vmul.f32 %v2023_v49, %v1131_v53 }
 0xc97   :  { %1124 = vrot.lane.b32.xlu1 %v1122_v51, %s2077_s29 }
 0xc98   :  { %1135 = vrot.lane.b32.xlu0 %v1133_v56, %s2077_s29  ;;  %v1115_v58 = vpop.permute.xlu0 %1114 }
 0xc99   :  { %v1117_v13 = vmul.f32 %v2021_v57, %v1115_v58 }
 0xd09   :  { %v1125_v50 = vpop.permute.xlu1 %1124 }
 0xd0a   :  { %v1127_v62 = vadd.f32 %v1125_v50, %v1117_v13  ;;  %v1136_v8 = vpop.permute.xlu0 %1135 }
 0xd0b   :  { %v1138_v0 = vadd.f32 %v1136_v8, %v1128_v34 }
 0xd0c   :  { %2024 = vtanh.f32 %v1127_v62 }
 0xd0d   :  { %2026 = vtanh.f32 %v1138_v0 }
 0xd16   :  { %v2025_v2 = vpop.eup %2024 }
 0xd17   :  { %v2027_v4 = vpop.eup %2026  ;;  %1141 = vrot.lane.b32.xlu1 %v2025_v2, %s2077_s29 }
 0xd18   :  { %1147 = vrot.lane.b32.xlu0 %v2027_v4, %s2077_s29 }
 0xd89   :  { %v1142_v6 = vpop.permute.xlu1 %1141 }
 0xd8a   :  { %v1144_v9 = vmul.f32 %v2021_v57, %v1142_v6  ;;  %v1148_v10 = vpop.permute.xlu0 %1147 }
 0xd8b   :  { %v2445_v46 = vmul.f32 %v2023_v49, %v1148_v10 }
 0xd8c   :  { %1158 = vrot.lane.b32.xlu1 %v1144_v9, %s2078_s4 }
 0xd8d   :  { %1163 = vrot.lane.b32.xlu0 %v2445_v46, %s2079_s13 }
 0xd90   :  { %1152 = vrot.lane.b32.xlu1 %v1127_v62, %s2079_s13 }
 0xdfe   :  { %v1159_v11 = vpop.permute.xlu1 %1158 }
 0xdff   :  { %1161 = vst.msk [vmem:[#allocation4] sm:$0xff] %vm526_vm1, %v1159_v11  ;;  %1736 = vst.msk [vmem:[%s2588_s5 + $0x20] sm:$0xff] %vm526_vm1, %v1159_v11  ;;  %v1164_v14 = vpop.permute.xlu0 %1163 }
 0xe00   :  { %1166 = vst.msk [vmem:[#allocation4] sm:$0xff] %vm528_vm2, %v1164_v14 }
 0xe02   :  { %v1153_v12 = vpop.permute.xlu1 %1152 }
 0xe03   :  { %1155 = vst.msk [vmem:[#allocation5] sm:$0xff] %vm526_vm1, %v1153_v12 }
 0xe04   :  { %1156 = vst.msk [vmem:[#allocation5] sm:$0xff] %vm528_vm2, %v1138_v0 }
 0xe07   :  { %v1174_v15 = vld [vmem:[#allocation4] sm:$0xff] }
 0xe08   :  { %1738 = vmatmul.mubr.msk.f32.vlgmr.msra.gmra.mrb[12].mxu1 %vm63_vm0, %v1174_v15 }
 0xe09   :  { %1915 = vmatpush1.bf16.msra.mxu1 %v2177_v20  ;;  %1556 = vmatprep.mubr.f32.mxu1 %v2076_v1 }
 0xe0a   :  { %1917 = vmatprep.subr.bf16.mxu1 %v2183_v22 }
 0xe0d   :  { %1919 = vmatpush1.bf16.msra.mxu1 %v2203_v28  ;;  %v1269_v28 = vld [vmem:[#allocation5] sm:$0xff] }
 0xe0e   :  { %1921 = vmatprep.subr.bf16.mxu1 %v2208_v29 }
 0xe11   :  { %1923 = vmatpush1.bf16.msra.mxu1 %v2233_v36 }
 0xe12   :  { %1925 = vmatprep.subr.bf16.mxu1 %v2236_v37 }
 0xe15   :  { %1927 = vmatpush1.bf16.msra.mxu1 %v2251_v41 }
 0xedb   :  { %v1244_v16 = vpop.f32.mrb[12].mxu1 }
 0xedc   :  { %v1251_v17 = vadd.f32 %v1244_v16, %v2301_v7  ;;  %v1246_v18 = vpop.f32.mrb[13].mxu1 }
 0xedd   :  { %v1254_v20 = vadd.f32 %v1246_v18, %v2283_v52 }
 0xede   :  { %2028 = vtanh.f32 %v1251_v17  ;;  %v1739_v29 = vmul.f32 -1.442695, %v1251_v17 }
 0xedf   :  { %2030 = vtanh.f32 %v1254_v20  ;;  %v1740_v36 = vmul.f32 -1.442695, %v1254_v20 }
 0xee0   :  { %2032 = vpow2.f32 %v1739_v29 }
 0xee1   :  { %2034 = vpow2.f32 %v1740_v36 }
 0xee8   :  { %v2029_v1 = vpop.eup %2028 }
 0xee9   :  { %v2031_v22 = vpop.eup %2030  ;;  %1276 = vrot.lane.b32.xlu0 %v2029_v1, %s2077_s29 }
 0xeea   :  { %1287 = vrot.lane.b32.xlu1 %v2031_v22, %s2077_s29  ;;  %v2033_v37 = vpop.eup %2032 }
 0xeeb   :  { %v2035_v41 = vpop.eup %2034  ;;  %v1258_v7 = vadd.f32 1.0, %v2033_v37 }
 0xeec   :  { %v1264_v54 = vadd.f32 1.0, %v2035_v41 }
 0xeed   :  { %1271 = vrot.lane.b32.xlu0 %v1269_v28, %s2077_s29  ;;  %2036 = vrcp.f32 %v1258_v7 }
 0xeee   :  { %2038 = vrcp.f32 %v1264_v54 }
 0xef7   :  { %v2037_v52 = vpop.eup %2036 }
 0xef8   :  { %v2039_v21 = vpop.eup %2038 }
 0xef9   :  { %v1285_v31 = vmul.f32 %v2039_v21, %v1269_v28 }
 0xf5b   :  { %v1277_v19 = vpop.permute.xlu0 %1276 }
 0xf5c   :  { %v1279_v23 = vmul.f32 %v2037_v52, %v1277_v19  ;;  %v1288_v24 = vpop.permute.xlu1 %1287 }
 0xf5d   :  { %v1290_v25 = vmul.f32 %v2039_v21, %v1288_v24 }
 0xf5e   :  { %1281 = vrot.lane.b32.xlu1 %v1279_v23, %s2077_s29 }
 0xf5f   :  { %1292 = vrot.lane.b32.xlu0 %v1290_v25, %s2077_s29  ;;  %v1272_v26 = vpop.permute.xlu0 %1271 }
 0xf60   :  { %v1274_v27 = vmul.f32 %v2037_v52, %v1272_v26 }
 0xfd0   :  { %v1282_v30 = vpop.permute.xlu1 %1281 }
 0xfd1   :  { %v1284_v32 = vadd.f32 %v1282_v30, %v1274_v27  ;;  %v1293_v33 = vpop.permute.xlu0 %1292 }
 0xfd2   :  { %v1295_v38 = vadd.f32 %v1293_v33, %v1285_v31 }
 0xfd3   :  { %2040 = vtanh.f32 %v1284_v32 }
 0xfd4   :  { %2042 = vtanh.f32 %v1295_v38 }
 0xfdd   :  { %v2041_v39 = vpop.eup %2040 }
 0xfde   :  { %v2043_v40 = vpop.eup %2042  ;;  %1298 = vrot.lane.b32.xlu1 %v2041_v39, %s2077_s29 }
 0xfdf   :  { %1304 = vrot.lane.b32.xlu0 %v2043_v40, %s2077_s29 }
0x1050   :  { %v1299_v42 = vpop.permute.xlu1 %1298 }
0x1051   :  { %v1301_v43 = vmul.f32 %v2037_v52, %v1299_v42  ;;  %v1305_v63 = vpop.permute.xlu0 %1304 }
0x1052   :  { %v2477_v44 = vmul.f32 %v2039_v21, %v1305_v63 }
0x1053   :  { %1315 = vrot.lane.b32.xlu1 %v1301_v43, %s2078_s4 }
0x1054   :  { %1320 = vrot.lane.b32.xlu0 %v2477_v44, %s2079_s13 }
0x1057   :  { %1309 = vrot.lane.b32.xlu1 %v1284_v32, %s2079_s13 }
0x10c5   :  { %v1316_v45 = vpop.permute.xlu1 %1315 }
0x10c6   :  { %1318 = vst.msk [vmem:[#allocation4] sm:$0xff] %vm526_vm1, %v1316_v45  ;;  %1741 = vst.msk [vmem:[%s2588_s5 + $0x28] sm:$0xff] %vm526_vm1, %v1316_v45  ;;  %v1321_v57 = vpop.permute.xlu0 %1320 }
0x10c7   :  { %1323 = vst.msk [vmem:[#allocation4] sm:$0xff] %vm528_vm2, %v1321_v57 }
0x10c9   :  { %v1310_v48 = vpop.permute.xlu1 %1309 }
0x10ca   :  { %1312 = vst.msk [vmem:[#allocation5] sm:$0xff] %vm526_vm1, %v1310_v48 }
0x10cb   :  { %1313 = vst.msk [vmem:[#allocation5] sm:$0xff] %vm528_vm2, %v1295_v38 }
0x10ce   :  { %v1331_v49 = vld [vmem:[#allocation4] sm:$0xff] }
0x10cf   :  { %1743 = vmatmul.mubr.msk.f32.vlgmr.msra.gmra.mrb[14].mxu0 %vm63_vm0, %v1331_v49 }
0x10d2   :  { %v1426_v34 = vld [vmem:[#allocation5] sm:$0xff] }
0x11a2   :  { %v1401_v51 = vpop.f32.mrb[14].mxu0 }
0x11a3   :  { %v1408_v53 = vadd.f32 %v1401_v51, %v2293_v61  ;;  %v1403_v56 = vpop.f32.mrb[15].mxu0 }
0x11a4   :  { %v1411_v58 = vadd.f32 %v1403_v56, %v2291_v59 }
0x11a5   :  { %2044 = vtanh.f32 %v1408_v53  ;;  %v1744_v62 = vmul.f32 -1.442695, %v1408_v53 }
0x11a6   :  { %2046 = vtanh.f32 %v1411_v58  ;;  %v1745_v8 = vmul.f32 -1.442695, %v1411_v58 }
0x11a7   :  { %2048 = vpow2.f32 %v1744_v62 }
0x11a8   :  { %2050 = vpow2.f32 %v1745_v8 }
0x11af   :  { %v2045_v13 = vpop.eup %2044 }
0x11b0   :  { %v2047_v50 = vpop.eup %2046  ;;  %1433 = vrot.lane.b32.xlu0 %v2045_v13, %s2077_s29 }
0x11b1   :  { %1444 = vrot.lane.b32.xlu1 %v2047_v50, %s2077_s29  ;;  %v2049_v0 = vpop.eup %2048 }
0x11b2   :  { %v2051_v61 = vpop.eup %2050  ;;  %v1415_v2 = vadd.f32 1.0, %v2049_v0 }
0x11b3   :  { %v1421_v4 = vadd.f32 1.0, %v2051_v61 }
0x11b4   :  { %1428 = vrot.lane.b32.xlu0 %v1426_v34, %s2077_s29  ;;  %2052 = vrcp.f32 %v1415_v2 }
0x11b5   :  { %2054 = vrcp.f32 %v1421_v4 }
0x11be   :  { %v2053_v59 = vpop.eup %2052 }
0x11bf   :  { %v2055_v9 = vpop.eup %2054 }
0x11c0   :  { %v1442_v17 = vmul.f32 %v2055_v9, %v1426_v34 }
0x1222   :  { %v1434_v6 = vpop.permute.xlu0 %1433 }
0x1223   :  { %v1436_v10 = vmul.f32 %v2053_v59, %v1434_v6  ;;  %v1445_v11 = vpop.permute.xlu1 %1444 }
0x1224   :  { %v1447_v14 = vmul.f32 %v2055_v9, %v1445_v11 }
0x1225   :  { %1438 = vrot.lane.b32.xlu1 %v1436_v10, %s2077_s29 }
0x1226   :  { %1449 = vrot.lane.b32.xlu0 %v1447_v14, %s2077_s29  ;;  %v1429_v12 = vpop.permute.xlu0 %1428 }
0x1227   :  { %v1431_v15 = vmul.f32 %v2053_v59, %v1429_v12 }
0x1297   :  { %v1439_v16 = vpop.permute.xlu1 %1438 }
0x1298   :  { %v1441_v18 = vadd.f32 %v1439_v16, %v1431_v15  ;;  %v1450_v20 = vpop.permute.xlu0 %1449 }
0x1299   :  { %v1452_v1 = vadd.f32 %v1450_v20, %v1442_v17 }
0x129a   :  { %2056 = vtanh.f32 %v1441_v18 }
0x129b   :  { %2058 = vtanh.f32 %v1452_v1 }
0x12a4   :  { %v2057_v22 = vpop.eup %2056 }
0x12a5   :  { %v2059_v28 = vpop.eup %2058  ;;  %1455 = vrot.lane.b32.xlu1 %v2057_v22, %s2077_s29 }
0x12a6   :  { %1461 = vrot.lane.b32.xlu0 %v2059_v28, %s2077_s29 }
0x1317   :  { %v1456_v29 = vpop.permute.xlu1 %1455 }
0x1318   :  { %v1458_v36 = vmul.f32 %v2053_v59, %v1456_v29  ;;  %v1462_v37 = vpop.permute.xlu0 %1461 }
0x1319   :  { %v2501_v41 = vmul.f32 %v2055_v9, %v1462_v37 }
0x131a   :  { %1472 = vrot.lane.b32.xlu1 %v1458_v36, %s2078_s4 }
0x131b   :  { %1477 = vrot.lane.b32.xlu0 %v2501_v41, %s2079_s13 }
0x131e   :  { %1466 = vrot.lane.b32.xlu1 %v1441_v18, %s2079_s13 }
0x138c   :  { %v1473_v7 = vpop.permute.xlu1 %1472 }
0x138d   :  { %1475 = vst.msk [vmem:[#allocation4] sm:$0xff] %vm526_vm1, %v1473_v7  ;;  %1746 = vst.msk [vmem:[%s2588_s5 + $0x30] sm:$0xff] %vm526_vm1, %v1473_v7  ;;  %v1478_v54 = vpop.permute.xlu0 %1477 }
0x138e   :  { %1480 = vst.msk [vmem:[#allocation4] sm:$0xff] %vm528_vm2, %v1478_v54 }
0x1390   :  { %v1467_v52 = vpop.permute.xlu1 %1466 }
0x1391   :  { %1469 = vst.msk [vmem:[#allocation5] sm:$0xff] %vm526_vm1, %v1467_v52 }
0x1392   :  { %1470 = vst.msk [vmem:[#allocation5] sm:$0xff] %vm528_vm2, %v1452_v1 }
0x1395   :  { %v1488_v19 = vld [vmem:[#allocation4] sm:$0xff] }
0x1396   :  { %1748 = vmatmul.mubr.msk.f32.vlgmr.msra.gmra.mrb[14].mxu1 %vm63_vm0, %v1488_v19 }
0x1399   :  { %v1582_v30 = vld [vmem:[#allocation5] sm:$0xff] }
0x1469   :  { %v1558_v21 = vpop.f32.mrb[14].mxu1 }
0x146a   :  { %v1565_v23 = vadd.f32 %v1558_v21, %v2297_v3  ;;  %v1560_v24 = vpop.f32.mrb[15].mxu1 }
0x146b   :  { %v1567_v25 = vadd.f32 %v1560_v24, %v2287_v55 }
0x146c   :  { %2060 = vtanh.f32 %v1565_v23  ;;  %v1749_v31 = vmul.f32 -1.442695, %v1565_v23 }
0x146d   :  { %2062 = vtanh.f32 %v1567_v25  ;;  %v1750_v32 = vmul.f32 -1.442695, %v1567_v25 }
0x146e   :  { %2064 = vpow2.f32 %v1749_v31 }
0x146f   :  { %2066 = vpow2.f32 %v1750_v32 }
0x1476   :  { %v2061_v26 = vpop.eup %2060 }
0x1477   :  { %v2063_v27 = vpop.eup %2062  ;;  %1589 = vrot.lane.b32.xlu0 %v2061_v26, %s2077_s29 }
0x1478   :  { %1600 = vrot.lane.b32.xlu1 %v2063_v27, %s2077_s29  ;;  %v2065_v33 = vpop.eup %2064 }
0x1479   :  { %v2067_v3 = vpop.eup %2066  ;;  %v1571_v38 = vadd.f32 1.0, %v2065_v33 }
0x147a   :  { %v1577_v39 = vadd.f32 1.0, %v2067_v3 }
0x147b   :  { %1584 = vrot.lane.b32.xlu0 %v1582_v30, %s2077_s29  ;;  %2068 = vrcp.f32 %v1571_v38 }
0x147c   :  { %2070 = vrcp.f32 %v1577_v39 }
0x1485   :  { %v2069_v55 = vpop.eup %2068 }
0x1486   :  { %v2071_v42 = vpop.eup %2070 }
0x1487   :  { %v1598_v51 = vmul.f32 %v2071_v42, %v1582_v30 }
0x14e9   :  { %v1590_v40 = vpop.permute.xlu0 %1589 }
0x14ea   :  { %v1592_v43 = vmul.f32 %v2069_v55, %v1590_v40  ;;  %v1601_v63 = vpop.permute.xlu1 %1600 }
0x14eb   :  { %v1603_v45 = vmul.f32 %v2071_v42, %v1601_v63 }
0x14ec   :  { %1594 = vrot.lane.b32.xlu1 %v1592_v43, %s2077_s29 }
0x14ed   :  { %1605 = vrot.lane.b32.xlu0 %v1603_v45, %s2077_s29  ;;  %v1585_v57 = vpop.permute.xlu0 %1584 }
0x14ee   :  { %v1587_v48 = vmul.f32 %v2069_v55, %v1585_v57 }
0x155e   :  { %v1595_v49 = vpop.permute.xlu1 %1594 }
0x155f   :  { %v1597_v53 = vadd.f32 %v1595_v49, %v1587_v48  ;;  %v1606_v56 = vpop.permute.xlu0 %1605 }
0x1560   :  { %v1608_v58 = vadd.f32 %v1606_v56, %v1598_v51 }
0x1561   :  { %2072 = vtanh.f32 %v1597_v53 }
0x1562   :  { %2074 = vtanh.f32 %v1608_v58 }
0x156b   :  { %v2073_v13 = vpop.eup %2072 }
0x156c   :  { %v2075_v50 = vpop.eup %2074  ;;  %1611 = vrot.lane.b32.xlu1 %v2073_v13, %s2077_s29 }
0x156d   :  { %1617 = vrot.lane.b32.xlu0 %v2075_v50, %s2077_s29 }
0x1570   :  { %1622 = vrot.lane.b32.xlu1 %v1597_v53, %s2079_s13 }
0x1571   :  { %698 = vrot.lane.b32.xlu0 %v2347_v47, %s2078_s4 }
0x1574   :  { %541 = vrot.lane.b32.xlu1 %v2315_v60, %s2078_s4 }
0x1575   :  { %1012 = vrot.lane.b32.xlu0 %v2413_v5, %s2078_s4 }
0x1578   :  { %855 = vrot.lane.b32.xlu1 %v2380_v35, %s2078_s4 }
0x1579   :  { %1326 = vrot.lane.b32.xlu0 %v2477_v44, %s2078_s4 }
0x157c   :  { %1169 = vrot.lane.b32.xlu1 %v2445_v46, %s2078_s4 }
0x1580   :  { %1483 = vrot.lane.b32.xlu1 %v2501_v41, %s2078_s4 }
0x15de   :  { %v1612_v34 = vpop.permute.xlu1 %1611 }
0x15df   :  { %v1614_v47 = vmul.f32 %v2069_v55, %v1612_v34  ;;  %v1618_v62 = vpop.permute.xlu0 %1617 }
0x15e0   :  { %v1620_v8 = vmul.f32 %v2071_v42, %v1618_v62 }
0x15e1   :  { %1628 = vrot.lane.b32.xlu0 %v1614_v47, %s2078_s4 }
0x15e2   :  { %1639 = vrot.lane.b32.xlu1 %v1620_v8, %s2078_s4  ;;  %v1623_v60 = vpop.permute.xlu1 %1622 }
0x15e3   :  { %1625 = vst.msk [vmem:[#allocation5] sm:$0xff] %vm526_vm1, %v1623_v60  ;;  %v699_v35 = vpop.permute.xlu0 %698 }
0x15e4   :  { %1626 = vst.msk [vmem:[#allocation5] sm:$0xff] %vm528_vm2, %v1608_v58 }
0x15e5   :  { %1722 = vst.msk [vmem:[%s2589_s6 + $0x30] sm:$0xff] %vm526_vm1, %v699_v35  ;;  %1633 = vrot.lane.b32.xlu0 %v1620_v8, %s2079_s13 }
0x15e6   :  { %v542_v5 = vpop.permute.xlu1 %541 }
0x15e7   :  { %1717 = vst.msk [vmem:[%s2589_s6 + $0x38] sm:$0xff] %vm526_vm1, %v542_v5  ;;  %v1013_v46 = vpop.permute.xlu0 %1012 }
0x15e8   :  { %1732 = vst.msk [vmem:[%s2589_s6 + $0x20] sm:$0xff] %vm526_vm1, %v1013_v46 }
0x15ea   :  { %v856_v44 = vpop.permute.xlu1 %855 }
0x15eb   :  { %1727 = vst.msk [vmem:[%s2589_s6 + $0x28] sm:$0xff] %vm526_vm1, %v856_v44  ;;  %v1327_v0 = vpop.permute.xlu0 %1326 }
0x15ec   :  { %1742 = vst.msk [vmem:[%s2589_s6 + $0x10] sm:$0xff] %vm526_vm1, %v1327_v0 }
0x15ee   :  { %v1170_v61 = vpop.permute.xlu1 %1169 }
0x15ef   :  { %1737 = vst.msk [vmem:[%s2589_s6 + $0x18] sm:$0xff] %vm526_vm1, %v1170_v61 }
0x15f2   :  { %v1484_v2 = vpop.permute.xlu1 %1483 }
0x15f3   :  { %1747 = vst.msk [vmem:[%s2589_s6 + $0x8] sm:$0xff] %vm526_vm1, %v1484_v2 }
0x1653   :  { %v1629_v4 = vpop.permute.xlu0 %1628 }
0x1654   :  { %1631 = vst.msk [vmem:[#allocation4] sm:$0xff] %vm526_vm1, %v1629_v4  ;;  %1751 = vst.msk [vmem:[%s2588_s5 + $0x38] sm:$0xff] %vm526_vm1, %v1629_v4  ;;  %v1640_v59 = vpop.permute.xlu1 %1639 }
0x1655   :  { %1642 = vst.msk [vmem:[%s2589_s6] sm:$0xff] %vm526_vm1, %v1640_v59 }
0x1657   :  { %v1634_v6 = vpop.permute.xlu0 %1633 }
0x1658   :  { %1636 = vst.msk [vmem:[#allocation4] sm:$0xff] %vm528_vm2, %v1634_v6 }

// kernel: lstm_forward.3
= control target key start
LH: loop header
LB: loop body
LE: loop exit
PB: predicated region body
PF: predicated region fallthrough
CT: control target
= control target key end

     0   :  { %vm63_vm0 = vcmask 523264   ;;  %v2020_v1 = vmov 0.0   ;;  %vm117_vm1 = vcmask 261120   ;;  %s2021_s26 = smov 32   ;;  %s2023_s29 = smov 96   ;;  %vm496_vm2 = vcmask 523520   ;;  %s2515_s2 = inlined_call_operand.vmem [shape: bf16[2,32,128], index: 2, kind: input, shape index: {}]   ;;  %s2516_s0 = inlined_call_operand.vmem [shape: bf16[64,32], index: 0, kind: input, shape index: {}, may-alias: {0,1}]   ;;  %s2517_s3 = inlined_call_operand.vmem [shape: f32[64,256], index: 3, kind: input, shape index: {}]   ;;  %s2518_s1 = inlined_call_operand.vmem [shape: bf16[64,32], index: 1, kind: input, shape index: {}, may-alias: {0,1}]   ;;  %s2519_s4 = inlined_call_operand.vmem [shape: f32[2,1,128], index: 4, kind: input, shape index: {}]   ;;  %s2520_s5 = inlined_call_operand.vmem [shape: f32[64,32], index: 5, kind: output, shape index: {0}]   ;;  %s2521_s6 = inlined_call_operand.vmem [shape: f32[64,32], index: 6, kind: output, shape index: {1}]  }
   0x1   :  { %v1880_v0 = vld [vmem:[%s2515_s2] sm:$0xff]   ;;  %64 = vst.msk [vmem:[#allocation4] sm:$0xff] %vm63_vm0, %v2020_v1  ;;  %65 = vst.msk [vmem:[#allocation5] sm:$0xff] %vm63_vm0, %v2020_v1  ;;  %v1881_v2 = vld [vmem:[%s2515_s2 + $0x8] sm:$0xff]  }
   0x2   :  { %1724 = vmatprep.subr.bf16.mxu0 %v1880_v0  ;;  %v1882_v3 = vld [vmem:[%s2515_s2 + $0x10] sm:$0xff]   ;;  %v1883_v4 = vld [vmem:[%s2516_s0] sm:$0xff]   ;;  %v1884_v5 = vld [vmem:[%s2516_s0 + $0x8] sm:$0xff]  }
   0x3   :  { %1725 = vmatpush3.bf16.msra.mxu0 %v1880_v0  ;;  %1736 = vmatprep.subr.bf16.mxu1 %v1882_v3  ;;  %v342_v6 = vld [vmem:[%s2517_s3 + $0x8] sm:$0xff]  ;;  %v344_v7 = vld [vmem:[%s2517_s3 + $0x18] sm:$0xff]  ;;  %v341_v10 = vld [vmem:[%s2517_s3] sm:$0xff] }
   0x4   :  { %1726 = vmatprep.subr.bf16.mxu0 %v1881_v2  ;;  %1737 = vmatpush3.bf16.msra.mxu1 %v1882_v3  ;;  %v2085_v8 = vpack.c.bf16 %v344_v7, %v342_v6  ;;  %v1885_v9 = vld [vmem:[%s2515_s2 + $0x18] sm:$0xff]   ;;  %v343_v11 = vld [vmem:[%s2517_s3 + $0x10] sm:$0xff]  ;;  %v1886_v13 = vld [vmem:[%s2518_s1] sm:$0xff]  }
   0x5   :  { %1728 = vmatprep.mubr.msk.bf16.mxu0 %vm117_vm1, %v1883_v4  ;;  %1738 = vmatprep.subr.bf16.mxu1 %v1885_v9  ;;  %v2097_v12 = vpack.c.bf16 %v343_v11, %v341_v10  ;;  %v346_v14 = vld [vmem:[%s2517_s3 + $0x28] sm:$0xff]  ;;  %v348_v15 = vld [vmem:[%s2517_s3 + $0x38] sm:$0xff]  ;;  %v345_v18 = vld [vmem:[%s2517_s3 + $0x20] sm:$0xff] }
   0x6   :  { %v2108_v16 = vpack.c.bf16 %v348_v15, %v346_v14  ;;  %v1887_v17 = vld [vmem:[%s2518_s1 + $0x8] sm:$0xff]   ;;  %1740 = vmatprep.mubr.msk.bf16.mxu1 %vm117_vm1, %v1886_v13  ;;  %v347_v19 = vld [vmem:[%s2517_s3 + $0x30] sm:$0xff]  ;;  %v1889_v22 = vld [vmem:[%s2516_s0 + $0x18] sm:$0xff]  }
   0x7   :  { %1727 = vmatpush3.bf16.msra.mxu0 %v1881_v2  ;;  %v2122_v20 = vpack.c.bf16 %v347_v19, %v345_v18  ;;  %v1888_v21 = vld [vmem:[%s2516_s0 + $0x10] sm:$0xff]   ;;  %v350_v23 = vld [vmem:[%s2517_s3 + $0x48] sm:$0xff]  ;;  %v352_v24 = vld [vmem:[%s2517_s3 + $0x58] sm:$0xff] }
   0x8   :  { %1749 = vmatprep.subr.bf16.mxu0 %v2085_v8  ;;  %1739 = vmatpush3.bf16.msra.mxu1 %v1885_v9  ;;  %v349_v25 = vld [vmem:[%s2517_s3 + $0x40] sm:$0xff]  ;;  %v351_v26 = vld [vmem:[%s2517_s3 + $0x50] sm:$0xff]  ;;  %v2147_v27 = vpack.c.bf16 %v352_v24, %v350_v23  ;;  %v354_v30 = vld [vmem:[%s2517_s3 + $0x68] sm:$0xff] }
   0x9   :  { %1765 = vmatprep.subr.bf16.mxu1 %v2085_v8  ;;  %v1890_v28 = vld [vmem:[%s2518_s1 + $0x10] sm:$0xff]   ;;  %v2154_v29 = vpack.c.bf16 %v351_v26, %v349_v25  ;;  %v356_v31 = vld [vmem:[%s2517_s3 + $0x78] sm:$0xff]  ;;  %v353_v34 = vld [vmem:[%s2517_s3 + $0x60] sm:$0xff] }
   0xa   :  { %1729 = vmatmul.mubr.msk.bf16.vlgmr.msra.gmra.mrb[0].mxu0 %vm117_vm1, %v1884_v5  ;;  %v2164_v32 = vpack.c.bf16 %v356_v31, %v354_v30  ;;  %v1891_v33 = vld [vmem:[%s2518_s1 + $0x18] sm:$0xff]   ;;  %v355_v35 = vld [vmem:[%s2517_s3 + $0x70] sm:$0xff]  ;;  %v2175_v36 = vld [vmem:[#allocation5] sm:$0xff] }
   0xb   :  { %1751 = vmatpush1.bf16.msra.mxu0 %v2097_v12  ;;  %1741 = vmatmul.mubr.msk.bf16.vlgmr.msra.gmra.mrb[0].mxu1 %vm117_vm1, %v1887_v17  ;;  %v2182_v37 = vpack.c.bf16 %v355_v35, %v353_v34  ;;  %v357_v38 = vld [vmem:[#allocation4] sm:$0xff] }
   0xc   :  { %1753 = vmatprep.subr.bf16.mxu0 %v2108_v16  ;;  %1732 = vmatprep.mubr.msk.bf16.mxu0 %vm117_vm1, %v1888_v21  ;;  %v1647_v39 = vld [vmem:[%s2519_s4] ss:$0 sm:$0xff]  ;;  %v1663_v41 = vld [vmem:[%s2519_s4 + $0x1] ss:$0 sm:$0xff]  ;;  %s2022_s4 = smov 64  }
   0xd   :  { %1767 = vmatpush1.bf16.msra.mxu1 %v2097_v12  ;;  %1744 = vmatprep.mubr.msk.bf16.mxu1 %vm117_vm1, %v1890_v28 }
   0xe   :  { %1769 = vmatprep.subr.bf16.mxu1 %v2108_v16  ;;  %454 = vrot.lane.b32.xlu1 %v2175_v36, %s2021_s26 }
   0xf   :  { %1755 = vmatpush1.bf16.msra.mxu0 %v2122_v20 }
  0x10   :  { %1757 = vmatprep.subr.bf16.mxu0 %v2147_v27 }
  0x11   :  { %1771 = vmatpush1.bf16.msra.mxu1 %v2122_v20 }
  0x12   :  { %1733 = vmatmul.mubr.msk.bf16.gmra.mrb[4].mxu0 %vm117_vm1, %v1889_v22  ;;  %1773 = vmatprep.subr.bf16.mxu1 %v2147_v27 }
  0x13   :  { %1759 = vmatpush1.bf16.msra.mxu0 %v2154_v29  ;;  %426 = vmatprep.mubr.f32.mxu0 %v2020_v1 }
  0x14   :  { %1761 = vmatprep.subr.bf16.mxu0 %v2164_v32  ;;  %1745 = vmatmul.mubr.msk.bf16.gmra.mrb[4].mxu1 %vm117_vm1, %v1891_v33 }
  0x15   :  { %582 = vmatprep.mubr.f32.mxu1 %v2020_v1  ;;  %1775 = vmatpush1.bf16.msra.mxu1 %v2154_v29 }
  0x16   :  { %1777 = vmatprep.subr.bf16.mxu1 %v2164_v32 }
  0x17   :  { %1763 = vmatpush1.bf16.msra.mxu0 %v2182_v37 }
  0x18   :  { %1781 = vmatprep.subr.bf16.mxu0 %v2085_v8 }
  0x19   :  { %1779 = vmatpush1.bf16.msra.mxu1 %v2182_v37 }
  0x1a   :  { %1674 = vmatmul.mubr.msk.f32.vlgmr.msra.gmra.mrb[8].mxu0 %vm63_vm0, %v357_v38  ;;  %1797 = vmatprep.subr.bf16.mxu1 %v2085_v8 }
  0x1b   :  { %1783 = vmatpush1.bf16.msra.mxu0 %v2097_v12  ;;  %739 = vmatprep.mubr.f32.mxu0 %v2020_v1 }
  0x1c   :  { %1785 = vmatprep.subr.bf16.mxu0 %v2108_v16 }
  0x1f   :  { %1787 = vmatpush1.bf16.msra.mxu0 %v2122_v20 }
  0x20   :  { %1789 = vmatprep.subr.bf16.mxu0 %v2147_v27 }
  0x23   :  { %1791 = vmatpush1.bf16.msra.mxu0 %v2154_v29 }
  0x24   :  { %1793 = vmatprep.subr.bf16.mxu0 %v2164_v32 }
  0x27   :  { %1795 = vmatpush1.bf16.msra.mxu0 %v2182_v37 }
  0x28   :  { %1813 = vmatprep.subr.bf16.mxu0 %v2085_v8 }
  0x80   :  { %v455_v35 = vpop.permute.xlu1 %454 }
  0xdd   :  { %v1730_v40 = vpop.f32.mrb[0].mxu0 }
  0xde   :  { %v2211_v42 = vadd.f32 %v1730_v40, %v1647_v39  ;;  %v164_v43 = vpop.f32.mrb[1].mxu0  ;;  %v1742_v45 = vpop.f32.mrb[0].mxu1 }
  0xdf   :  { %v1731_v44 = vpop.f32.mrb[2].mxu0  ;;  %v2215_v48 = vadd.f32 %v1742_v45, %v1663_v41  ;;  %v302_v49 = vpop.f32.mrb[1].mxu1  ;;  %v165_v10 = vadd.f32 %v1647_v39, %v164_v43 }
  0xe0   :  { %v2213_v46 = vadd.f32 %v1731_v44, %v1647_v39  ;;  %v167_v47 = vpop.f32.mrb[3].mxu0  ;;  %v2219_v51 = vadd.f32 %v1663_v41, %v302_v49  ;;  %v1743_v52 = vpop.f32.mrb[2].mxu1 }
  0xe1   :  { %v2217_v50 = vadd.f32 %v1647_v39, %v167_v47  ;;  %v2221_v53 = vadd.f32 %v1743_v52, %v1663_v41  ;;  %v305_v54 = vpop.f32.mrb[3].mxu1 }
  0xe2   :  { %v2223_v55 = vadd.f32 %v1663_v41, %v305_v54 }
  0xe5   :  { %v1734_v56 = vpop.f32.mrb[4].mxu0 }
  0xe6   :  { %v2225_v57 = vadd.f32 %v1734_v56, %v1647_v39  ;;  %v180_v58 = vpop.f32.mrb[5].mxu0 }
  0xe7   :  { %v2227_v59 = vadd.f32 %v1647_v39, %v180_v58  ;;  %v1735_v60 = vpop.f32.mrb[6].mxu0  ;;  %v1746_v61 = vpop.f32.mrb[4].mxu1 }
  0xe8   :  { %v2229_v62 = vadd.f32 %v1735_v60, %v1647_v39  ;;  %v183_v63 = vpop.f32.mrb[7].mxu0  ;;  %v2231_v0 = vadd.f32 %v1746_v61, %v1663_v41  ;;  %v318_v2 = vpop.f32.mrb[5].mxu1 }
  0xe9   :  { %v2233_v3 = vadd.f32 %v1647_v39, %v183_v63  ;;  %v2235_v4 = vadd.f32 %v1663_v41, %v318_v2  ;;  %v1747_v5 = vpop.f32.mrb[6].mxu1 }
  0xea   :  { %v321_v6 = vpop.f32.mrb[7].mxu1  ;;  %v330_v7 = vadd.f32 %v1747_v5, %v1663_v41 }
  0xeb   :  { %v2237_v9 = vadd.f32 %v1663_v41, %v321_v6 }
  0xed   :  { %v428_v11 = vpop.f32.mrb[8].mxu0 }
  0xee   :  { %v434_v13 = vadd.f32 %v428_v11, %v165_v10  ;;  %v430_v14 = vpop.f32.mrb[9].mxu0 }
  0xef   :  { %v437_v15 = vadd.f32 %v430_v14, %v330_v7 }
  0xf0   :  { %1892 = vtanh.f32 %v434_v13  ;;  %v1675_v19 = vmul.f32 -1.442695, %v434_v13 }
  0xf1   :  { %1894 = vtanh.f32 %v437_v15  ;;  %v1676_v21 = vmul.f32 -1.442695, %v437_v15 }
  0xf2   :  { %1896 = vpow2.f32 %v1675_v19 }
  0xf3   :  { %1898 = vpow2.f32 %v1676_v21 }
  0xfa   :  { %v1893_v17 = vpop.eup %1892 }
  0xfb   :  { %459 = vrot.lane.b32.xlu0 %v1893_v17, %s2021_s26  ;;  %v1895_v18 = vpop.eup %1894 }
  0xfc   :  { %v1897_v22 = vpop.eup %1896 }
  0xfd   :  { %v441_v23 = vadd.f32 1.0, %v1897_v22  ;;  %v1899_v24 = vpop.eup %1898 }
  0xfe   :  { %v447_v25 = vadd.f32 1.0, %v1899_v24 }
  0xff   :  { %470 = vrot.lane.b32.xlu0 %v1895_v18, %s2021_s26  ;;  %1900 = vrcp.f32 %v441_v23 }
 0x100   :  { %1902 = vrcp.f32 %v447_v25 }
 0x109   :  { %v1901_v26 = vpop.eup %1900 }
 0x10a   :  { %v1903_v31 = vpop.eup %1902  ;;  %v457_v38 = vmul.f32 %v1901_v26, %v455_v35 }
 0x10b   :  { %v468_v41 = vmul.f32 %v1903_v31, %v2175_v36 }
 0x16d   :  { %v460_v28 = vpop.permute.xlu0 %459 }
 0x16e   :  { %v462_v30 = vmul.f32 %v1901_v26, %v460_v28 }
 0x170   :  { %464 = vrot.lane.b32.xlu1 %v462_v30, %s2021_s26 }
 0x171   :  { %v471_v33 = vpop.permute.xlu0 %470 }
 0x172   :  { %v473_v34 = vmul.f32 %v1903_v31, %v471_v33 }
 0x174   :  { %475 = vrot.lane.b32.xlu0 %v473_v34, %s2021_s26 }
 0x1e2   :  { %v465_v39 = vpop.permute.xlu1 %464 }
 0x1e3   :  { %v467_v40 = vadd.f32 %v465_v39, %v457_v38 }
 0x1e5   :  { %1904 = vtanh.f32 %v467_v40 }
 0x1e6   :  { %v476_v43 = vpop.permute.xlu0 %475 }
 0x1e7   :  { %v478_v44 = vadd.f32 %v476_v43, %v468_v41 }
 0x1e9   :  { %1906 = vtanh.f32 %v478_v44 }
 0x1ef   :  { %v1905_v45 = vpop.eup %1904 }
 0x1f0   :  { %481 = vrot.lane.b32.xlu1 %v1905_v45, %s2021_s26 }
 0x1f3   :  { %v1907_v47 = vpop.eup %1906 }
 0x1f4   :  { %487 = vrot.lane.b32.xlu0 %v1907_v47, %s2021_s26 }
 0x262   :  { %v482_v49 = vpop.permute.xlu1 %481 }
 0x263   :  { %v484_v52 = vmul.f32 %v1901_v26, %v482_v49 }
 0x265   :  { %499 = vrot.lane.b32.xlu1 %v484_v52, %s2022_s4 }
 0x266   :  { %v488_v54 = vpop.permute.xlu0 %487 }
 0x267   :  { %v2247_v56 = vmul.f32 %v1903_v31, %v488_v54 }
 0x269   :  { %504 = vrot.lane.b32.xlu0 %v2247_v56, %s2023_s29  ;;  %492 = vrot.lane.b32.xlu1 %v467_v40, %s2023_s29 }
 0x2d7   :  { %v500_v36 = vpop.permute.xlu1 %499 }
 0x2d8   :  { %502 = vst.msk [vmem:[#allocation4] sm:$0xff] %vm117_vm1, %v500_v36  ;;  %508 = vst.msk [vmem:[%s2520_s5] sm:$0xff] %vm117_vm1, %v500_v36 }
 0x2db   :  { %v505_v58 = vpop.permute.xlu0 %504  ;;  %v493_v60 = vpop.permute.xlu1 %492 }
 0x2dc   :  { %507 = vst.msk [vmem:[#allocation4] sm:$0xff] %vm496_vm2, %v505_v58 }
 0x2dd   :  { %495 = vst.msk [vmem:[#allocation5] sm:$0xff] %vm117_vm1, %v493_v60 }
 0x2de   :  { %497 = vst.msk [vmem:[#allocation5] sm:$0xff] %vm496_vm2, %v478_v44 }
 0x2e3   :  { %v514_v61 = vld [vmem:[#allocation4] sm:$0xff] }
 0x2e4   :  { %1678 = vmatmul.mubr.msk.f32.vlgmr.msra.gmra.mrb[8].mxu1 %vm63_vm0, %v514_v61 }
 0x2e5   :  { %1799 = vmatpush1.bf16.msra.mxu1 %v2097_v12  ;;  %896 = vmatprep.mubr.f32.mxu1 %v2020_v1  ;;  %v609_v11 = vld [vmem:[#allocation5] sm:$0xff] }
 0x2e6   :  { %1801 = vmatprep.subr.bf16.mxu1 %v2108_v16 }
 0x2e9   :  { %1803 = vmatpush1.bf16.msra.mxu1 %v2122_v20 }
 0x2ea   :  { %1805 = vmatprep.subr.bf16.mxu1 %v2147_v27 }
 0x2ed   :  { %1807 = vmatpush1.bf16.msra.mxu1 %v2154_v29 }
 0x2ee   :  { %1809 = vmatprep.subr.bf16.mxu1 %v2164_v32 }
 0x2f1   :  { %1811 = vmatpush1.bf16.msra.mxu1 %v2182_v37 }
 0x2f2   :  { %1829 = vmatprep.subr.bf16.mxu1 %v2085_v8 }
 0x3b7   :  { %v584_v63 = vpop.f32.mrb[8].mxu1 }
 0x3b8   :  { %v591_v2 = vadd.f32 %v584_v63, %v2217_v50  ;;  %v586_v5 = vpop.f32.mrb[9].mxu1 }
 0x3b9   :  { %v594_v6 = vadd.f32 %v586_v5, %v2231_v0 }
 0x3ba   :  { %1908 = vtanh.f32 %v591_v2  ;;  %v1679_v13 = vmul.f32 -1.442695, %v591_v2 }
 0x3bb   :  { %1910 = vtanh.f32 %v594_v6  ;;  %v1680_v14 = vmul.f32 -1.442695, %v594_v6 }
 0x3bc   :  { %1912 = vpow2.f32 %v1679_v13 }
 0x3bd   :  { %1914 = vpow2.f32 %v1680_v14 }
 0x3c4   :  { %v1909_v7 = vpop.eup %1908 }
 0x3c5   :  { %v1911_v10 = vpop.eup %1910  ;;  %616 = vrot.lane.b32.xlu0 %v1909_v7, %s2021_s26 }
 0x3c6   :  { %627 = vrot.lane.b32.xlu1 %v1911_v10, %s2021_s26  ;;  %v1913_v15 = vpop.eup %1912 }
 0x3c7   :  { %v1915_v50 = vpop.eup %1914  ;;  %v598_v17 = vadd.f32 1.0, %v1913_v15 }
 0x3c8   :  { %v604_v18 = vadd.f32 1.0, %v1915_v50 }
 0x3c9   :  { %611 = vrot.lane.b32.xlu0 %v609_v11, %s2021_s26  ;;  %1916 = vrcp.f32 %v598_v17 }
 0x3ca   :  { %1918 = vrcp.f32 %v604_v18 }
 0x3d3   :  { %v1917_v0 = vpop.eup %1916 }
 0x3d4   :  { %v1919_v21 = vpop.eup %1918 }
 0x3d5   :  { %v625_v30 = vmul.f32 %v1919_v21, %v609_v11 }
 0x437   :  { %v617_v19 = vpop.permute.xlu0 %616 }
 0x438   :  { %v619_v22 = vmul.f32 %v1917_v0, %v617_v19  ;;  %v628_v23 = vpop.permute.xlu1 %627 }
 0x439   :  { %v630_v24 = vmul.f32 %v1919_v21, %v628_v23 }
 0x43a   :  { %621 = vrot.lane.b32.xlu1 %v619_v22, %s2021_s26 }
 0x43b   :  { %632 = vrot.lane.b32.xlu0 %v630_v24, %s2021_s26  ;;  %v612_v25 = vpop.permute.xlu0 %611 }
 0x43c   :  { %v614_v26 = vmul.f32 %v1917_v0, %v612_v25 }
 0x4ac   :  { %v622_v28 = vpop.permute.xlu1 %621 }
 0x4ad   :  { %v624_v31 = vadd.f32 %v622_v28, %v614_v26  ;;  %v633_v33 = vpop.permute.xlu0 %632 }
 0x4ae   :  { %v635_v34 = vadd.f32 %v633_v33, %v625_v30 }
 0x4af   :  { %1920 = vtanh.f32 %v624_v31 }
 0x4b0   :  { %1922 = vtanh.f32 %v635_v34 }
 0x4b9   :  { %v1921_v35 = vpop.eup %1920 }
 0x4ba   :  { %v1923_v38 = vpop.eup %1922  ;;  %638 = vrot.lane.b32.xlu1 %v1921_v35, %s2021_s26 }
 0x4bb   :  { %644 = vrot.lane.b32.xlu0 %v1923_v38, %s2021_s26 }
 0x52c   :  { %v639_v39 = vpop.permute.xlu1 %638 }
 0x52d   :  { %v641_v40 = vmul.f32 %v1917_v0, %v639_v39  ;;  %v645_v41 = vpop.permute.xlu0 %644 }
 0x52e   :  { %v2279_v43 = vmul.f32 %v1919_v21, %v645_v41 }
 0x52f   :  { %655 = vrot.lane.b32.xlu1 %v641_v40, %s2022_s4 }
 0x530   :  { %660 = vrot.lane.b32.xlu0 %v2279_v43, %s2023_s29 }
 0x533   :  { %649 = vrot.lane.b32.xlu1 %v624_v31, %s2023_s29 }
 0x5a1   :  { %v656_v44 = vpop.permute.xlu1 %655 }
 0x5a2   :  { %658 = vst.msk [vmem:[#allocation4] sm:$0xff] %vm117_vm1, %v656_v44  ;;  %1681 = vst.msk [vmem:[%s2520_s5 + $0x8] sm:$0xff] %vm117_vm1, %v656_v44  ;;  %v661_v45 = vpop.permute.xlu0 %660 }
 0x5a3   :  { %663 = vst.msk [vmem:[#allocation4] sm:$0xff] %vm496_vm2, %v661_v45 }
 0x5a5   :  { %v650_v47 = vpop.permute.xlu1 %649 }
 0x5a6   :  { %652 = vst.msk [vmem:[#allocation5] sm:$0xff] %vm117_vm1, %v650_v47 }
 0x5a7   :  { %653 = vst.msk [vmem:[#allocation5] sm:$0xff] %vm496_vm2, %v635_v34 }
 0x5aa   :  { %v671_v49 = vld [vmem:[#allocation4] sm:$0xff] }
 0x5ab   :  { %1683 = vmatmul.mubr.msk.f32.vlgmr.msra.gmra.mrb[10].mxu0 %vm63_vm0, %v671_v49 }
 0x5ac   :  { %1815 = vmatpush1.bf16.msra.mxu0 %v2097_v12  ;;  %1053 = vmatprep.mubr.f32.mxu0 %v2020_v1 }
 0x5ad   :  { %1817 = vmatprep.subr.bf16.mxu0 %v2108_v16 }
 0x5ae   :  { %v766_v63 = vld [vmem:[#allocation5] sm:$0xff] }
 0x5b0   :  { %1819 = vmatpush1.bf16.msra.mxu0 %v2122_v20 }
 0x5b1   :  { %1821 = vmatprep.subr.bf16.mxu0 %v2147_v27 }
 0x5b4   :  { %1823 = vmatpush1.bf16.msra.mxu0 %v2154_v29 }
 0x5b5   :  { %1825 = vmatprep.subr.bf16.mxu0 %v2164_v32 }
 0x5b8   :  { %1827 = vmatpush1.bf16.msra.mxu0 %v2182_v37 }
 0x5b9   :  { %1845 = vmatprep.subr.bf16.mxu0 %v2085_v8 }
 0x67e   :  { %v741_v52 = vpop.f32.mrb[10].mxu0 }
 0x67f   :  { %v748_v54 = vadd.f32 %v741_v52, %v2211_v42  ;;  %v743_v36 = vpop.f32.mrb[11].mxu0 }
 0x680   :  { %v751_v58 = vadd.f32 %v743_v36, %v2237_v9 }
 0x681   :  { %1924 = vtanh.f32 %v748_v54  ;;  %v1684_v2 = vmul.f32 -1.442695, %v748_v54 }
 0x682   :  { %1926 = vtanh.f32 %v751_v58  ;;  %v1685_v5 = vmul.f32 -1.442695, %v751_v58 }
 0x683   :  { %1928 = vpow2.f32 %v1684_v2 }
 0x684   :  { %1930 = vpow2.f32 %v1685_v5 }
 0x68b   :  { %v1925_v60 = vpop.eup %1924 }
 0x68c   :  { %v1927_v61 = vpop.eup %1926  ;;  %773 = vrot.lane.b32.xlu0 %v1925_v60, %s2021_s26 }
 0x68d   :  { %784 = vrot.lane.b32.xlu1 %v1927_v61, %s2021_s26  ;;  %v1929_v6 = vpop.eup %1928 }
 0x68e   :  { %v1931_v42 = vpop.eup %1930  ;;  %v755_v7 = vadd.f32 1.0, %v1929_v6 }
 0x68f   :  { %v761_v10 = vadd.f32 1.0, %v1931_v42 }
 0x690   :  { %768 = vrot.lane.b32.xlu0 %v766_v63, %s2021_s26  ;;  %1932 = vrcp.f32 %v755_v7 }
 0x691   :  { %1934 = vrcp.f32 %v761_v10 }
 0x69a   :  { %v1933_v9 = vpop.eup %1932 }
 0x69b   :  { %v1935_v13 = vpop.eup %1934 }
 0x69c   :  { %v782_v19 = vmul.f32 %v1935_v13, %v766_v63 }
 0x6fe   :  { %v774_v11 = vpop.permute.xlu0 %773 }
 0x6ff   :  { %v776_v14 = vmul.f32 %v1933_v9, %v774_v11  ;;  %v785_v15 = vpop.permute.xlu1 %784 }
 0x700   :  { %v787_v50 = vmul.f32 %v1935_v13, %v785_v15 }
 0x701   :  { %778 = vrot.lane.b32.xlu1 %v776_v14, %s2021_s26 }
 0x702   :  { %789 = vrot.lane.b32.xlu0 %v787_v50, %s2021_s26  ;;  %v769_v17 = vpop.permute.xlu0 %768 }
 0x703   :  { %v771_v18 = vmul.f32 %v1933_v9, %v769_v17 }
 0x773   :  { %v779_v0 = vpop.permute.xlu1 %778 }
 0x774   :  { %v781_v21 = vadd.f32 %v779_v0, %v771_v18  ;;  %v790_v22 = vpop.permute.xlu0 %789 }
 0x775   :  { %v792_v23 = vadd.f32 %v790_v22, %v782_v19 }
 0x776   :  { %1936 = vtanh.f32 %v781_v21 }
 0x777   :  { %1938 = vtanh.f32 %v792_v23 }
 0x780   :  { %v1937_v24 = vpop.eup %1936 }
 0x781   :  { %v1939_v25 = vpop.eup %1938  ;;  %795 = vrot.lane.b32.xlu1 %v1937_v24, %s2021_s26 }
 0x782   :  { %801 = vrot.lane.b32.xlu0 %v1939_v25, %s2021_s26 }
 0x7f3   :  { %v796_v26 = vpop.permute.xlu1 %795 }
 0x7f4   :  { %v798_v28 = vmul.f32 %v1933_v9, %v796_v26  ;;  %v802_v30 = vpop.permute.xlu0 %801 }
 0x7f5   :  { %v2312_v31 = vmul.f32 %v1935_v13, %v802_v30 }
 0x7f6   :  { %812 = vrot.lane.b32.xlu1 %v798_v28, %s2022_s4 }
 0x7f7   :  { %817 = vrot.lane.b32.xlu0 %v2312_v31, %s2023_s29 }
 0x7fa   :  { %806 = vrot.lane.b32.xlu1 %v781_v21, %s2023_s29 }
 0x868   :  { %v813_v33 = vpop.permute.xlu1 %812 }
 0x869   :  { %815 = vst.msk [vmem:[#allocation4] sm:$0xff] %vm117_vm1, %v813_v33  ;;  %1686 = vst.msk [vmem:[%s2520_s5 + $0x10] sm:$0xff] %vm117_vm1, %v813_v33  ;;  %v818_v34 = vpop.permute.xlu0 %817 }
 0x86a   :  { %820 = vst.msk [vmem:[#allocation4] sm:$0xff] %vm496_vm2, %v818_v34 }
 0x86c   :  { %v807_v35 = vpop.permute.xlu1 %806 }
 0x86d   :  { %809 = vst.msk [vmem:[#allocation5] sm:$0xff] %vm117_vm1, %v807_v35 }
 0x86e   :  { %810 = vst.msk [vmem:[#allocation5] sm:$0xff] %vm496_vm2, %v792_v23 }
 0x871   :  { %v828_v38 = vld [vmem:[#allocation4] sm:$0xff] }
 0x872   :  { %1688 = vmatmul.mubr.msk.f32.vlgmr.msra.gmra.mrb[10].mxu1 %vm63_vm0, %v828_v38 }
 0x873   :  { %1831 = vmatpush1.bf16.msra.mxu1 %v2097_v12  ;;  %1210 = vmatprep.mubr.f32.mxu1 %v2020_v1 }
 0x874   :  { %1833 = vmatprep.subr.bf16.mxu1 %v2108_v16 }
 0x875   :  { %v923_v49 = vld [vmem:[#allocation5] sm:$0xff] }
 0x877   :  { %1835 = vmatpush1.bf16.msra.mxu1 %v2122_v20 }
 0x878   :  { %1837 = vmatprep.subr.bf16.mxu1 %v2147_v27 }
 0x87b   :  { %1839 = vmatpush1.bf16.msra.mxu1 %v2154_v29 }
 0x87c   :  { %1841 = vmatprep.subr.bf16.mxu1 %v2164_v32 }
 0x87f   :  { %1843 = vmatpush1.bf16.msra.mxu1 %v2182_v37 }
 0x880   :  { %1861 = vmatprep.subr.bf16.mxu1 %v2085_v8 }
 0x945   :  { %v898_v39 = vpop.f32.mrb[10].mxu1 }
 0x946   :  { %v905_v40 = vadd.f32 %v898_v39, %v2213_v46  ;;  %v900_v41 = vpop.f32.mrb[11].mxu1 }
 0x947   :  { %v908_v44 = vadd.f32 %v900_v41, %v2235_v4 }
 0x948   :  { %1940 = vtanh.f32 %v905_v40  ;;  %v1689_v52 = vmul.f32 -1.442695, %v905_v40 }
 0x949   :  { %1942 = vtanh.f32 %v908_v44  ;;  %v1690_v54 = vmul.f32 -1.442695, %v908_v44 }
 0x94a   :  { %1944 = vpow2.f32 %v1689_v52 }
 0x94b   :  { %1946 = vpow2.f32 %v1690_v54 }
 0x952   :  { %v1941_v45 = vpop.eup %1940 }
 0x953   :  { %v1943_v47 = vpop.eup %1942  ;;  %930 = vrot.lane.b32.xlu0 %v1941_v45, %s2021_s26 }
 0x954   :  { %941 = vrot.lane.b32.xlu1 %v1943_v47, %s2021_s26  ;;  %v1945_v8 = vpop.eup %1944 }
 0x955   :  { %v1947_v46 = vpop.eup %1946  ;;  %v912_v36 = vadd.f32 1.0, %v1945_v8 }
 0x956   :  { %v918_v58 = vadd.f32 1.0, %v1947_v46 }
 0x957   :  { %925 = vrot.lane.b32.xlu0 %v923_v49, %s2021_s26  ;;  %1948 = vrcp.f32 %v912_v36 }
 0x958   :  { %1950 = vrcp.f32 %v918_v58 }
 0x961   :  { %v1949_v4 = vpop.eup %1948 }
 0x962   :  { %v1951_v61 = vpop.eup %1950 }
 0x963   :  { %v939_v10 = vmul.f32 %v1951_v61, %v923_v49 }
 0x9c5   :  { %v931_v60 = vpop.permute.xlu0 %930 }
 0x9c6   :  { %v933_v63 = vmul.f32 %v1949_v4, %v931_v60  ;;  %v942_v2 = vpop.permute.xlu1 %941 }
 0x9c7   :  { %v944_v5 = vmul.f32 %v1951_v61, %v942_v2 }
 0x9c8   :  { %935 = vrot.lane.b32.xlu1 %v933_v63, %s2021_s26 }
 0x9c9   :  { %946 = vrot.lane.b32.xlu0 %v944_v5, %s2021_s26  ;;  %v926_v6 = vpop.permute.xlu0 %925 }
 0x9ca   :  { %v928_v42 = vmul.f32 %v1949_v4, %v926_v6 }
 0xa3a   :  { %v936_v7 = vpop.permute.xlu1 %935 }
 0xa3b   :  { %v938_v9 = vadd.f32 %v936_v7, %v928_v42  ;;  %v947_v11 = vpop.permute.xlu0 %946 }
 0xa3c   :  { %v949_v13 = vadd.f32 %v947_v11, %v939_v10 }
 0xa3d   :  { %1952 = vtanh.f32 %v938_v9 }
 0xa3e   :  { %1954 = vtanh.f32 %v949_v13 }
 0xa47   :  { %v1953_v14 = vpop.eup %1952 }
 0xa48   :  { %v1955_v15 = vpop.eup %1954  ;;  %952 = vrot.lane.b32.xlu1 %v1953_v14, %s2021_s26 }
 0xa49   :  { %958 = vrot.lane.b32.xlu0 %v1955_v15, %s2021_s26 }
 0xaba   :  { %v953_v50 = vpop.permute.xlu1 %952 }
 0xabb   :  { %v955_v17 = vmul.f32 %v1949_v4, %v953_v50  ;;  %v959_v18 = vpop.permute.xlu0 %958 }
 0xabc   :  { %v2345_v0 = vmul.f32 %v1951_v61, %v959_v18 }
 0xabd   :  { %969 = vrot.lane.b32.xlu1 %v955_v17, %s2022_s4 }
 0xabe   :  { %974 = vrot.lane.b32.xlu0 %v2345_v0, %s2023_s29 }
 0xac1   :  { %963 = vrot.lane.b32.xlu1 %v938_v9, %s2023_s29 }
 0xb2f   :  { %v970_v19 = vpop.permute.xlu1 %969 }
 0xb30   :  { %972 = vst.msk [vmem:[#allocation4] sm:$0xff] %vm117_vm1, %v970_v19  ;;  %1691 = vst.msk [vmem:[%s2520_s5 + $0x18] sm:$0xff] %vm117_vm1, %v970_v19  ;;  %v975_v21 = vpop.permute.xlu0 %974 }
 0xb31   :  { %977 = vst.msk [vmem:[#allocation4] sm:$0xff] %vm496_vm2, %v975_v21 }
 0xb33   :  { %v964_v22 = vpop.permute.xlu1 %963 }
 0xb34   :  { %966 = vst.msk [vmem:[#allocation5] sm:$0xff] %vm117_vm1, %v964_v22 }
 0xb35   :  { %967 = vst.msk [vmem:[#allocation5] sm:$0xff] %vm496_vm2, %v949_v13 }
 0xb38   :  { %v985_v23 = vld [vmem:[#allocation4] sm:$0xff] }
 0xb39   :  { %1693 = vmatmul.mubr.msk.f32.vlgmr.msra.gmra.mrb[12].mxu0 %vm63_vm0, %v985_v23 }
 0xb3a   :  { %1847 = vmatpush1.bf16.msra.mxu0 %v2097_v12  ;;  %1367 = vmatprep.mubr.f32.mxu0 %v2020_v1 }
 0xb3b   :  { %1849 = vmatprep.subr.bf16.mxu0 %v2108_v16 }
 0xb3c   :  { %v1080_v34 = vld [vmem:[#allocation5] sm:$0xff] }
 0xb3e   :  { %1851 = vmatpush1.bf16.msra.mxu0 %v2122_v20 }
 0xb3f   :  { %1853 = vmatprep.subr.bf16.mxu0 %v2147_v27 }
 0xb42   :  { %1855 = vmatpush1.bf16.msra.mxu0 %v2154_v29 }
 0xb43   :  { %1857 = vmatprep.subr.bf16.mxu0 %v2164_v32 }
 0xb46   :  { %1859 = vmatpush1.bf16.msra.mxu0 %v2182_v37 }
 0xc0c   :  { %v1055_v24 = vpop.f32.mrb[12].mxu0 }
 0xc0d   :  { %v1062_v25 = vadd.f32 %v1055_v24, %v2227_v59  ;;  %v1057_v26 = vpop.f32.mrb[13].mxu0 }
 0xc0e   :  { %v1065_v28 = vadd.f32 %v1057_v26, %v2221_v53 }
 0xc0f   :  { %1956 = vtanh.f32 %v1062_v25  ;;  %v1694_v35 = vmul.f32 -1.442695, %v1062_v25 }
 0xc10   :  { %1958 = vtanh.f32 %v1065_v28  ;;  %v1695_v38 = vmul.f32 -1.442695, %v1065_v28 }
 0xc11   :  { %1960 = vpow2.f32 %v1694_v35 }
 0xc12   :  { %1962 = vpow2.f32 %v1695_v38 }
 0xc19   :  { %v1957_v30 = vpop.eup %1956 }
 0xc1a   :  { %v1959_v33 = vpop.eup %1958  ;;  %1087 = vrot.lane.b32.xlu0 %v1957_v30, %s2021_s26 }
 0xc1b   :  { %1098 = vrot.lane.b32.xlu1 %v1959_v33, %s2021_s26  ;;  %v1961_v39 = vpop.eup %1960 }
 0xc1c   :  { %v1963_v59 = vpop.eup %1962  ;;  %v1069_v40 = vadd.f32 1.0, %v1961_v39 }
 0xc1d   :  { %v1075_v41 = vadd.f32 1.0, %v1963_v59 }
 0xc1e   :  { %1082 = vrot.lane.b32.xlu0 %v1080_v34, %s2021_s26  ;;  %1964 = vrcp.f32 %v1069_v40 }
 0xc1f   :  { %1966 = vrcp.f32 %v1075_v41 }
 0xc28   :  { %v1965_v53 = vpop.eup %1964 }
 0xc29   :  { %v1967_v45 = vpop.eup %1966 }
 0xc2a   :  { %v1096_v36 = vmul.f32 %v1967_v45, %v1080_v34 }
 0xc8c   :  { %v1088_v44 = vpop.permute.xlu0 %1087 }
 0xc8d   :  { %v1090_v47 = vmul.f32 %v1965_v53, %v1088_v44  ;;  %v1099_v49 = vpop.permute.xlu1 %1098 }
 0xc8e   :  { %v1101_v52 = vmul.f32 %v1967_v45, %v1099_v49 }
 0xc8f   :  { %1092 = vrot.lane.b32.xlu1 %v1090_v47, %s2021_s26 }
 0xc90   :  { %1103 = vrot.lane.b32.xlu0 %v1101_v52, %s2021_s26  ;;  %v1083_v54 = vpop.permute.xlu0 %1082 }
 0xc91   :  { %v1085_v8 = vmul.f32 %v1965_v53, %v1083_v54 }
 0xd01   :  { %v1093_v46 = vpop.permute.xlu1 %1092 }
 0xd02   :  { %v1095_v58 = vadd.f32 %v1093_v46, %v1085_v8  ;;  %v1104_v4 = vpop.permute.xlu0 %1103 }
 0xd03   :  { %v1106_v60 = vadd.f32 %v1104_v4, %v1096_v36 }
 0xd04   :  { %1968 = vtanh.f32 %v1095_v58 }
 0xd05   :  { %1970 = vtanh.f32 %v1106_v60 }
 0xd0e   :  { %v1969_v61 = vpop.eup %1968 }
 0xd0f   :  { %v1971_v63 = vpop.eup %1970  ;;  %1109 = vrot.lane.b32.xlu1 %v1969_v61, %s2021_s26 }
 0xd10   :  { %1115 = vrot.lane.b32.xlu0 %v1971_v63, %s2021_s26 }
 0xd81   :  { %v1110_v2 = vpop.permute.xlu1 %1109 }
 0xd82   :  { %v1112_v5 = vmul.f32 %v1965_v53, %v1110_v2  ;;  %v1116_v6 = vpop.permute.xlu0 %1115 }
 0xd83   :  { %v2377_v42 = vmul.f32 %v1967_v45, %v1116_v6 }
 0xd84   :  { %1126 = vrot.lane.b32.xlu1 %v1112_v5, %s2022_s4 }
 0xd85   :  { %1131 = vrot.lane.b32.xlu0 %v2377_v42, %s2023_s29 }
 0xd88   :  { %1120 = vrot.lane.b32.xlu1 %v1095_v58, %s2023_s29 }
 0xdf6   :  { %v1127_v7 = vpop.permute.xlu1 %1126 }
 0xdf7   :  { %1129 = vst.msk [vmem:[#allocation4] sm:$0xff] %vm117_vm1, %v1127_v7  ;;  %1696 = vst.msk [vmem:[%s2520_s5 + $0x20] sm:$0xff] %vm117_vm1, %v1127_v7  ;;  %v1132_v10 = vpop.permute.xlu0 %1131 }
 0xdf8   :  { %1134 = vst.msk [vmem:[#allocation4] sm:$0xff] %vm496_vm2, %v1132_v10 }
 0xdfa   :  { %v1121_v9 = vpop.permute.xlu1 %1120 }
 0xdfb   :  { %1123 = vst.msk [vmem:[#allocation5] sm:$0xff] %vm117_vm1, %v1121_v9 }
 0xdfc   :  { %1124 = vst.msk [vmem:[#allocation5] sm:$0xff] %vm496_vm2, %v1106_v60 }
 0xdff   :  { %v1142_v11 = vld [vmem:[#allocation4] sm:$0xff] }
 0xe00   :  { %1698 = vmatmul.mubr.msk.f32.vlgmr.msra.gmra.mrb[12].mxu1 %vm63_vm0, %v1142_v11 }
 0xe01   :  { %1863 = vmatpush1.bf16.msra.mxu1 %v2097_v12  ;;  %1524 = vmatprep.mubr.f32.mxu1 %v2020_v1 }
 0xe02   :  { %1865 = vmatprep.subr.bf16.mxu1 %v2108_v16 }
 0xe05   :  { %1867 = vmatpush1.bf16.msra.mxu1 %v2122_v20  ;;  %v1237_v20 = vld [vmem:[#allocation5] sm:$0xff] }
 0xe06   :  { %1869 = vmatprep.subr.bf16.mxu1 %v2147_v27 }
 0xe09   :  { %1871 = vmatpush1.bf16.msra.mxu1 %v2154_v29 }
 0xe0a   :  { %1873 = vmatprep.subr.bf16.mxu1 %v2164_v32 }
 0xe0d   :  { %1875 = vmatpush1.bf16.msra.mxu1 %v2182_v37 }
 0xed3   :  { %v1212_v13 = vpop.f32.mrb[12].mxu1 }
 0xed4   :  { %v1219_v14 = vadd.f32 %v1212_v13, %v2233_v3  ;;  %v1214_v15 = vpop.f32.mrb[13].mxu1 }
 0xed5   :  { %v1222_v12 = vadd.f32 %v1214_v15, %v2215_v48 }
 0xed6   :  { %1972 = vtanh.f32 %v1219_v14  ;;  %v1699_v27 = vmul.f32 -1.442695, %v1219_v14 }
 0xed7   :  { %1974 = vtanh.f32 %v1222_v12  ;;  %v1700_v29 = vmul.f32 -1.442695, %v1222_v12 }
 0xed8   :  { %1976 = vpow2.f32 %v1699_v27 }
 0xed9   :  { %1978 = vpow2.f32 %v1700_v29 }
 0xee0   :  { %v1973_v1 = vpop.eup %1972 }
 0xee1   :  { %v1975_v16 = vpop.eup %1974  ;;  %1244 = vrot.lane.b32.xlu0 %v1973_v1, %s2021_s26 }
 0xee2   :  { %1255 = vrot.lane.b32.xlu1 %v1975_v16, %s2021_s26  ;;  %v1977_v32 = vpop.eup %1976 }
 0xee3   :  { %v1979_v37 = vpop.eup %1978  ;;  %v1226_v3 = vadd.f32 1.0, %v1977_v32 }
 0xee4   :  { %v1232_v50 = vadd.f32 1.0, %v1979_v37 }
 0xee5   :  { %1239 = vrot.lane.b32.xlu0 %v1237_v20, %s2021_s26  ;;  %1980 = vrcp.f32 %v1226_v3 }
 0xee6   :  { %1982 = vrcp.f32 %v1232_v50 }
 0xeef   :  { %v1981_v48 = vpop.eup %1980 }
 0xef0   :  { %v1983_v18 = vpop.eup %1982 }
 0xef1   :  { %v1253_v26 = vmul.f32 %v1983_v18, %v1237_v20 }
 0xf53   :  { %v1245_v17 = vpop.permute.xlu0 %1244 }
 0xf54   :  { %v1247_v19 = vmul.f32 %v1981_v48, %v1245_v17  ;;  %v1256_v21 = vpop.permute.xlu1 %1255 }
 0xf55   :  { %v1258_v22 = vmul.f32 %v1983_v18, %v1256_v21 }
 0xf56   :  { %1249 = vrot.lane.b32.xlu1 %v1247_v19, %s2021_s26 }
 0xf57   :  { %1260 = vrot.lane.b32.xlu0 %v1258_v22, %s2021_s26  ;;  %v1240_v23 = vpop.permute.xlu0 %1239 }
 0xf58   :  { %v1242_v24 = vmul.f32 %v1981_v48, %v1240_v23 }
 0xfc8   :  { %v1250_v25 = vpop.permute.xlu1 %1249 }
 0xfc9   :  { %v1252_v28 = vadd.f32 %v1250_v25, %v1242_v24  ;;  %v1261_v30 = vpop.permute.xlu0 %1260 }
 0xfca   :  { %v1263_v33 = vadd.f32 %v1261_v30, %v1253_v26 }
 0xfcb   :  { %1984 = vtanh.f32 %v1252_v28 }
 0xfcc   :  { %1986 = vtanh.f32 %v1263_v33 }
 0xfd5   :  { %v1985_v34 = vpop.eup %1984 }
 0xfd6   :  { %v1987_v35 = vpop.eup %1986  ;;  %1266 = vrot.lane.b32.xlu1 %v1985_v34, %s2021_s26 }
 0xfd7   :  { %1272 = vrot.lane.b32.xlu0 %v1987_v35, %s2021_s26 }
0x1048   :  { %v1267_v38 = vpop.permute.xlu1 %1266 }
0x1049   :  { %v1269_v39 = vmul.f32 %v1981_v48, %v1267_v38  ;;  %v1273_v59 = vpop.permute.xlu0 %1272 }
0x104a   :  { %v2409_v40 = vmul.f32 %v1983_v18, %v1273_v59 }
0x104b   :  { %1283 = vrot.lane.b32.xlu1 %v1269_v39, %s2022_s4 }
0x104c   :  { %1288 = vrot.lane.b32.xlu0 %v2409_v40, %s2023_s29 }
0x104f   :  { %1277 = vrot.lane.b32.xlu1 %v1252_v28, %s2023_s29 }
0x10bd   :  { %v1284_v41 = vpop.permute.xlu1 %1283 }
0x10be   :  { %1286 = vst.msk [vmem:[#allocation4] sm:$0xff] %vm117_vm1, %v1284_v41  ;;  %1701 = vst.msk [vmem:[%s2520_s5 + $0x28] sm:$0xff] %vm117_vm1, %v1284_v41  ;;  %v1289_v53 = vpop.permute.xlu0 %1288 }
0x10bf   :  { %1291 = vst.msk [vmem:[#allocation4] sm:$0xff] %vm496_vm2, %v1289_v53 }
0x10c1   :  { %v1278_v44 = vpop.permute.xlu1 %1277 }
0x10c2   :  { %1280 = vst.msk [vmem:[#allocation5] sm:$0xff] %vm117_vm1, %v1278_v44 }
0x10c3   :  { %1281 = vst.msk [vmem:[#allocation5] sm:$0xff] %vm496_vm2, %v1263_v33 }
0x10c6   :  { %v1299_v45 = vld [vmem:[#allocation4] sm:$0xff] }
0x10c7   :  { %1703 = vmatmul.mubr.msk.f32.vlgmr.msra.gmra.mrb[14].mxu0 %vm63_vm0, %v1299_v45 }
0x10ca   :  { %v1394_v36 = vld [vmem:[#allocation5] sm:$0xff] }
0x119a   :  { %v1369_v47 = vpop.f32.mrb[14].mxu0 }
0x119b   :  { %v1376_v49 = vadd.f32 %v1369_v47, %v2225_v57  ;;  %v1371_v52 = vpop.f32.mrb[15].mxu0 }
0x119c   :  { %v1379_v54 = vadd.f32 %v1371_v52, %v2223_v55 }
0x119d   :  { %1988 = vtanh.f32 %v1376_v49  ;;  %v1704_v58 = vmul.f32 -1.442695, %v1376_v49 }
0x119e   :  { %1990 = vtanh.f32 %v1379_v54  ;;  %v1705_v4 = vmul.f32 -1.442695, %v1379_v54 }
0x119f   :  { %1992 = vpow2.f32 %v1704_v58 }
0x11a0   :  { %1994 = vpow2.f32 %v1705_v4 }
0x11a7   :  { %v1989_v8 = vpop.eup %1988 }
0x11a8   :  { %v1991_v46 = vpop.eup %1990  ;;  %1401 = vrot.lane.b32.xlu0 %v1989_v8, %s2021_s26 }
0x11a9   :  { %1412 = vrot.lane.b32.xlu1 %v1991_v46, %s2021_s26  ;;  %v1993_v60 = vpop.eup %1992 }
0x11aa   :  { %v1995_v57 = vpop.eup %1994  ;;  %v1383_v61 = vadd.f32 1.0, %v1993_v60 }
0x11ab   :  { %v1389_v63 = vadd.f32 1.0, %v1995_v57 }
0x11ac   :  { %1396 = vrot.lane.b32.xlu0 %v1394_v36, %s2021_s26  ;;  %1996 = vrcp.f32 %v1383_v61 }
0x11ad   :  { %1998 = vrcp.f32 %v1389_v63 }
0x11b6   :  { %v1997_v55 = vpop.eup %1996 }
0x11b7   :  { %v1999_v5 = vpop.eup %1998 }
0x11b8   :  { %v1410_v14 = vmul.f32 %v1999_v5, %v1394_v36 }
0x121a   :  { %v1402_v2 = vpop.permute.xlu0 %1401 }
0x121b   :  { %v1404_v6 = vmul.f32 %v1997_v55, %v1402_v2  ;;  %v1413_v7 = vpop.permute.xlu1 %1412 }
0x121c   :  { %v1415_v10 = vmul.f32 %v1999_v5, %v1413_v7 }
0x121d   :  { %1406 = vrot.lane.b32.xlu1 %v1404_v6, %s2021_s26 }
0x121e   :  { %1417 = vrot.lane.b32.xlu0 %v1415_v10, %s2021_s26  ;;  %v1397_v9 = vpop.permute.xlu0 %1396 }
0x121f   :  { %v1399_v11 = vmul.f32 %v1997_v55, %v1397_v9 }
0x128f   :  { %v1407_v13 = vpop.permute.xlu1 %1406 }
0x1290   :  { %v1409_v15 = vadd.f32 %v1407_v13, %v1399_v11  ;;  %v1418_v12 = vpop.permute.xlu0 %1417 }
0x1291   :  { %v1420_v1 = vadd.f32 %v1418_v12, %v1410_v14 }
0x1292   :  { %2000 = vtanh.f32 %v1409_v15 }
0x1293   :  { %2002 = vtanh.f32 %v1420_v1 }
0x129c   :  { %v2001_v16 = vpop.eup %2000 }
0x129d   :  { %v2003_v20 = vpop.eup %2002  ;;  %1423 = vrot.lane.b32.xlu1 %v2001_v16, %s2021_s26 }
0x129e   :  { %1429 = vrot.lane.b32.xlu0 %v2003_v20, %s2021_s26 }
0x130f   :  { %v1424_v27 = vpop.permute.xlu1 %1423 }
0x1310   :  { %v1426_v29 = vmul.f32 %v1997_v55, %v1424_v27  ;;  %v1430_v32 = vpop.permute.xlu0 %1429 }
0x1311   :  { %v2433_v37 = vmul.f32 %v1999_v5, %v1430_v32 }
0x1312   :  { %1440 = vrot.lane.b32.xlu1 %v1426_v29, %s2022_s4 }
0x1313   :  { %1445 = vrot.lane.b32.xlu0 %v2433_v37, %s2023_s29 }
0x1316   :  { %1434 = vrot.lane.b32.xlu1 %v1409_v15, %s2023_s29 }
0x1384   :  { %v1441_v3 = vpop.permute.xlu1 %1440 }
0x1385   :  { %1443 = vst.msk [vmem:[#allocation4] sm:$0xff] %vm117_vm1, %v1441_v3  ;;  %1706 = vst.msk [vmem:[%s2520_s5 + $0x30] sm:$0xff] %vm117_vm1, %v1441_v3  ;;  %v1446_v50 = vpop.permute.xlu0 %1445 }
0x1386   :  { %1448 = vst.msk [vmem:[#allocation4] sm:$0xff] %vm496_vm2, %v1446_v50 }
0x1388   :  { %v1435_v48 = vpop.permute.xlu1 %1434 }
0x1389   :  { %1437 = vst.msk [vmem:[#allocation5] sm:$0xff] %vm117_vm1, %v1435_v48 }
0x138a   :  { %1438 = vst.msk [vmem:[#allocation5] sm:$0xff] %vm496_vm2, %v1420_v1 }
0x138d   :  { %v1456_v17 = vld [vmem:[#allocation4] sm:$0xff] }
0x138e   :  { %1708 = vmatmul.mubr.msk.f32.vlgmr.msra.gmra.mrb[14].mxu1 %vm63_vm0, %v1456_v17 }
0x1391   :  { %v1550_v25 = vld [vmem:[#allocation5] sm:$0xff] }
0x1461   :  { %v1526_v18 = vpop.f32.mrb[14].mxu1 }
0x1462   :  { %v1533_v19 = vadd.f32 %v1526_v18, %v2229_v62  ;;  %v1528_v21 = vpop.f32.mrb[15].mxu1 }
0x1463   :  { %v1535_v22 = vadd.f32 %v1528_v21, %v2219_v51 }
0x1464   :  { %2004 = vtanh.f32 %v1533_v19  ;;  %v1709_v26 = vmul.f32 -1.442695, %v1533_v19 }
0x1465   :  { %2006 = vtanh.f32 %v1535_v22  ;;  %v1710_v28 = vmul.f32 -1.442695, %v1535_v22 }
0x1466   :  { %2008 = vpow2.f32 %v1709_v26 }
0x1467   :  { %2010 = vpow2.f32 %v1710_v28 }
0x146e   :  { %v2005_v23 = vpop.eup %2004 }
0x146f   :  { %v2007_v24 = vpop.eup %2006  ;;  %1557 = vrot.lane.b32.xlu0 %v2005_v23, %s2021_s26 }
0x1470   :  { %1568 = vrot.lane.b32.xlu1 %v2007_v24, %s2021_s26  ;;  %v2009_v30 = vpop.eup %2008 }
0x1471   :  { %v2011_v62 = vpop.eup %2010  ;;  %v1539_v33 = vadd.f32 1.0, %v2009_v30 }
0x1472   :  { %v1545_v34 = vadd.f32 1.0, %v2011_v62 }
0x1473   :  { %1552 = vrot.lane.b32.xlu0 %v1550_v25, %s2021_s26  ;;  %2012 = vrcp.f32 %v1539_v33 }
0x1474   :  { %2014 = vrcp.f32 %v1545_v34 }
0x147d   :  { %v2013_v51 = vpop.eup %2012 }
0x147e   :  { %v2015_v38 = vpop.eup %2014 }
0x147f   :  { %v1566_v47 = vmul.f32 %v2015_v38, %v1550_v25 }
0x14e1   :  { %v1558_v35 = vpop.permute.xlu0 %1557 }
0x14e2   :  { %v1560_v39 = vmul.f32 %v2013_v51, %v1558_v35  ;;  %v1569_v59 = vpop.permute.xlu1 %1568 }
0x14e3   :  { %v1571_v41 = vmul.f32 %v2015_v38, %v1569_v59 }
0x14e4   :  { %1562 = vrot.lane.b32.xlu1 %v1560_v39, %s2021_s26 }
0x14e5   :  { %1573 = vrot.lane.b32.xlu0 %v1571_v41, %s2021_s26  ;;  %v1553_v53 = vpop.permute.xlu0 %1552 }
0x14e6   :  { %v1555_v44 = vmul.f32 %v2013_v51, %v1553_v53 }
0x1556   :  { %v1563_v45 = vpop.permute.xlu1 %1562 }
0x1557   :  { %v1565_v49 = vadd.f32 %v1563_v45, %v1555_v44  ;;  %v1574_v52 = vpop.permute.xlu0 %1573 }
0x1558   :  { %v1576_v54 = vadd.f32 %v1574_v52, %v1566_v47 }
0x1559   :  { %2016 = vtanh.f32 %v1565_v49 }
0x155a   :  { %2018 = vtanh.f32 %v1576_v54 }
0x1563   :  { %v2017_v8 = vpop.eup %2016 }
0x1564   :  { %v2019_v46 = vpop.eup %2018  ;;  %1579 = vrot.lane.b32.xlu1 %v2017_v8, %s2021_s26 }
0x1565   :  { %1585 = vrot.lane.b32.xlu0 %v2019_v46, %s2021_s26 }
0x1568   :  { %1590 = vrot.lane.b32.xlu1 %v1565_v49, %s2023_s29 }
0x1569   :  { %666 = vrot.lane.b32.xlu0 %v2279_v43, %s2022_s4 }
0x156c   :  { %509 = vrot.lane.b32.xlu1 %v2247_v56, %s2022_s4 }
0x156d   :  { %980 = vrot.lane.b32.xlu0 %v2345_v0, %s2022_s4 }
0x1570   :  { %823 = vrot.lane.b32.xlu1 %v2312_v31, %s2022_s4 }
0x1571   :  { %1294 = vrot.lane.b32.xlu0 %v2409_v40, %s2022_s4 }
0x1574   :  { %1137 = vrot.lane.b32.xlu1 %v2377_v42, %s2022_s4 }
0x1578   :  { %1451 = vrot.lane.b32.xlu1 %v2433_v37, %s2022_s4 }
0x15d6   :  { %v1580_v36 = vpop.permute.xlu1 %1579 }
0x15d7   :  { %v1582_v43 = vmul.f32 %v2013_v51, %v1580_v36  ;;  %v1586_v58 = vpop.permute.xlu0 %1585 }
0x15d8   :  { %v1588_v4 = vmul.f32 %v2015_v38, %v1586_v58 }
0x15d9   :  { %1596 = vrot.lane.b32.xlu0 %v1582_v43, %s2022_s4 }
0x15da   :  { %1607 = vrot.lane.b32.xlu1 %v1588_v4, %s2022_s4  ;;  %v1591_v56 = vpop.permute.xlu1 %1590 }
0x15db   :  { %1593 = vst.msk [vmem:[#allocation5] sm:$0xff] %vm117_vm1, %v1591_v56  ;;  %v667_v31 = vpop.permute.xlu0 %666 }
0x15dc   :  { %1594 = vst.msk [vmem:[#allocation5] sm:$0xff] %vm496_vm2, %v1576_v54 }
0x15dd   :  { %1682 = vst.msk [vmem:[%s2521_s6 + $0x30] sm:$0xff] %vm117_vm1, %v667_v31  ;;  %1601 = vrot.lane.b32.xlu0 %v1588_v4, %s2023_s29 }
0x15de   :  { %v510_v0 = vpop.permute.xlu1 %509 }
0x15df   :  { %1677 = vst.msk [vmem:[%s2521_s6 + $0x38] sm:$0xff] %vm117_vm1, %v510_v0  ;;  %v981_v42 = vpop.permute.xlu0 %980 }
0x15e0   :  { %1692 = vst.msk [vmem:[%s2521_s6 + $0x20] sm:$0xff] %vm117_vm1, %v981_v42 }
0x15e2   :  { %v824_v40 = vpop.permute.xlu1 %823 }
0x15e3   :  { %1687 = vst.msk [vmem:[%s2521_s6 + $0x28] sm:$0xff] %vm117_vm1, %v824_v40  ;;  %v1295_v60 = vpop.permute.xlu0 %1294 }
0x15e4   :  { %1702 = vst.msk [vmem:[%s2521_s6 + $0x10] sm:$0xff] %vm117_vm1, %v1295_v60 }
0x15e6   :  { %v1138_v57 = vpop.permute.xlu1 %1137 }
0x15e7   :  { %1697 = vst.msk [vmem:[%s2521_s6 + $0x18] sm:$0xff] %vm117_vm1, %v1138_v57 }
0x15ea   :  { %v1452_v61 = vpop.permute.xlu1 %1451 }
0x15eb   :  { %1707 = vst.msk [vmem:[%s2521_s6 + $0x8] sm:$0xff] %vm117_vm1, %v1452_v61 }
0x164b   :  { %v1597_v63 = vpop.permute.xlu0 %1596 }
0x164c   :  { %1599 = vst.msk [vmem:[#allocation4] sm:$0xff] %vm117_vm1, %v1597_v63  ;;  %1711 = vst.msk [vmem:[%s2520_s5 + $0x38] sm:$0xff] %vm117_vm1, %v1597_v63  ;;  %v1608_v55 = vpop.permute.xlu1 %1607 }
0x164d   :  { %1610 = vst.msk [vmem:[%s2521_s6] sm:$0xff] %vm117_vm1, %v1608_v55 }
0x164f   :  { %v1602_v2 = vpop.permute.xlu0 %1601 }
0x1650   :  { %1604 = vst.msk [vmem:[#allocation4] sm:$0xff] %vm496_vm2, %v1602_v2 }

</bundles_post_ra>
